<compile_context>
chip_gen: v7x
topology: tpu7x:2x2x1
jax: 0.10.0
libtpu: 0.0.40
codegen_flags: <defaults>
</compile_context>

<pallas_src>
from functools import partial

import jax
import jax.numpy as jnp
from jax.experimental import pallas as pl
from jax.experimental.pallas import tpu as pltpu


# ---------------------------------------------------------------------------
# Pallas kernels
# ---------------------------------------------------------------------------
def _matmul_kernel(x_ref, w_ref, o_ref):
    """o = x @ w  (bf16 operands, f32 accumulation on the MXU)."""
    o_ref[...] = jnp.dot(x_ref[...].astype(jnp.bfloat16), w_ref[...],
                         preferred_element_type=jnp.float32)


def _bn_relu_matmul_kernel(x_ref, s_ref, w_ref, o_ref):
    """o = relu(x * scale + shift) @ w  — BN+ReLU fused as matmul prologue."""
    x = x_ref[...]
    xn = jnp.maximum(x * s_ref[0:1, :] + s_ref[1:2, :], 0.0)
    o_ref[...] = jnp.dot(xn.astype(jnp.bfloat16), w_ref[...],
                         preferred_element_type=jnp.float32)


def _bn_stats_kernel(x_ref, g_ref, b_ref, o_ref, sum_ref, ssq_ref,
                     *, m_total, tile_m, eps):
    """Accumulate per-channel sum / sum^2 across M tiles, finalize to
    (scale, shift) = (gamma*rsqrt(var+eps), beta - mean*scale) on last step."""
    i = pl.program_id(0)

    @pl.when(i == 0)
    def _():
        sum_ref[...] = jnp.zeros_like(sum_ref)
        ssq_ref[...] = jnp.zeros_like(ssq_ref)

    x = x_ref[...]
    if m_total % tile_m != 0:                # mask rows of the ragged tile
        rows = jax.lax.broadcasted_iota(jnp.int32, x.shape, 0) + i * tile_m
        x = jnp.where(rows < m_total, x, 0.0)
    sum_ref[...] += jnp.sum(x, axis=0, keepdims=True)
    ssq_ref[...] += jnp.sum(x * x, axis=0, keepdims=True)

    @pl.when(i == pl.num_programs(0) - 1)
    def _():
        inv_m = 1.0 / float(m_total)
        mean = sum_ref[...] * inv_m
        var = jnp.maximum(ssq_ref[...] * inv_m - mean * mean, 0.0)  # biased
        scale = g_ref[...] * jax.lax.rsqrt(var + eps)
        o_ref[0:1, :] = scale
        o_ref[1:2, :] = b_ref[...] - mean * scale


def _tanh_kernel(x_ref, o_ref):
    o_ref[...] = jnp.tanh(x_ref[...])


# ---------------------------------------------------------------------------
# pallas_call wrappers
# ---------------------------------------------------------------------------
def pallas_matmul(x, w, tile_m=256, tile_n=256):
    """(M, K) @ (K, Nw) -> (M, Nw) f32, tiled over M and Nw."""
    M, K = x.shape
    _, Nw = w.shape
    tm = min(tile_m, M)
    tn = Nw if Nw <= tile_n else tile_n
    return pl.pallas_call(
        _matmul_kernel,
        out_shape=jax.ShapeDtypeStruct((M, Nw), jnp.float32),
        grid=(pl.cdiv(M, tm), pl.cdiv(Nw, tn)),
        in_specs=[pl.BlockSpec((tm, K), lambda i, j: (i, 0)),
                  pl.BlockSpec((K, tn), lambda i, j: (0, j))],
        out_specs=pl.BlockSpec((tm, tn), lambda i, j: (i, j)),
        compiler_params=pltpu.CompilerParams(
            dimension_semantics=("parallel", "parallel")),
    )(x.astype(jnp.float32), w.astype(jnp.bfloat16))


def pallas_bn_relu_matmul(x, scale_shift, w, tile_m=256, tile_n=256):
    """relu(x*scale + shift) @ w with BN+ReLU fused into the prologue."""
    M, K = x.shape
    _, Nw = w.shape
    tm = min(tile_m, M)
    tn = Nw if Nw <= tile_n else tile_n
    return pl.pallas_call(
        _bn_relu_matmul_kernel,
        out_shape=jax.ShapeDtypeStruct((M, Nw), jnp.float32),
        grid=(pl.cdiv(M, tm), pl.cdiv(Nw, tn)),
        in_specs=[pl.BlockSpec((tm, K), lambda i, j: (i, 0)),
                  pl.BlockSpec((2, K), lambda i, j: (0, 0)),
                  pl.BlockSpec((K, tn), lambda i, j: (0, j))],
        out_specs=pl.BlockSpec((tm, tn), lambda i, j: (i, j)),
        compiler_params=pltpu.CompilerParams(
            dimension_semantics=("parallel", "parallel")),
    )(x.astype(jnp.float32), scale_shift, w.astype(jnp.bfloat16))


def pallas_bn_stats(x, gamma, beta, eps=1e-5, tile_m=512):
    """BatchNorm2d training-mode batch stats over (M, C) -> (2, C)=[scale;shift]."""
    M, C = x.shape
    tm = min(tile_m, M)
    return pl.pallas_call(
        partial(_bn_stats_kernel, m_total=M, tile_m=tm, eps=eps),
        out_shape=jax.ShapeDtypeStruct((2, C), jnp.float32),
        grid=(pl.cdiv(M, tm),),
        in_specs=[pl.BlockSpec((tm, C), lambda i: (i, 0)),
                  pl.BlockSpec((1, C), lambda i: (0, 0)),
                  pl.BlockSpec((1, C), lambda i: (0, 0))],
        out_specs=pl.BlockSpec((2, C), lambda i: (0, 0)),
        scratch_shapes=[pltpu.VMEM((1, C), jnp.float32),
                        pltpu.VMEM((1, C), jnp.float32)],
        compiler_params=pltpu.CompilerParams(
            dimension_semantics=("arbitrary",)),     # sequential accumulation
    )(x.astype(jnp.float32),
      gamma.reshape(1, C).astype(jnp.float32),
      beta.reshape(1, C).astype(jnp.float32))


def pallas_tanh(x2d, tile_m=8):
    """Elementwise tanh on a lane-dense (rows, H*W*C) slab."""
    M, Nw = x2d.shape
    tm = min(tile_m, M)
    return pl.pallas_call(
        _tanh_kernel,
        out_shape=jax.ShapeDtypeStruct((M, Nw), jnp.float32),
        grid=(pl.cdiv(M, tm),),
        in_specs=[pl.BlockSpec((tm, Nw), lambda i: (i, 0))],
        out_specs=pl.BlockSpec((tm, Nw), lambda i: (i, 0)),
        compiler_params=pltpu.CompilerParams(
            dimension_semantics=("parallel",)),
    )(x2d.astype(jnp.float32))


# ---------------------------------------------------------------------------
# ConvTranspose2d(k=4, s=2, p=1) overlap-add (pure data movement, left to XLA)
# ---------------------------------------------------------------------------
def overlap_add_2x(y, n, h, w, c):
    """Scatter-add the 16 (kh, kw) taps of the matmul-first output.

    y: (n*h*w, 16*c) with last-dim order (kh, kw, c).
    Each output pixel receives exactly the in-range taps:
      out[2i]   = Y[i, kh=1] + Y[i-1, kh=3]
      out[2i+1] = Y[i, kh=2] + Y[i+1, kh=0]     (same recurrence along W).
    Returns the ConvTranspose2d(k=4, s=2, p=1) result, (n, 2h, 2w, c).
    """
    y = y.reshape(n, h, w, 4, 4, c)

    def shift_m1(a, axis):      # out[i] = a[i-1]  (zero at i = 0)
        pad = [(0, 0)] * a.ndim
        pad[axis] = (1, 0)
        return jax.lax.slice_in_dim(jnp.pad(a, pad), 0, a.shape[axis], axis=axis)

    def shift_p1(a, axis):      # out[i] = a[i+1]  (zero at i = end)
        pad = [(0, 0)] * a.ndim
        pad[axis] = (0, 1)
        return jax.lax.slice_in_dim(jnp.pad(a, pad), 1, a.shape[axis] + 1,
                                    axis=axis)

    even_r = y[:, :, :, 1] + shift_m1(y[:, :, :, 3], axis=1)
    odd_r = y[:, :, :, 2] + shift_p1(y[:, :, :, 0], axis=1)
    rows = jnp.stack([even_r, odd_r], axis=2).reshape(n, 2 * h, w, 4, c)

    even_c = rows[:, :, :, 1] + shift_m1(rows[:, :, :, 3], axis=2)
    odd_c = rows[:, :, :, 2] + shift_p1(rows[:, :, :, 0], axis=2)
    return jnp.stack([even_c, odd_c], axis=3).reshape(n, 2 * h, 2 * w, c)


# ---------------------------------------------------------------------------
# Generator forward (imgSize = 32 branch)
# ---------------------------------------------------------------------------
def generator_forward(x_nchw, params):
    """x_nchw: (N, latent_dim, 1, 1).  Returns (N, channels, 32, 32)."""
    n, latent = x_nchw.shape[0], x_nchw.shape[1]
    z = x_nchw.reshape(n, latent)

    # Layer 1: ConvTranspose2d(latent, 4d, 4, 1, 0) on a 1x1 input == matmul.
    c = params["w1m"].shape[1] // 16
    a = pallas_matmul(z, params["w1m"]).reshape(n * 16, c)   # NHWC rows, 4x4
    h = w = 4

    # Layers 2-4: BN+ReLU of the previous output fused into the matmul
    # prologue, matmul-first transposed conv, then overlap-add upsampling.
    for li in (2, 3, 4):
        wmat = params[f"w{li}m"]
        c = wmat.shape[1] // 16
        ss = pallas_bn_stats(a, params[f"g{li - 1}"], params[f"b{li - 1}"])
        y = pallas_bn_relu_matmul(a, ss, wmat)               # (n*h*w, 16*c)
        img = overlap_add_2x(y, n, h, w, c)                  # (n, 2h, 2w, c)
        h, w = 2 * h, 2 * w
        a = img.reshape(n * h * w, c)

    # Final Tanh on a lane-dense (N, H*W*C) slab, then back to NCHW.
    out = pallas_tanh(a.reshape(n, h * w * c)).reshape(n, h, w, c)
    return jnp.transpose(out, (0, 3, 1, 2))


# ---------------------------------------------------------------------------
# Parameters
# ---------------------------------------------------------------------------
def init_params(key, latent_dim=16, d=32, channels=3):
    """PyTorch-layout parameters (ConvTranspose2d weight: (Cin, Cout, 4, 4))."""
    ks = jax.random.split(key, 4)
    scale = 0.05
    return {
        "w1": scale * jax.random.normal(ks[0], (latent_dim, d * 4, 4, 4), jnp.float32),
        "w2": scale * jax.random.normal(ks[1], (d * 4, d * 2, 4, 4), jnp.float32),
        "w3": scale * jax.random.normal(ks[2], (d * 2, d, 4, 4), jnp.float32),
        "w4": scale * jax.random.normal(ks[3], (d, channels, 4, 4), jnp.float32),
        # BatchNorm affine params (PyTorch init: gamma=1, beta=0)
        "g1": jnp.ones((d * 4,), jnp.float32), "b1": jnp.zeros((d * 4,), jnp.float32),
        "g2": jnp.ones((d * 2,), jnp.float32), "b2": jnp.zeros((d * 2,), jnp.float32),
        "g3": jnp.ones((d,), jnp.float32),     "b3": jnp.zeros((d,), jnp.float32),
    }


def prepare_params(raw):
    """Precompute matmul-layout bf16 weights once (hoisted out of the forward).

    W'[cin, (kh*4 + kw)*Cout + cout] = W_pt[cin, cout, kh, kw]; no kernel flip
    is needed in the matmul-first (scatter / overlap-add) formulation.
    """
    def to_matmul(w_pt):
        cin, cout = w_pt.shape[0], w_pt.shape[1]
        return (jnp.transpose(w_pt, (0, 2, 3, 1))
                .reshape(cin, 16 * cout).astype(jnp.bfloat16))

    out = {f"w{i}m": to_matmul(raw[f"w{i}"]) for i in (1, 2, 3, 4)}
    for k in ("g1", "b1", "g2", "b2", "g3", "b3"):
        out[k] = raw[k].astype(jnp.float32)
    return out


# ---------------------------------------------------------------------------
# Pure-XLA f32 reference (self-check only)
# ---------------------------------------------------------------------------
def reference_forward(x_nchw, raw, eps=1e-5):
    def conv_t(x_nhwc, w_pt, stride, pad):
        k = w_pt.shape[2]
        kern = jnp.transpose(w_pt[:, :, ::-1, ::-1], (2, 3, 0, 1))   # HWIO
        return jax.lax.conv_general_dilated(
            x_nhwc, kern, window_strides=(1, 1),
            padding=[(k - 1 - pad, k - 1 - pad)] * 2,
            lhs_dilation=(stride, stride),
            dimension_numbers=("NHWC", "HWIO", "NHWC"))

    def bn_relu(t, g, b):
        mean = jnp.mean(t, axis=(0, 1, 2), keepdims=True)
        var = jnp.mean(jnp.square(t - mean), axis=(0, 1, 2), keepdims=True)
        return jnp.maximum((t - mean) * jax.lax.rsqrt(var + eps) * g + b, 0.0)

    t = jnp.transpose(x_nchw, (0, 2, 3, 1))
    t = bn_relu(conv_t(t, raw["w1"], 1, 0), raw["g1"], raw["b1"])
    t = bn_relu(conv_t(t, raw["w2"], 2, 1), raw["g2"], raw["b2"])
    t = bn_relu(conv_t(t, raw["w3"], 2, 1), raw["g3"], raw["b3"])
    t = jnp.tanh(conv_t(t, raw["w4"], 2, 1))
    return jnp.transpose(t, (0, 3, 1, 2))


if __name__ == "__main__":
    latent_dim, d, channels, batch = 16, 32, 3, 2

    key = jax.random.PRNGKey(0)
    k_params, k_input = jax.random.split(key)
    raw = init_params(k_params, latent_dim=latent_dim, d=d, channels=channels)
    params = prepare_params(raw)        # matmul-layout bf16 weights, once

    # PyTorch-style latent input: (N, latent_dim, 1, 1), NCHW
    x = jax.random.normal(k_input, (batch, latent_dim, 1, 1), jnp.float32)

    fwd = jax.jit(generator_forward)
    out = jax.block_until_ready(fwd(x, params))

    assert out.shape == (batch, channels, 32, 32), out.shape
    assert bool(jnp.all(jnp.isfinite(out)))
    assert bool(jnp.all(jnp.abs(out) <= 1.0))      # tanh range

    # Cross-check against a pure-XLA f32 reference (loose tol for bf16 MXU).
    ref = reference_forward(x, raw)
    assert float(jnp.max(jnp.abs(out - ref))) < 0.1

    print("KERNEL_OK")
</pallas_src>

<mosaic_0001>
module attributes {stable_mosaic.version = 11 : i64} {
  func.func @_bn_stats_kernel(%arg0: i32, %arg1: memref<32x128xf32, #tpu.memory_space<vmem>>, %arg2: memref<1x128xf32, #tpu.memory_space<vmem>>, %arg3: memref<1x128xf32, #tpu.memory_space<vmem>>, %arg4: memref<2x128xf32, #tpu.memory_space<vmem>>, %arg5: memref<1x128xf32, #tpu.memory_space<vmem>>, %arg6: memref<1x128xf32, #tpu.memory_space<vmem>>) attributes {dimension_semantics = [#tpu.dimension_semantics<arbitrary>], iteration_bounds = array<i64: 1>, scalar_prefetch = 0 : i64, scratch_operands = 2 : i64, tpu.core_type = #tpu.core_type<tc>, window_params = [{transform_indices = @transform_0, window_bounds = array<i64: 32, 128>}, {pipeline_mode = #tpu.pipeline_mode<synchronous>, transform_indices = @transform_1, window_bounds = array<i64: 1, 128>}, {pipeline_mode = #tpu.pipeline_mode<synchronous>, transform_indices = @transform_2, window_bounds = array<i64: 1, 128>}, {pipeline_mode = #tpu.pipeline_mode<synchronous>, transform_indices = @transform_3, window_bounds = array<i64: 2, 128>}]} {
    %c0_i32 = arith.constant 0 : i32
    %0 = arith.cmpi eq, %arg0, %c0_i32 : i32
    %1 = arith.extui %0 : i1 to i32
    %c0_i32_0 = arith.constant 0 : i32
    %2 = arith.cmpi ne, %1, %c0_i32_0 : i32
    scf.if %2 {
      %cst_13 = arith.constant 0.000000e+00 : f32
      %18 = vector.broadcast %cst_13 : f32 to vector<1x128xf32>
      %c0_14 = arith.constant 0 : index
      %c0_15 = arith.constant 0 : index
      %19 = vector.load %arg5[%c0_14, %c0_15] : memref<1x128xf32, #tpu.memory_space<vmem>>, vector<1x128xf32>
      tpu.vector_store %arg5[%c0_14, %c0_15], %18 {strides = array<i32>} : memref<1x128xf32, #tpu.memory_space<vmem>>, vector<1x128xf32>,
      %cst_16 = arith.constant 0.000000e+00 : f32
      %20 = vector.broadcast %cst_16 : f32 to vector<1x128xf32>
      %c0_17 = arith.constant 0 : index
      %c0_18 = arith.constant 0 : index
      %21 = vector.load %arg6[%c0_17, %c0_18] : memref<1x128xf32, #tpu.memory_space<vmem>>, vector<1x128xf32>
      tpu.vector_store %arg6[%c0_17, %c0_18], %20 {strides = array<i32>} : memref<1x128xf32, #tpu.memory_space<vmem>>, vector<1x128xf32>,
    } else {
    }
    %c0 = arith.constant 0 : index
    %c0_1 = arith.constant 0 : index
    %3 = vector.load %arg1[%c0, %c0_1] : memref<32x128xf32, #tpu.memory_space<vmem>>, vector<32x128xf32>
    %c0_2 = arith.constant 0 : index
    %c0_3 = arith.constant 0 : index
    %4 = vector.load %arg5[%c0_2, %c0_3] : memref<1x128xf32, #tpu.memory_space<vmem>>, vector<1x128xf32>
    %cst = arith.constant dense<0.000000e+00> : vector<128xf32>
    %5 = vector.multi_reduction <add>, %3, %cst [0] : vector<32x128xf32> to vector<128xf32>
    %6 = vector.shape_cast %5 : vector<128xf32> to vector<1x128xf32>
    %7 = arith.addf %4, %6 : vector<1x128xf32>
    %c0_4 = arith.constant 0 : index
    %c0_5 = arith.constant 0 : index
    %8 = vector.load %arg5[%c0_4, %c0_5] : memref<1x128xf32, #tpu.memory_space<vmem>>, vector<1x128xf32>
    tpu.vector_store %arg5[%c0_4, %c0_5], %7 {strides = array<i32>} : memref<1x128xf32, #tpu.memory_space<vmem>>, vector<1x128xf32>,
    %c0_6 = arith.constant 0 : index
    %c0_7 = arith.constant 0 : index
    %9 = vector.load %arg6[%c0_6, %c0_7] : memref<1x128xf32, #tpu.memory_space<vmem>>, vector<1x128xf32>
    %10 = arith.mulf %3, %3 : vector<32x128xf32>
    %cst_8 = arith.constant dense<0.000000e+00> : vector<128xf32>
    %11 = vector.multi_reduction <add>, %10, %cst_8 [0] : vector<32x128xf32> to vector<128xf32>
    %12 = vector.shape_cast %11 : vector<128xf32> to vector<1x128xf32>
    %13 = arith.addf %9, %12 : vector<1x128xf32>
    %c0_9 = arith.constant 0 : index
    %c0_10 = arith.constant 0 : index
    %14 = vector.load %arg6[%c0_9, %c0_10] : memref<1x128xf32, #tpu.memory_space<vmem>>, vector<1x128xf32>
    tpu.vector_store %arg6[%c0_9, %c0_10], %13 {strides = array<i32>} : memref<1x128xf32, #tpu.memory_space<vmem>>, vector<1x128xf32>,
    %c0_i32_11 = arith.constant 0 : i32
    %15 = arith.cmpi eq, %arg0, %c0_i32_11 : i32
    %16 = arith.extui %15 : i1 to i32
    %c0_i32_12 = arith.constant 0 : i32
    %17 = arith.cmpi ne, %16, %c0_i32_12 : i32
    scf.if %17 {
      %c0_13 = arith.constant 0 : index
      %c0_14 = arith.constant 0 : index
      %18 = vector.load %arg5[%c0_13, %c0_14] : memref<1x128xf32, #tpu.memory_space<vmem>>, vector<1x128xf32>
      %cst_15 = arith.constant 3.125000e-02 : f32
      %19 = vector.broadcast %cst_15 : f32 to vector<1x128xf32>
      %20 = arith.mulf %18, %19 : vector<1x128xf32>
      %c0_16 = arith.constant 0 : index
      %c0_17 = arith.constant 0 : index
      %21 = vector.load %arg6[%c0_16, %c0_17] : memref<1x128xf32, #tpu.memory_space<vmem>>, vector<1x128xf32>
      %cst_18 = arith.constant 3.125000e-02 : f32
      %22 = vector.broadcast %cst_18 : f32 to vector<1x128xf32>
      %23 = arith.mulf %21, %22 : vector<1x128xf32>
      %24 = arith.mulf %20, %20 : vector<1x128xf32>
      %25 = arith.subf %23, %24 : vector<1x128xf32>
      %cst_19 = arith.constant 0.000000e+00 : f32
      %26 = vector.broadcast %cst_19 : f32 to vector<1x128xf32>
      %27 = arith.maximumf %25, %26 : vector<1x128xf32>
      %c0_20 = arith.constant 0 : index
      %c0_21 = arith.constant 0 : index
      %28 = vector.load %arg2[%c0_20, %c0_21] : memref<1x128xf32, #tpu.memory_space<vmem>>, vector<1x128xf32>
      %cst_22 = arith.constant 9.99999974E-6 : f32
      %29 = vector.broadcast %cst_22 : f32 to vector<1x128xf32>
      %30 = arith.addf %27, %29 : vector<1x128xf32>
      %31 = math.rsqrt %30 : vector<1x128xf32>
      %32 = arith.mulf %28, %31 : vector<1x128xf32>
      %c0_23 = arith.constant 0 : index
      %c0_24 = arith.constant 0 : index
      %33 = vector.load %arg4[%c0_23, %c0_24] : memref<2x128xf32, #tpu.memory_space<vmem>>, vector<1x128xf32>
      tpu.vector_store %arg4[%c0_23, %c0_24], %32 {strides = array<i32>} : memref<2x128xf32, #tpu.memory_space<vmem>>, vector<1x128xf32>,
      %c0_25 = arith.constant 0 : index
      %c0_26 = arith.constant 0 : index
      %34 = vector.load %arg3[%c0_25, %c0_26] : memref<1x128xf32, #tpu.memory_space<vmem>>, vector<1x128xf32>
      %35 = arith.mulf %20, %32 : vector<1x128xf32>
      %36 = arith.subf %34, %35 : vector<1x128xf32>
      %c1 = arith.constant 1 : index
      %c0_27 = arith.constant 0 : index
      %37 = vector.load %arg4[%c1, %c0_27] : memref<2x128xf32, #tpu.memory_space<vmem>>, vector<1x128xf32>
      tpu.vector_store %arg4[%c1, %c0_27], %36 {strides = array<i32>} : memref<2x128xf32, #tpu.memory_space<vmem>>, vector<1x128xf32>,
    } else {
    }
    return
  }
  func.func @transform_0(%arg0: i32) -> (i32, i32) {
    %c0_i32 = arith.constant 0 : i32
    %c0_i32_0 = arith.constant 0 : i32
    return %arg0, %c0_i32 : i32, i32
  }
  func.func @transform_1(%arg0: i32) -> (i32, i32) {
    %c0_i32 = arith.constant 0 : i32
    %c0_i32_0 = arith.constant 0 : i32
    %c0_i32_1 = arith.constant 0 : i32
    return %c0_i32, %c0_i32_0 : i32, i32
  }
  func.func @transform_2(%arg0: i32) -> (i32, i32) {
    %c0_i32 = arith.constant 0 : i32
    %c0_i32_0 = arith.constant 0 : i32
    %c0_i32_1 = arith.constant 0 : i32
    return %c0_i32, %c0_i32_0 : i32, i32
  }
  func.func @transform_3(%arg0: i32) -> (i32, i32) {
    %c0_i32 = arith.constant 0 : i32
    %c0_i32_0 = arith.constant 0 : i32
    %c0_i32_1 = arith.constant 0 : i32
    return %c0_i32, %c0_i32_0 : i32, i32
  }
}

module attributes {stable_mosaic.version = 11 : i64} {
  func.func @_matmul_kernel(%arg0: i32, %arg1: i32, %arg2: memref<2x16xf32, #tpu.memory_space<vmem>>, %arg3: memref<16x256xbf16, #tpu.memory_space<vmem>>, %arg4: memref<2x256xf32, #tpu.memory_space<vmem>>) attributes {dimension_semantics = [#tpu.dimension_semantics<parallel>, #tpu.dimension_semantics<parallel>], iteration_bounds = array<i64: 1, 8>, scalar_prefetch = 0 : i64, scratch_operands = 0 : i64, tpu.core_type = #tpu.core_type<tc>, window_params = [{transform_indices = @transform_0, window_bounds = array<i64: 2, 16>}, {transform_indices = @transform_1, window_bounds = array<i64: 16, 256>}, {transform_indices = @transform_2, window_bounds = array<i64: 2, 256>}]} {
    %c0 = arith.constant 0 : index
    %c0_0 = arith.constant 0 : index
    %0 = vector.load %arg2[%c0, %c0_0] : memref<2x16xf32, #tpu.memory_space<vmem>>, vector<2x16xf32>
    %1 = arith.truncf %0 : vector<2x16xf32> to vector<2x16xbf16>
    %c0_1 = arith.constant 0 : index
    %c0_2 = arith.constant 0 : index
    %2 = vector.load %arg3[%c0_1, %c0_2] : memref<16x256xbf16, #tpu.memory_space<vmem>>, vector<16x256xbf16>
    %cst = arith.constant dense<0.000000e+00> : vector<2x256xf32>
    %3 = tpu.matmul %1, %2, %cst {dimension_numbers = #tpu.dot_dimension_numbers<[1], [0], [0], [1], [0, 0, 1, 1], [], []>} : vector<2x16xbf16>, vector<16x256xbf16>, vector<2x256xf32> -> vector<2x256xf32>
    %c0_3 = arith.constant 0 : index
    %c0_4 = arith.constant 0 : index
    %4 = vector.load %arg4[%c0_3, %c0_4] : memref<2x256xf32, #tpu.memory_space<vmem>>, vector<2x256xf32>
    tpu.vector_store %arg4[%c0_3, %c0_4], %3 {strides = array<i32>} : memref<2x256xf32, #tpu.memory_space<vmem>>, vector<2x256xf32>,
    return
  }
  func.func @transform_0(%arg0: i32, %arg1: i32) -> (i32, i32) {
    %c0_i32 = arith.constant 0 : i32
    %c0_i32_0 = arith.constant 0 : i32
    return %arg0, %c0_i32 : i32, i32
  }
  func.func @transform_1(%arg0: i32, %arg1: i32) -> (i32, i32) {
    %c0_i32 = arith.constant 0 : i32
    %c0_i32_0 = arith.constant 0 : i32
    return %c0_i32, %arg1 : i32, i32
  }
  func.func @transform_2(%arg0: i32, %arg1: i32) -> (i32, i32) {
    %c0_i32 = arith.constant 0 : i32
    return %arg0, %arg1 : i32, i32
  }
}

module attributes {stable_mosaic.version = 11 : i64} {
  func.func @_bn_relu_matmul_kernel(%arg0: i32, %arg1: i32, %arg2: memref<32x128xf32, #tpu.memory_space<vmem>>, %arg3: memref<2x128xf32, #tpu.memory_space<vmem>>, %arg4: memref<128x256xbf16, #tpu.memory_space<vmem>>, %arg5: memref<32x256xf32, #tpu.memory_space<vmem>>) attributes {dimension_semantics = [#tpu.dimension_semantics<parallel>, #tpu.dimension_semantics<parallel>], iteration_bounds = array<i64: 1, 4>, scalar_prefetch = 0 : i64, scratch_operands = 0 : i64, tpu.core_type = #tpu.core_type<tc>, window_params = [{transform_indices = @transform_0, window_bounds = array<i64: 32, 128>}, {pipeline_mode = #tpu.pipeline_mode<synchronous>, transform_indices = @transform_1, window_bounds = array<i64: 2, 128>}, {transform_indices = @transform_2, window_bounds = array<i64: 128, 256>}, {transform_indices = @transform_3, window_bounds = array<i64: 32, 256>}]} {
    %c0 = arith.constant 0 : index
    %c0_0 = arith.constant 0 : index
    %0 = vector.load %arg2[%c0, %c0_0] : memref<32x128xf32, #tpu.memory_space<vmem>>, vector<32x128xf32>
    %c0_1 = arith.constant 0 : index
    %c0_2 = arith.constant 0 : index
    %1 = vector.load %arg3[%c0_1, %c0_2] : memref<2x128xf32, #tpu.memory_space<vmem>>, vector<1x128xf32>
    %2 = vector.broadcast %1 : vector<1x128xf32> to vector<32x128xf32>
    %3 = arith.mulf %0, %2 : vector<32x128xf32>
    %c1 = arith.constant 1 : index
    %c0_3 = arith.constant 0 : index
    %4 = vector.load %arg3[%c1, %c0_3] : memref<2x128xf32, #tpu.memory_space<vmem>>, vector<1x128xf32>
    %5 = vector.broadcast %4 : vector<1x128xf32> to vector<32x128xf32>
    %6 = arith.addf %3, %5 : vector<32x128xf32>
    %cst = arith.constant 0.000000e+00 : f32
    %7 = vector.broadcast %cst : f32 to vector<32x128xf32>
    %8 = arith.maximumf %6, %7 : vector<32x128xf32>
    %9 = arith.truncf %8 : vector<32x128xf32> to vector<32x128xbf16>
    %c0_4 = arith.constant 0 : index
    %c0_5 = arith.constant 0 : index
    %10 = vector.load %arg4[%c0_4, %c0_5] : memref<128x256xbf16, #tpu.memory_space<vmem>>, vector<128x256xbf16>
    %cst_6 = arith.constant dense<0.000000e+00> : vector<32x256xf32>
    %11 = tpu.matmul %9, %10, %cst_6 {dimension_numbers = #tpu.dot_dimension_numbers<[1], [0], [0], [1], [0, 0, 1, 1], [], []>} : vector<32x128xbf16>, vector<128x256xbf16>, vector<32x256xf32> -> vector<32x256xf32>
    %c0_7 = arith.constant 0 : index
    %c0_8 = arith.constant 0 : index
    %12 = vector.load %arg5[%c0_7, %c0_8] : memref<32x256xf32, #tpu.memory_space<vmem>>, vector<32x256xf32>
    tpu.vector_store %arg5[%c0_7, %c0_8], %11 {strides = array<i32>} : memref<32x256xf32, #tpu.memory_space<vmem>>, vector<32x256xf32>,
    return
  }
  func.func @transform_0(%arg0: i32, %arg1: i32) -> (i32, i32) {
    %c0_i32 = arith.constant 0 : i32
    %c0_i32_0 = arith.constant 0 : i32
    return %arg0, %c0_i32 : i32, i32
  }
  func.func @transform_1(%arg0: i32, %arg1: i32) -> (i32, i32) {
    %c0_i32 = arith.constant 0 : i32
    %c0_i32_0 = arith.constant 0 : i32
    %c0_i32_1 = arith.constant 0 : i32
    return %c0_i32, %c0_i32_0 : i32, i32
  }
  func.func @transform_2(%arg0: i32, %arg1: i32) -> (i32, i32) {
    %c0_i32 = arith.constant 0 : i32
    %c0_i32_0 = arith.constant 0 : i32
    return %c0_i32, %arg1 : i32, i32
  }
  func.func @transform_3(%arg0: i32, %arg1: i32) -> (i32, i32) {
    %c0_i32 = arith.constant 0 : i32
    return %arg0, %arg1 : i32, i32
  }
}

module attributes {stable_mosaic.version = 11 : i64} {
  func.func @_bn_relu_matmul_kernel(%arg0: i32, %arg1: i32, %arg2: memref<128x64xf32, #tpu.memory_space<vmem>>, %arg3: memref<2x64xf32, #tpu.memory_space<vmem>>, %arg4: memref<64x256xbf16, #tpu.memory_space<vmem>>, %arg5: memref<128x256xf32, #tpu.memory_space<vmem>>) attributes {dimension_semantics = [#tpu.dimension_semantics<parallel>, #tpu.dimension_semantics<parallel>], iteration_bounds = array<i64: 1, 2>, scalar_prefetch = 0 : i64, scratch_operands = 0 : i64, tpu.core_type = #tpu.core_type<tc>, window_params = [{transform_indices = @transform_0, window_bounds = array<i64: 128, 64>}, {pipeline_mode = #tpu.pipeline_mode<synchronous>, transform_indices = @transform_1, window_bounds = array<i64: 2, 64>}, {transform_indices = @transform_2, window_bounds = array<i64: 64, 256>}, {transform_indices = @transform_3, window_bounds = array<i64: 128, 256>}]} {
    %c0 = arith.constant 0 : index
    %c0_0 = arith.constant 0 : index
    %0 = vector.load %arg2[%c0, %c0_0] : memref<128x64xf32, #tpu.memory_space<vmem>>, vector<128x64xf32>
    %c0_1 = arith.constant 0 : index
    %c0_2 = arith.constant 0 : index
    %1 = vector.load %arg3[%c0_1, %c0_2] : memref<2x64xf32, #tpu.memory_space<vmem>>, vector<1x64xf32>
    %2 = vector.broadcast %1 : vector<1x64xf32> to vector<128x64xf32>
    %3 = arith.mulf %0, %2 : vector<128x64xf32>
    %c1 = arith.constant 1 : index
    %c0_3 = arith.constant 0 : index
    %4 = vector.load %arg3[%c1, %c0_3] : memref<2x64xf32, #tpu.memory_space<vmem>>, vector<1x64xf32>
    %5 = vector.broadcast %4 : vector<1x64xf32> to vector<128x64xf32>
    %6 = arith.addf %3, %5 : vector<128x64xf32>
    %cst = arith.constant 0.000000e+00 : f32
    %7 = vector.broadcast %cst : f32 to vector<128x64xf32>
    %8 = arith.maximumf %6, %7 : vector<128x64xf32>
    %9 = arith.truncf %8 : vector<128x64xf32> to vector<128x64xbf16>
    %c0_4 = arith.constant 0 : index
    %c0_5 = arith.constant 0 : index
    %10 = vector.load %arg4[%c0_4, %c0_5] : memref<64x256xbf16, #tpu.memory_space<vmem>>, vector<64x256xbf16>
    %cst_6 = arith.constant dense<0.000000e+00> : vector<128x256xf32>
    %11 = tpu.matmul %9, %10, %cst_6 {dimension_numbers = #tpu.dot_dimension_numbers<[1], [0], [0], [1], [0, 0, 1, 1], [], []>} : vector<128x64xbf16>, vector<64x256xbf16>, vector<128x256xf32> -> vector<128x256xf32>
    %c0_7 = arith.constant 0 : index
    %c0_8 = arith.constant 0 : index
    %12 = vector.load %arg5[%c0_7, %c0_8] : memref<128x256xf32, #tpu.memory_space<vmem>>, vector<128x256xf32>
    tpu.vector_store %arg5[%c0_7, %c0_8], %11 {strides = array<i32>} : memref<128x256xf32, #tpu.memory_space<vmem>>, vector<128x256xf32>,
    return
  }
  func.func @transform_0(%arg0: i32, %arg1: i32) -> (i32, i32) {
    %c0_i32 = arith.constant 0 : i32
    %c0_i32_0 = arith.constant 0 : i32
    return %arg0, %c0_i32 : i32, i32
  }
  func.func @transform_1(%arg0: i32, %arg1: i32) -> (i32, i32) {
    %c0_i32 = arith.constant 0 : i32
    %c0_i32_0 = arith.constant 0 : i32
    %c0_i32_1 = arith.constant 0 : i32
    return %c0_i32, %c0_i32_0 : i32, i32
  }
  func.func @transform_2(%arg0: i32, %arg1: i32) -> (i32, i32) {
    %c0_i32 = arith.constant 0 : i32
    %c0_i32_0 = arith.constant 0 : i32
    return %c0_i32, %arg1 : i32, i32
  }
  func.func @transform_3(%arg0: i32, %arg1: i32) -> (i32, i32) {
    %c0_i32 = arith.constant 0 : i32
    return %arg0, %arg1 : i32, i32
  }
}

module attributes {stable_mosaic.version = 11 : i64} {
  func.func @_bn_stats_kernel(%arg0: i32, %arg1: memref<128x64xf32, #tpu.memory_space<vmem>>, %arg2: memref<1x64xf32, #tpu.memory_space<vmem>>, %arg3: memref<1x64xf32, #tpu.memory_space<vmem>>, %arg4: memref<2x64xf32, #tpu.memory_space<vmem>>, %arg5: memref<1x64xf32, #tpu.memory_space<vmem>>, %arg6: memref<1x64xf32, #tpu.memory_space<vmem>>) attributes {dimension_semantics = [#tpu.dimension_semantics<arbitrary>], iteration_bounds = array<i64: 1>, scalar_prefetch = 0 : i64, scratch_operands = 2 : i64, tpu.core_type = #tpu.core_type<tc>, window_params = [{transform_indices = @transform_0, window_bounds = array<i64: 128, 64>}, {pipeline_mode = #tpu.pipeline_mode<synchronous>, transform_indices = @transform_1, window_bounds = array<i64: 1, 64>}, {pipeline_mode = #tpu.pipeline_mode<synchronous>, transform_indices = @transform_2, window_bounds = array<i64: 1, 64>}, {pipeline_mode = #tpu.pipeline_mode<synchronous>, transform_indices = @transform_3, window_bounds = array<i64: 2, 64>}]} {
    %c0_i32 = arith.constant 0 : i32
    %0 = arith.cmpi eq, %arg0, %c0_i32 : i32
    %1 = arith.extui %0 : i1 to i32
    %c0_i32_0 = arith.constant 0 : i32
    %2 = arith.cmpi ne, %1, %c0_i32_0 : i32
    scf.if %2 {
      %cst_13 = arith.constant 0.000000e+00 : f32
      %18 = vector.broadcast %cst_13 : f32 to vector<1x64xf32>
      %c0_14 = arith.constant 0 : index
      %c0_15 = arith.constant 0 : index
      %19 = vector.load %arg5[%c0_14, %c0_15] : memref<1x64xf32, #tpu.memory_space<vmem>>, vector<1x64xf32>
      tpu.vector_store %arg5[%c0_14, %c0_15], %18 {strides = array<i32>} : memref<1x64xf32, #tpu.memory_space<vmem>>, vector<1x64xf32>,
      %cst_16 = arith.constant 0.000000e+00 : f32
      %20 = vector.broadcast %cst_16 : f32 to vector<1x64xf32>
      %c0_17 = arith.constant 0 : index
      %c0_18 = arith.constant 0 : index
      %21 = vector.load %arg6[%c0_17, %c0_18] : memref<1x64xf32, #tpu.memory_space<vmem>>, vector<1x64xf32>
      tpu.vector_store %arg6[%c0_17, %c0_18], %20 {strides = array<i32>} : memref<1x64xf32, #tpu.memory_space<vmem>>, vector<1x64xf32>,
    } else {
    }
    %c0 = arith.constant 0 : index
    %c0_1 = arith.constant 0 : index
    %3 = vector.load %arg1[%c0, %c0_1] : memref<128x64xf32, #tpu.memory_space<vmem>>, vector<128x64xf32>
    %c0_2 = arith.constant 0 : index
    %c0_3 = arith.constant 0 : index
    %4 = vector.load %arg5[%c0_2, %c0_3] : memref<1x64xf32, #tpu.memory_space<vmem>>, vector<1x64xf32>
    %cst = arith.constant dense<0.000000e+00> : vector<64xf32>
    %5 = vector.multi_reduction <add>, %3, %cst [0] : vector<128x64xf32> to vector<64xf32>
    %6 = vector.shape_cast %5 : vector<64xf32> to vector<1x64xf32>
    %7 = arith.addf %4, %6 : vector<1x64xf32>
    %c0_4 = arith.constant 0 : index
    %c0_5 = arith.constant 0 : index
    %8 = vector.load %arg5[%c0_4, %c0_5] : memref<1x64xf32, #tpu.memory_space<vmem>>, vector<1x64xf32>
    tpu.vector_store %arg5[%c0_4, %c0_5], %7 {strides = array<i32>} : memref<1x64xf32, #tpu.memory_space<vmem>>, vector<1x64xf32>,
    %c0_6 = arith.constant 0 : index
    %c0_7 = arith.constant 0 : index
    %9 = vector.load %arg6[%c0_6, %c0_7] : memref<1x64xf32, #tpu.memory_space<vmem>>, vector<1x64xf32>
    %10 = arith.mulf %3, %3 : vector<128x64xf32>
    %cst_8 = arith.constant dense<0.000000e+00> : vector<64xf32>
    %11 = vector.multi_reduction <add>, %10, %cst_8 [0] : vector<128x64xf32> to vector<64xf32>
    %12 = vector.shape_cast %11 : vector<64xf32> to vector<1x64xf32>
    %13 = arith.addf %9, %12 : vector<1x64xf32>
    %c0_9 = arith.constant 0 : index
    %c0_10 = arith.constant 0 : index
    %14 = vector.load %arg6[%c0_9, %c0_10] : memref<1x64xf32, #tpu.memory_space<vmem>>, vector<1x64xf32>
    tpu.vector_store %arg6[%c0_9, %c0_10], %13 {strides = array<i32>} : memref<1x64xf32, #tpu.memory_space<vmem>>, vector<1x64xf32>,
    %c0_i32_11 = arith.constant 0 : i32
    %15 = arith.cmpi eq, %arg0, %c0_i32_11 : i32
    %16 = arith.extui %15 : i1 to i32
    %c0_i32_12 = arith.constant 0 : i32
    %17 = arith.cmpi ne, %16, %c0_i32_12 : i32
    scf.if %17 {
      %c0_13 = arith.constant 0 : index
      %c0_14 = arith.constant 0 : index
      %18 = vector.load %arg5[%c0_13, %c0_14] : memref<1x64xf32, #tpu.memory_space<vmem>>, vector<1x64xf32>
      %cst_15 = arith.constant 7.812500e-03 : f32
      %19 = vector.broadcast %cst_15 : f32 to vector<1x64xf32>
      %20 = arith.mulf %18, %19 : vector<1x64xf32>
      %c0_16 = arith.constant 0 : index
      %c0_17 = arith.constant 0 : index
      %21 = vector.load %arg6[%c0_16, %c0_17] : memref<1x64xf32, #tpu.memory_space<vmem>>, vector<1x64xf32>
      %cst_18 = arith.constant 7.812500e-03 : f32
      %22 = vector.broadcast %cst_18 : f32 to vector<1x64xf32>
      %23 = arith.mulf %21, %22 : vector<1x64xf32>
      %24 = arith.mulf %20, %20 : vector<1x64xf32>
      %25 = arith.subf %23, %24 : vector<1x64xf32>
      %cst_19 = arith.constant 0.000000e+00 : f32
      %26 = vector.broadcast %cst_19 : f32 to vector<1x64xf32>
      %27 = arith.maximumf %25, %26 : vector<1x64xf32>
      %c0_20 = arith.constant 0 : index
      %c0_21 = arith.constant 0 : index
      %28 = vector.load %arg2[%c0_20, %c0_21] : memref<1x64xf32, #tpu.memory_space<vmem>>, vector<1x64xf32>
      %cst_22 = arith.constant 9.99999974E-6 : f32
      %29 = vector.broadcast %cst_22 : f32 to vector<1x64xf32>
      %30 = arith.addf %27, %29 : vector<1x64xf32>
      %31 = math.rsqrt %30 : vector<1x64xf32>
      %32 = arith.mulf %28, %31 : vector<1x64xf32>
      %c0_23 = arith.constant 0 : index
      %c0_24 = arith.constant 0 : index
      %33 = vector.load %arg4[%c0_23, %c0_24] : memref<2x64xf32, #tpu.memory_space<vmem>>, vector<1x64xf32>
      tpu.vector_store %arg4[%c0_23, %c0_24], %32 {strides = array<i32>} : memref<2x64xf32, #tpu.memory_space<vmem>>, vector<1x64xf32>,
      %c0_25 = arith.constant 0 : index
      %c0_26 = arith.constant 0 : index
      %34 = vector.load %arg3[%c0_25, %c0_26] : memref<1x64xf32, #tpu.memory_space<vmem>>, vector<1x64xf32>
      %35 = arith.mulf %20, %32 : vector<1x64xf32>
      %36 = arith.subf %34, %35 : vector<1x64xf32>
      %c1 = arith.constant 1 : index
      %c0_27 = arith.constant 0 : index
      %37 = vector.load %arg4[%c1, %c0_27] : memref<2x64xf32, #tpu.memory_space<vmem>>, vector<1x64xf32>
      tpu.vector_store %arg4[%c1, %c0_27], %36 {strides = array<i32>} : memref<2x64xf32, #tpu.memory_space<vmem>>, vector<1x64xf32>,
    } else {
    }
    return
  }
  func.func @transform_0(%arg0: i32) -> (i32, i32) {
    %c0_i32 = arith.constant 0 : i32
    %c0_i32_0 = arith.constant 0 : i32
    return %arg0, %c0_i32 : i32, i32
  }
  func.func @transform_1(%arg0: i32) -> (i32, i32) {
    %c0_i32 = arith.constant 0 : i32
    %c0_i32_0 = arith.constant 0 : i32
    %c0_i32_1 = arith.constant 0 : i32
    return %c0_i32, %c0_i32_0 : i32, i32
  }
  func.func @transform_2(%arg0: i32) -> (i32, i32) {
    %c0_i32 = arith.constant 0 : i32
    %c0_i32_0 = arith.constant 0 : i32
    %c0_i32_1 = arith.constant 0 : i32
    return %c0_i32, %c0_i32_0 : i32, i32
  }
  func.func @transform_3(%arg0: i32) -> (i32, i32) {
    %c0_i32 = arith.constant 0 : i32
    %c0_i32_0 = arith.constant 0 : i32
    %c0_i32_1 = arith.constant 0 : i32
    return %c0_i32, %c0_i32_0 : i32, i32
  }
}

module attributes {stable_mosaic.version = 11 : i64} {
  func.func @_bn_stats_kernel(%arg0: i32, %arg1: memref<512x32xf32, #tpu.memory_space<vmem>>, %arg2: memref<1x32xf32, #tpu.memory_space<vmem>>, %arg3: memref<1x32xf32, #tpu.memory_space<vmem>>, %arg4: memref<2x32xf32, #tpu.memory_space<vmem>>, %arg5: memref<1x32xf32, #tpu.memory_space<vmem>>, %arg6: memref<1x32xf32, #tpu.memory_space<vmem>>) attributes {dimension_semantics = [#tpu.dimension_semantics<arbitrary>], iteration_bounds = array<i64: 1>, scalar_prefetch = 0 : i64, scratch_operands = 2 : i64, tpu.core_type = #tpu.core_type<tc>, window_params = [{transform_indices = @transform_0, window_bounds = array<i64: 512, 32>}, {pipeline_mode = #tpu.pipeline_mode<synchronous>, transform_indices = @transform_1, window_bounds = array<i64: 1, 32>}, {pipeline_mode = #tpu.pipeline_mode<synchronous>, transform_indices = @transform_2, window_bounds = array<i64: 1, 32>}, {pipeline_mode = #tpu.pipeline_mode<synchronous>, transform_indices = @transform_3, window_bounds = array<i64: 2, 32>}]} {
    %c0_i32 = arith.constant 0 : i32
    %0 = arith.cmpi eq, %arg0, %c0_i32 : i32
    %1 = arith.extui %0 : i1 to i32
    %c0_i32_0 = arith.constant 0 : i32
    %2 = arith.cmpi ne, %1, %c0_i32_0 : i32
    scf.if %2 {
      %cst_13 = arith.constant 0.000000e+00 : f32
      %18 = vector.broadcast %cst_13 : f32 to vector<1x32xf32>
      %c0_14 = arith.constant 0 : index
      %c0_15 = arith.constant 0 : index
      %19 = vector.load %arg5[%c0_14, %c0_15] : memref<1x32xf32, #tpu.memory_space<vmem>>, vector<1x32xf32>
      tpu.vector_store %arg5[%c0_14, %c0_15], %18 {strides = array<i32>} : memref<1x32xf32, #tpu.memory_space<vmem>>, vector<1x32xf32>,
      %cst_16 = arith.constant 0.000000e+00 : f32
      %20 = vector.broadcast %cst_16 : f32 to vector<1x32xf32>
      %c0_17 = arith.constant 0 : index
      %c0_18 = arith.constant 0 : index
      %21 = vector.load %arg6[%c0_17, %c0_18] : memref<1x32xf32, #tpu.memory_space<vmem>>, vector<1x32xf32>
      tpu.vector_store %arg6[%c0_17, %c0_18], %20 {strides = array<i32>} : memref<1x32xf32, #tpu.memory_space<vmem>>, vector<1x32xf32>,
    } else {
    }
    %c0 = arith.constant 0 : index
    %c0_1 = arith.constant 0 : index
    %3 = vector.load %arg1[%c0, %c0_1] : memref<512x32xf32, #tpu.memory_space<vmem>>, vector<512x32xf32>
    %c0_2 = arith.constant 0 : index
    %c0_3 = arith.constant 0 : index
    %4 = vector.load %arg5[%c0_2, %c0_3] : memref<1x32xf32, #tpu.memory_space<vmem>>, vector<1x32xf32>
    %cst = arith.constant dense<0.000000e+00> : vector<32xf32>
    %5 = vector.multi_reduction <add>, %3, %cst [0] : vector<512x32xf32> to vector<32xf32>
    %6 = vector.shape_cast %5 : vector<32xf32> to vector<1x32xf32>
    %7 = arith.addf %4, %6 : vector<1x32xf32>
    %c0_4 = arith.constant 0 : index
    %c0_5 = arith.constant 0 : index
    %8 = vector.load %arg5[%c0_4, %c0_5] : memref<1x32xf32, #tpu.memory_space<vmem>>, vector<1x32xf32>
    tpu.vector_store %arg5[%c0_4, %c0_5], %7 {strides = array<i32>} : memref<1x32xf32, #tpu.memory_space<vmem>>, vector<1x32xf32>,
    %c0_6 = arith.constant 0 : index
    %c0_7 = arith.constant 0 : index
    %9 = vector.load %arg6[%c0_6, %c0_7] : memref<1x32xf32, #tpu.memory_space<vmem>>, vector<1x32xf32>
    %10 = arith.mulf %3, %3 : vector<512x32xf32>
    %cst_8 = arith.constant dense<0.000000e+00> : vector<32xf32>
    %11 = vector.multi_reduction <add>, %10, %cst_8 [0] : vector<512x32xf32> to vector<32xf32>
    %12 = vector.shape_cast %11 : vector<32xf32> to vector<1x32xf32>
    %13 = arith.addf %9, %12 : vector<1x32xf32>
    %c0_9 = arith.constant 0 : index
    %c0_10 = arith.constant 0 : index
    %14 = vector.load %arg6[%c0_9, %c0_10] : memref<1x32xf32, #tpu.memory_space<vmem>>, vector<1x32xf32>
    tpu.vector_store %arg6[%c0_9, %c0_10], %13 {strides = array<i32>} : memref<1x32xf32, #tpu.memory_space<vmem>>, vector<1x32xf32>,
    %c0_i32_11 = arith.constant 0 : i32
    %15 = arith.cmpi eq, %arg0, %c0_i32_11 : i32
    %16 = arith.extui %15 : i1 to i32
    %c0_i32_12 = arith.constant 0 : i32
    %17 = arith.cmpi ne, %16, %c0_i32_12 : i32
    scf.if %17 {
      %c0_13 = arith.constant 0 : index
      %c0_14 = arith.constant 0 : index
      %18 = vector.load %arg5[%c0_13, %c0_14] : memref<1x32xf32, #tpu.memory_space<vmem>>, vector<1x32xf32>
      %cst_15 = arith.constant 0.001953125 : f32
      %19 = vector.broadcast %cst_15 : f32 to vector<1x32xf32>
      %20 = arith.mulf %18, %19 : vector<1x32xf32>
      %c0_16 = arith.constant 0 : index
      %c0_17 = arith.constant 0 : index
      %21 = vector.load %arg6[%c0_16, %c0_17] : memref<1x32xf32, #tpu.memory_space<vmem>>, vector<1x32xf32>
      %cst_18 = arith.constant 0.001953125 : f32
      %22 = vector.broadcast %cst_18 : f32 to vector<1x32xf32>
      %23 = arith.mulf %21, %22 : vector<1x32xf32>
      %24 = arith.mulf %20, %20 : vector<1x32xf32>
      %25 = arith.subf %23, %24 : vector<1x32xf32>
      %cst_19 = arith.constant 0.000000e+00 : f32
      %26 = vector.broadcast %cst_19 : f32 to vector<1x32xf32>
      %27 = arith.maximumf %25, %26 : vector<1x32xf32>
      %c0_20 = arith.constant 0 : index
      %c0_21 = arith.constant 0 : index
      %28 = vector.load %arg2[%c0_20, %c0_21] : memref<1x32xf32, #tpu.memory_space<vmem>>, vector<1x32xf32>
      %cst_22 = arith.constant 9.99999974E-6 : f32
      %29 = vector.broadcast %cst_22 : f32 to vector<1x32xf32>
      %30 = arith.addf %27, %29 : vector<1x32xf32>
      %31 = math.rsqrt %30 : vector<1x32xf32>
      %32 = arith.mulf %28, %31 : vector<1x32xf32>
      %c0_23 = arith.constant 0 : index
      %c0_24 = arith.constant 0 : index
      %33 = vector.load %arg4[%c0_23, %c0_24] : memref<2x32xf32, #tpu.memory_space<vmem>>, vector<1x32xf32>
      tpu.vector_store %arg4[%c0_23, %c0_24], %32 {strides = array<i32>} : memref<2x32xf32, #tpu.memory_space<vmem>>, vector<1x32xf32>,
      %c0_25 = arith.constant 0 : index
      %c0_26 = arith.constant 0 : index
      %34 = vector.load %arg3[%c0_25, %c0_26] : memref<1x32xf32, #tpu.memory_space<vmem>>, vector<1x32xf32>
      %35 = arith.mulf %20, %32 : vector<1x32xf32>
      %36 = arith.subf %34, %35 : vector<1x32xf32>
      %c1 = arith.constant 1 : index
      %c0_27 = arith.constant 0 : index
      %37 = vector.load %arg4[%c1, %c0_27] : memref<2x32xf32, #tpu.memory_space<vmem>>, vector<1x32xf32>
      tpu.vector_store %arg4[%c1, %c0_27], %36 {strides = array<i32>} : memref<2x32xf32, #tpu.memory_space<vmem>>, vector<1x32xf32>,
    } else {
    }
    return
  }
  func.func @transform_0(%arg0: i32) -> (i32, i32) {
    %c0_i32 = arith.constant 0 : i32
    %c0_i32_0 = arith.constant 0 : i32
    return %arg0, %c0_i32 : i32, i32
  }
  func.func @transform_1(%arg0: i32) -> (i32, i32) {
    %c0_i32 = arith.constant 0 : i32
    %c0_i32_0 = arith.constant 0 : i32
    %c0_i32_1 = arith.constant 0 : i32
    return %c0_i32, %c0_i32_0 : i32, i32
  }
  func.func @transform_2(%arg0: i32) -> (i32, i32) {
    %c0_i32 = arith.constant 0 : i32
    %c0_i32_0 = arith.constant 0 : i32
    %c0_i32_1 = arith.constant 0 : i32
    return %c0_i32, %c0_i32_0 : i32, i32
  }
  func.func @transform_3(%arg0: i32) -> (i32, i32) {
    %c0_i32 = arith.constant 0 : i32
    %c0_i32_0 = arith.constant 0 : i32
    %c0_i32_1 = arith.constant 0 : i32
    return %c0_i32, %c0_i32_0 : i32, i32
  }
}

module attributes {stable_mosaic.version = 11 : i64} {
  func.func @_bn_relu_matmul_kernel(%arg0: i32, %arg1: i32, %arg2: memref<256x32xf32, #tpu.memory_space<vmem>>, %arg3: memref<2x32xf32, #tpu.memory_space<vmem>>, %arg4: memref<32x48xbf16, #tpu.memory_space<vmem>>, %arg5: memref<256x48xf32, #tpu.memory_space<vmem>>) attributes {dimension_semantics = [#tpu.dimension_semantics<parallel>, #tpu.dimension_semantics<parallel>], iteration_bounds = array<i64: 2, 1>, scalar_prefetch = 0 : i64, scratch_operands = 0 : i64, tpu.core_type = #tpu.core_type<tc>, window_params = [{transform_indices = @transform_0, window_bounds = array<i64: 256, 32>}, {pipeline_mode = #tpu.pipeline_mode<synchronous>, transform_indices = @transform_1, window_bounds = array<i64: 2, 32>}, {transform_indices = @transform_2, window_bounds = array<i64: 32, 48>}, {transform_indices = @transform_3, window_bounds = array<i64: 256, 48>}]} {
    %c0 = arith.constant 0 : index
    %c0_0 = arith.constant 0 : index
    %0 = vector.load %arg2[%c0, %c0_0] : memref<256x32xf32, #tpu.memory_space<vmem>>, vector<256x32xf32>
    %c0_1 = arith.constant 0 : index
    %c0_2 = arith.constant 0 : index
    %1 = vector.load %arg3[%c0_1, %c0_2] : memref<2x32xf32, #tpu.memory_space<vmem>>, vector<1x32xf32>
    %2 = vector.broadcast %1 : vector<1x32xf32> to vector<256x32xf32>
    %3 = arith.mulf %0, %2 : vector<256x32xf32>
    %c1 = arith.constant 1 : index
    %c0_3 = arith.constant 0 : index
    %4 = vector.load %arg3[%c1, %c0_3] : memref<2x32xf32, #tpu.memory_space<vmem>>, vector<1x32xf32>
    %5 = vector.broadcast %4 : vector<1x32xf32> to vector<256x32xf32>
    %6 = arith.addf %3, %5 : vector<256x32xf32>
    %cst = arith.constant 0.000000e+00 : f32
    %7 = vector.broadcast %cst : f32 to vector<256x32xf32>
    %8 = arith.maximumf %6, %7 : vector<256x32xf32>
    %9 = arith.truncf %8 : vector<256x32xf32> to vector<256x32xbf16>
    %c0_4 = arith.constant 0 : index
    %c0_5 = arith.constant 0 : index
    %10 = vector.load %arg4[%c0_4, %c0_5] : memref<32x48xbf16, #tpu.memory_space<vmem>>, vector<32x48xbf16>
    %cst_6 = arith.constant dense<0.000000e+00> : vector<256x48xf32>
    %11 = tpu.matmul %9, %10, %cst_6 {dimension_numbers = #tpu.dot_dimension_numbers<[1], [0], [0], [1], [0, 0, 1, 1], [], []>} : vector<256x32xbf16>, vector<32x48xbf16>, vector<256x48xf32> -> vector<256x48xf32>
    %c0_7 = arith.constant 0 : index
    %c0_8 = arith.constant 0 : index
    %12 = vector.load %arg5[%c0_7, %c0_8] : memref<256x48xf32, #tpu.memory_space<vmem>>, vector<256x48xf32>
    tpu.vector_store %arg5[%c0_7, %c0_8], %11 {strides = array<i32>} : memref<256x48xf32, #tpu.memory_space<vmem>>, vector<256x48xf32>,
    return
  }
  func.func @transform_0(%arg0: i32, %arg1: i32) -> (i32, i32) {
    %c0_i32 = arith.constant 0 : i32
    %c0_i32_0 = arith.constant 0 : i32
    return %arg0, %c0_i32 : i32, i32
  }
  func.func @transform_1(%arg0: i32, %arg1: i32) -> (i32, i32) {
    %c0_i32 = arith.constant 0 : i32
    %c0_i32_0 = arith.constant 0 : i32
    %c0_i32_1 = arith.constant 0 : i32
    return %c0_i32, %c0_i32_0 : i32, i32
  }
  func.func @transform_2(%arg0: i32, %arg1: i32) -> (i32, i32) {
    %c0_i32 = arith.constant 0 : i32
    %c0_i32_0 = arith.constant 0 : i32
    return %c0_i32, %arg1 : i32, i32
  }
  func.func @transform_3(%arg0: i32, %arg1: i32) -> (i32, i32) {
    %c0_i32 = arith.constant 0 : i32
    return %arg0, %arg1 : i32, i32
  }
}

module attributes {stable_mosaic.version = 11 : i64} {
  func.func @_tanh_kernel(%arg0: i32, %arg1: memref<2x3072xf32, #tpu.memory_space<vmem>>, %arg2: memref<2x3072xf32, #tpu.memory_space<vmem>>) attributes {dimension_semantics = [#tpu.dimension_semantics<parallel>], iteration_bounds = array<i64: 1>, scalar_prefetch = 0 : i64, scratch_operands = 0 : i64, tpu.core_type = #tpu.core_type<tc>, window_params = [{transform_indices = @transform_0, window_bounds = array<i64: 2, 3072>}, {transform_indices = @transform_1, window_bounds = array<i64: 2, 3072>}]} {
    %c0 = arith.constant 0 : index
    %c0_0 = arith.constant 0 : index
    %0 = vector.load %arg1[%c0, %c0_0] : memref<2x3072xf32, #tpu.memory_space<vmem>>, vector<2x3072xf32>
    %1 = math.tanh %0 : vector<2x3072xf32>
    %c0_1 = arith.constant 0 : index
    %c0_2 = arith.constant 0 : index
    %2 = vector.load %arg2[%c0_1, %c0_2] : memref<2x3072xf32, #tpu.memory_space<vmem>>, vector<2x3072xf32>
    tpu.vector_store %arg2[%c0_1, %c0_2], %1 {strides = array<i32>} : memref<2x3072xf32, #tpu.memory_space<vmem>>, vector<2x3072xf32>,
    return
  }
  func.func @transform_0(%arg0: i32) -> (i32, i32) {
    %c0_i32 = arith.constant 0 : i32
    %c0_i32_0 = arith.constant 0 : i32
    return %arg0, %c0_i32 : i32, i32
  }
  func.func @transform_1(%arg0: i32) -> (i32, i32) {
    %c0_i32 = arith.constant 0 : i32
    %c0_i32_0 = arith.constant 0 : i32
    return %arg0, %c0_i32 : i32, i32
  }
}

</mosaic_0001>

<bundles_post_ra>
// kernel: generator_forward.8
= control target key start
LH: loop header
LB: loop body
LE: loop exit
PB: predicated region body
PF: predicated region fallthrough
CT: control target
= control target key end

     0   :  { %7 = vsyncpa [#allocation3], 0  ;;  %s695_s0 = inlined_call_operand.vmem [shape: f32[2,16], index: 0, kind: input, shape index: {}]   ;;  %s696_s1 = inlined_call_operand.hbm [shape: bf16[16,2048], index: 1, kind: input, shape index: {}]   ;;  %s697_s2 = inlined_call_operand.vmem [shape: f32[2,2048], index: 2, kind: output, shape index: {}]  }
   0x1   :  { %9 = vsyncpa [#allocation3 + $0x1], 0  ;;  %s567_s9 = smov 0   ;;  %s569_s10 = smov 0  }
   0x2   :  { %s571_s11 = smov 0   ;;  %s573_s12 = smov 0  }
   0x3   :  { %s575_s13 = smov 0   ;;  %s577_s14 = smov 0  }
   0x4 LB: > { %s384_s15 = sadd.s32 4294967295, %s545_s14   ;;  %s24_s16 = sadd.s32 1, %s541_s13  ;;  %s545_s14 = sphi %s577_s14, %s15_s14   ;;  %s541_s13 = sphi %s575_s13, %s706_s13   ;;  %s537_s12 = sphi %s573_s12, %s705_s12   ;;  %s533_s11 = sphi %s571_s11, %s704_s11   ;;  %s529_s10 = sphi %s569_s10, %s703_s10   ;;  %s525_s9 = sphi %s567_s9, %s702_s9  }
   0x5   : > { %p25_p0 = scmp.ge.s32.totalorder %s24_s16, 8  ;;  %s60_s17 = sadd.s32 1, %s533_s11 }
   0x6   : > { %p67_p1 = scmp.ne.s32.totalorder %s533_s11, %s529_s10  ;;  %p68_p2 = scmp.eq.s32.totalorder %s545_s14, 0 }
   0x7   : > { %s708_s16 = smov (%p25_p0, %s24_s16), 0  ;;  %p73_p4 = scmp.ne.s32.totalorder %s529_s10, %s525_s9 }
   0x8   : > { %p603_p3 = por %p68_p2, %p67_p1  ;;  %s57_s19 = ssub.s32 %s541_s13, %s708_s16 }
   0x9   : > { %p74_p5 = scmp.eq.s32.totalorder %s384_s15, 0  ;;  %p58_p6 = scmp.eq.s32.totalorder %s57_s19, 0 }
   0xa   : > { %p409_p8 = scmp.lt.s32.totalorder %s545_s14, 8  ;;  %s132_s22 = sand.u32 1, %s533_s11  }
   0xb   : > { %p610_p7 = por %p74_p5, %p73_p4  ;;  %s402_s23 = sshll.u32 %s541_s13, 7 }
   0xc   : > { %s616_s21 = scalar_select %p58_p6, %s533_s11, %s60_s17  }
   0xd   : > { %s389_s24 = sshll.u32 %s132_s22, 4  ;;  %s623_s27 = scalar_lea.hbm %s696_s1, %s402_s23 }
   0xe   : > { %s136_s28 = scalar_lea.vmem [#allocation2], %s389_s24  ;;  %p627_p9 = pnand %p409_p8, %p603_p3 }
   0xf   : > { %s143_s29 = sshll.u32 %s136_s28, 4  ;;  %s634_s3 = scalar_lea.sflag [#allocation3], %s132_s22  ;;  %s631_s29 = int_to_ptr.vmem [resolvable:$true] %s143_s29 }
  0x10   : > { %s465_s4 = scalar_lea.hbm %s623_s27, 256  ;;  %p467_p12 = pneg %p627_p9 }
  0x11   : > { %p466_p11 = scmp.ne.s32.totalorder %s623_s27, %s465_s4  ;;  %s470_s7 = scalar_lea.hbm %s696_s1, 2048 }
  0x12   : > { %p471_p1 = scmp.lt.u32.totalorder %s623_s27, %s696_s1  ;;  %p472_p2 = scmp.lt.u32.totalorder %s470_s7, %s465_s4 }
  0x13   : > { %p468_p13 = pnand %p467_p12, %p466_p11  ;;  %p474_p4 = scmp.lt.u32.totalorder %s465_s4, %s623_s27 }
  0x14   : > { %p473_p3 = por %p472_p2, %p471_p1 }
  0x15   : > { %p469_p0 = pneg %p468_p13 }
  0x16   : > { %p475_p5 = por %p474_p4, %p473_p3 }
  0x18   : > { %p476_p6 = pnand %p475_p5, %p469_p0 }
  0x1a   : > { %479 = shalt.err (!%p476_p6)
}
  0x1b   : > { %s480_s15 = scalar_lea.vmem %s631_s29, 256  ;;  %s547_s17 = smov [#allocation2]  }
  0x1c   : > { %p481_p8 = scmp.ne.s32.totalorder %s631_s29, %s480_s15  ;;  %s485_s18 = sshll.u32 %s547_s17, 4  ;;  %s486_s18 = int_to_ptr.vmem [resolvable:$false] %s485_s18 }
  0x1d   : > { %s487_s19 = scalar_lea.vmem %s486_s18, 512  ;;  %p488_p10 = scmp.lt.s32.totalorder %s631_s29, %s486_s18 }
  0x1e   : > { %p483_p11 = pnand %p481_p8, %p467_p12  ;;  %p489_p1 = scmp.lt.s32.totalorder %s487_s19, %s480_s15 }
  0x20   : > { %p484_p13 = pneg %p483_p11  ;;  %p490_p2 = por %p489_p1, %p488_p10 }
  0x22   : > { %p491_p3 = pnand %p490_p2, %p484_p13 }
  0x24   : > { %494 = shalt.err (!%p491_p3)
}
  0x25   : > { %s548_s22 = smov 1024   ;;  %s549_s23 = smov 128  }
  0x26   : > { %s550_s24 = smov 8   ;;  %p151_p12 = scmp.lt.s32.totalorder %s545_s14, 9 }
  0x27   : > { %408 = dma.hbm_to_vmem [thread:$0]  (!%p627_p9), %s623_s27, 256, %s631_s29, %s634_s3, %s548_s22, %s549_s23, %s550_s24  }
  0x28   : > { %p701_p0 = scmp.ge.s32.totalorder %s545_s14, 1 }
  0x2a   : > { %p152_p4 = pnand %p701_p0, %p151_p12 }
  0x2b   : > { %s157_s25 = sand.u32 (!%p152_p4), 1, %s529_s10  }
  0x2c   : > { %155 = sbr.rel (%p152_p4) target bundleno = 273 (0x111), region = 28  ;;  %s393_s26 = sshll.u32 (!%p152_p4), %s157_s25, 4 }
  0x2d   : > { %s158_s28 = scalar_lea.sflag (!%p152_p4), [#allocation3], %s157_s25  ;;  %s161_s4 = scalar_lea.vmem (!%p152_p4), [#allocation2], %s393_s26 }
  0x33   : > { %520 = dma.done.wait (%p610_p7), %s158_s28, 256  }
  0x34   : > { %522 = vsyncadd (%p610_p7), %s158_s28, 4294967040  ;;  %v551_v0 = vmov 0   ;;  %v462_v1 = vld [vmem:[%s161_s4 + $0x4] ss:$8 sps:$4 sm:$0xff]   ;;  %v464_v2 = vld [vmem:[%s161_s4] ss:$8 sps:$4 sm:$0xff]  }
  0x35   : > { %256 = vmatprep.mubr.bf16.mxu0 %v551_v0  ;;  %v206_v3 = vld [vmem:[%s695_s0] sm:$0x3]  ;;  %224 = vmatprep.subr.bf16.mxu0 %v462_v1  ;;  %vm220_vm0 = vcmask 130048   ;;  %s394_s30 = sshll.u32 %s537_s12, 1 }
  0x36   : > { %v207_v4 = vpack.c.bf16 %v206_v3, %v206_v3  ;;  %225 = vmatpush1.bf16.msra.mxu0 %v464_v2  ;;  %p198_p9 = scmp.lt.s32.totalorder %s394_s30, 15 }
  0x38   : > { %s710_s30 = smov (!%p198_p9, %s394_s30), 15 }
  0x39   : > { %398 = vmatmul.mubr.msk.bf16.vlgmr.msra.gmra.mrb[0].mxu0 %vm220_vm0, %v207_v4  ;;  %s395_s3 = sshll.u32 %s710_s30, 1 }
  0x3a   : > { %s203_s6 = scalar_lea.vmem %s697_s2, %s395_s3 }
 0x10c   : > { %v258_v5 = vpop.f32.mrb[0].mxu0 }
 0x10d   : > { %v260_v6 = vpop.f32.mrb[1].mxu0 }
 0x10e   : > { %v267_v7 = vcombine.low %v258_v5, %v260_v6  ;;  %v262_v8 = vpop.f32.mrb[2].mxu0 }
 0x10f   : > { %v263_v9 = vpop.f32.mrb[3].mxu0 }
 0x110   : > { %399 = vst.sshfl [vmem:[%s203_s6] sm:$0x33 pattern:$0x76325410] %v267_v7 }
 0x111 PF: > { %s15_s14 = sadd.s32 1, %s545_s14   ;;  %s702_s9 = smov %s529_s10 }
 0x112   : > { %p12_p7 = scmp.ge.s32.totalorder %s15_s14, 10   ;;  %s703_s10 = smov %s533_s11 }
 0x113   : > { %s704_s11 = smov %s616_s21  ;;  %s705_s12 = smov %s541_s13 }
 0x114   : > { %s706_s13 = smov %s708_s16  ;;  %14 = sbr.rel (!%p12_p7) target bundleno = 4 (0x4), region = 71 }
 0x11b   :  { %307 = vsyncpa [#allocation3], 1 }
 0x11c   :  { %309 = vsyncpa [#allocation3 + $0x1], 1 }

// kernel: generator_forward.9
= control target key start
LH: loop header
LB: loop body
LE: loop exit
PB: predicated region body
PF: predicated region fallthrough
CT: control target
= control target key end

     0   :  { %v78_v0 = vmov 0.0   ;;  %s123_s0 = inlined_call_operand.vmem [shape: f32[32,128], index: 0, kind: input, shape index: {}]   ;;  %s124_s1 = inlined_call_operand.vmem [shape: f32[1,128], index: 1, kind: input, shape index: {}]   ;;  %s125_s2 = inlined_call_operand.vmem [shape: f32[1,128], index: 2, kind: input, shape index: {}]   ;;  %s126_s3 = inlined_call_operand.vmem [shape: f32[2,128], index: 3, kind: output, shape index: {}]  }
   0x1   :  { %18 = vst [vmem:[#allocation2] sm:$0x1] %v78_v0  ;;  %19 = vst [vmem:[#allocation3] sm:$0x1] %v78_v0  ;;  %v20_v1 = vld [vmem:[%s123_s0] sm:$0xff]  ;;  %v21_v2 = vld [vmem:[%s123_s0 + $0x8] sm:$0xff] }
   0x2   :  { %v22_v3 = vld [vmem:[%s123_s0 + $0x10] sm:$0xff]  ;;  %v23_v4 = vld [vmem:[%s123_s0 + $0x18] sm:$0xff]  ;;  %v25_v5 = vadd.f32 %v21_v2, %v20_v1  ;;  %v37_v6 = vmul.f32 %v20_v1, %v20_v1  ;;  %v38_v7 = vmul.f32 %v21_v2, %v21_v2  ;;  %v62_v39 = vld [vmem:[%s124_s1] sm:$0x1] }
   0x3   :  { %v39_v8 = vmul.f32 %v22_v3, %v22_v3  ;;  %v40_v10 = vmul.f32 %v23_v4, %v23_v4  ;;  %v67_v42 = vld [vmem:[%s125_s2] sm:$0x1] }
   0x4   :  { %v26_v9 = vadd.f32 %v25_v5, %v22_v3  ;;  %v41_v11 = vadd.f32 %v38_v7, %v37_v6 }
   0x6   :  { %v27_v12 = vadd.f32 %v26_v9, %v23_v4  ;;  %v42_v13 = vadd.f32 %v41_v11, %v39_v8 }
   0x8   :  { %v28_v14 = vrot.slane %v27_v12, 4  ;;  %v43_v15 = vadd.f32 %v42_v13, %v40_v10  ;;  %v24_v24 = vld [vmem:[#allocation2] sm:$0x1]  ;;  %v36_v27 = vld [vmem:[#allocation3] sm:$0x1] }
   0xa   :  { %v29_v16 = vadd.f32 %v28_v14, %v27_v12  ;;  %v44_v17 = vrot.slane %v43_v15, 4 }
   0xc   :  { %v30_v18 = vrot.slane %v29_v16, 2  ;;  %v45_v19 = vadd.f32 %v44_v17, %v43_v15 }
   0xe   :  { %v31_v20 = vadd.f32 %v30_v18, %v29_v16  ;;  %v46_v21 = vrot.slane %v45_v19, 2 }
  0x10   :  { %v32_v22 = vrot.slane %v31_v20, 1  ;;  %v47_v23 = vadd.f32 %v46_v21, %v45_v19 }
  0x12   :  { %v33_v25 = vadd.f32 %v32_v22, %v31_v20  ;;  %v48_v26 = vrot.slane %v47_v23, 1 }
  0x14   :  { %v34_v28 = vadd.f32 %v33_v25, %v24_v24  ;;  %v49_v29 = vadd.f32 %v48_v26, %v47_v23 }
  0x16   :  { %35 = vst [vmem:[#allocation2] sm:$0x1] %v34_v28  ;;  %v50_v30 = vadd.f32 %v49_v29, %v36_v27 }
  0x18   :  { %51 = vst [vmem:[#allocation3] sm:$0x1] %v50_v30 }
  0x1d   :  { %v55_v31 = vld [vmem:[#allocation2] sm:$0x1] }
  0x1e   :  { %v56_v32 = vmul.f32 0.03125, %v55_v31 }
  0x1f   :  { %v57_v33 = vld [vmem:[#allocation3] sm:$0x1] }
  0x20   :  { %v58_v34 = vmul.f32 0.03125, %v57_v33  ;;  %v59_v35 = vmul.f32 %v56_v32, %v56_v32 }
  0x22   :  { %v60_v36 = vsub.f32 %v58_v34, %v59_v35 }
  0x24   :  { %v61_v37 = vmax.f32 %v60_v36, 0.0 }
  0x26   :  { %v63_v38 = vadd.f32 1e-05, %v61_v37 }
  0x28   :  { %76 = vrsqrt.f32 %v63_v38 }
  0x32   :  { %v77_v40 = vpop.eup %76 }
  0x33   :  { %v65_v41 = vmul.f32 %v77_v40, %v62_v39 }
  0x35   :  { %66 = vst [vmem:[%s126_s3] sm:$0x1] %v65_v41  ;;  %v68_v43 = vmul.f32 %v65_v41, %v56_v32 }
  0x37   :  { %v69_v44 = vsub.f32 %v67_v42, %v68_v43 }
  0x39   :  { %70 = vst [vmem:[%s126_s3 + $0x1] sm:$0x1] %v69_v44 }

// kernel: generator_forward.10
= control target key start
LH: loop header
LB: loop body
LE: loop exit
PB: predicated region body
PF: predicated region fallthrough
CT: control target
= control target key end

     0   :  { %8 = vsyncpa [#allocation3], 0  ;;  %s974_s0 = inlined_call_operand.vmem [shape: f32[32,128], index: 0, kind: input, shape index: {}]   ;;  %s975_s1 = inlined_call_operand.vmem [shape: f32[2,128], index: 1, kind: input, shape index: {}]   ;;  %s976_s2 = inlined_call_operand.hbm [shape: bf16[128,1024], index: 2, kind: input, shape index: {}]   ;;  %s977_s3 = inlined_call_operand.vmem [shape: f32[32,1024], index: 3, kind: output, shape index: {}]  }
   0x1   :  { %10 = vsyncpa [#allocation3 + $0x1], 0  ;;  %s784_s12 = smov 0   ;;  %s786_s13 = smov 0  }
   0x2   :  { %s788_s14 = smov 0   ;;  %s790_s15 = smov 0  }
   0x3   :  { %s792_s16 = smov 0   ;;  %s794_s17 = smov 0  }
   0x4 LB: > { %s542_s18 = sadd.s32 4294967295, %s757_s17   ;;  %s25_s19 = sadd.s32 1, %s753_s16  ;;  %s757_s17 = sphi %s794_s17, %s16_s17   ;;  %s753_s16 = sphi %s792_s16, %s988_s16   ;;  %s749_s15 = sphi %s790_s15, %s987_s15   ;;  %s745_s14 = sphi %s788_s14, %s986_s14   ;;  %s741_s13 = sphi %s786_s13, %s985_s13   ;;  %s737_s12 = sphi %s784_s12, %s984_s12  }
   0x5   : > { %p26_p0 = scmp.ge.s32.totalorder %s25_s19, 4  ;;  %s82_s20 = sadd.s32 1, %s745_s14 }
   0x6   : > { %p89_p1 = scmp.ne.s32.totalorder %s745_s14, %s741_s13  ;;  %p90_p2 = scmp.eq.s32.totalorder %s757_s17, 0 }
   0x7   : > { %s990_s19 = smov (%p26_p0, %s25_s19), 0  ;;  %p95_p4 = scmp.ne.s32.totalorder %s741_s13, %s737_s12 }
   0x8   : > { %p820_p3 = por %p90_p2, %p89_p1  ;;  %s79_s22 = ssub.s32 %s753_s16, %s990_s19 }
   0x9   : > { %p96_p5 = scmp.eq.s32.totalorder %s542_s18, 0  ;;  %p80_p6 = scmp.eq.s32.totalorder %s79_s22, 0 }
   0xa   : > { %p121_p7 = scmp.eq.s32.totalorder %s542_s18, 3  ;;  %p600_p10 = scmp.lt.s32.totalorder %s757_s17, 4 }
   0xb   : > { %p827_p8 = por %p96_p5, %p95_p4  ;;  %s159_s26 = sand.u32 1, %s745_s14  }
   0xc   : > { %s832_s24 = scalar_select %p80_p6, %s745_s14, %s82_s20  }
   0xd   : > { %p834_p9 = por %p121_p7, %p89_p1  ;;  %s576_s27 = sshll.u32 %s753_s16, 7 }
   0xe   : > { %s547_s28 = sshll.u32 %s159_s26, 7  ;;  %s844_s4 = scalar_lea.hbm %s976_s2, %s576_s27 }
   0xf   : > { %s980_s25 = scalar_select %p834_p9, 1, 0 }
  0x10   : > { %s163_s5 = scalar_lea.vmem [#allocation2], %s547_s28  ;;  %p848_p11 = pnand %p600_p10, %p820_p3 }
  0x11   : > { %s170_s6 = sshll.u32 %s163_s5, 4  ;;  %s855_s8 = scalar_lea.sflag [#allocation3], %s159_s26  ;;  %s852_s6 = int_to_ptr.vmem [resolvable:$true] %s170_s6 }
  0x12   : > { %s677_s9 = scalar_lea.hbm %s844_s4, 2048  ;;  %p679_p0 = pneg %p848_p11 }
  0x13   : > { %p678_p13 = scmp.ne.s32.totalorder %s844_s4, %s677_s9  ;;  %s682_s12 = scalar_lea.hbm %s976_s2, 8192 }
  0x14   : > { %p683_p3 = scmp.lt.u32.totalorder %s844_s4, %s976_s2  ;;  %p684_p4 = scmp.lt.u32.totalorder %s682_s12, %s677_s9 }
  0x15   : > { %p680_p1 = pnand %p679_p0, %p678_p13  ;;  %p686_p6 = scmp.lt.u32.totalorder %s677_s9, %s844_s4 }
  0x16   : > { %p685_p5 = por %p684_p4, %p683_p3 }
  0x17   : > { %p681_p2 = pneg %p680_p1 }
  0x18   : > { %p687_p7 = por %p686_p6, %p685_p5 }
  0x1a   : > { %p688_p10 = pnand %p687_p7, %p681_p2 }
  0x1c   : > { %691 = shalt.err (!%p688_p10)
}
  0x1d   : > { %s692_s21 = scalar_lea.vmem %s852_s6, 2048  ;;  %s759_s22 = smov [#allocation2]  }
  0x1e   : > { %p693_p13 = scmp.ne.s32.totalorder %s852_s6, %s692_s21  ;;  %s697_s26 = sshll.u32 %s759_s22, 4  ;;  %s698_s26 = int_to_ptr.vmem [resolvable:$false] %s697_s26 }
  0x1f   : > { %s699_s27 = scalar_lea.vmem %s698_s26, 4096  ;;  %p700_p9 = scmp.lt.s32.totalorder %s852_s6, %s698_s26 }
  0x20   : > { %p695_p1 = pnand %p693_p13, %p679_p0  ;;  %p701_p3 = scmp.lt.s32.totalorder %s699_s27, %s692_s21 }
  0x22   : > { %p696_p12 = pneg %p695_p1  ;;  %p702_p4 = por %p701_p3, %p700_p9 }
  0x24   : > { %p703_p5 = pnand %p702_p4, %p696_p12 }
  0x26   : > { %706 = shalt.err (!%p703_p5)
}
  0x27   : > { %s760_s28 = smov 512   ;;  %s761_s29 = smov 128  }
  0x28   : > { %s762_s30 = smov 8   ;;  %p178_p0 = scmp.lt.s32.totalorder %s757_s17, 5 }
  0x29   : > { %599 = dma.hbm_to_vmem [thread:$0]  (!%p848_p11), %s844_s4, 2048, %s852_s6, %s855_s8, %s760_s28, %s761_s29, %s762_s30  }
  0x2a   : > { %p982_p2 = scmp.ge.s32.totalorder %s757_s17, 1 }
  0x2c   : > { %p179_p6 = pnand %p982_p2, %p178_p0 }
  0x2d   : > { %s887_s5 = sand.u32 (!%p179_p6), 1, %s741_s13  }
  0x2e   : > { %182 = sbr.rel (%p179_p6) target bundleno = 313 (0x139), region = 32  ;;  %s551_s9 = sshll.u32 (!%p179_p6), %s887_s5, 7 }
  0x2f   : > { %s185_s10 = scalar_lea.sflag (!%p179_p6), [#allocation3], %s887_s5  ;;  %s891_s11 = scalar_lea.vmem (!%p179_p6), [#allocation2], %s551_s9 }
  0x35   : > { %732 = dma.done.wait (%p827_p8), %s185_s10, 2048  }
  0x36   : > { %734 = vsyncadd (%p827_p8), %s185_s10, 4294965248  ;;  %v763_v0 = vmov 0   ;;  %v653_v1 = vld [vmem:[%s891_s11 + $0x4] ss:$8 sps:$4 sm:$0xff]   ;;  %v655_v2 = vld [vmem:[%s891_s11] ss:$8 sps:$4 sm:$0xff]  }
  0x37   : > { %381 = vmatprep.mubr.bf16.mxu0 %v763_v0  ;;  %391 = vmatprep.mubr.bf16.mxu1 %v763_v0  ;;  %v656_v3 = vld [vmem:[%s891_s11 + $0x14] ss:$8 sps:$4 sm:$0xff]   ;;  %v658_v4 = vld [vmem:[%s891_s11 + $0x10] ss:$8 sps:$4 sm:$0xff]   ;;  %v659_v5 = vld [vmem:[%s891_s11 + $0x24] ss:$8 sps:$4 sm:$0xff]  }
  0x38   : > { %349 = vmatprep.subr.bf16.mxu0 %v653_v1  ;;  %578 = vmatprep.subr.bf16.mxu1 %v653_v1  ;;  %v661_v6 = vld [vmem:[%s891_s11 + $0x20] ss:$8 sps:$4 sm:$0xff]   ;;  %v662_v7 = vld [vmem:[%s891_s11 + $0x34] ss:$8 sps:$4 sm:$0xff]   ;;  %v664_v8 = vld [vmem:[%s891_s11 + $0x30] ss:$8 sps:$4 sm:$0xff]  }
  0x39   : > { %350 = vmatpush1.bf16.msra.mxu0 %v655_v2  ;;  %586 = vmatpush1.bf16.msra.mxu1 %v655_v2  ;;  %v665_v9 = vld [vmem:[%s891_s11 + $0x44] ss:$8 sps:$4 sm:$0xff]   ;;  %v667_v10 = vld [vmem:[%s891_s11 + $0x40] ss:$8 sps:$4 sm:$0xff]   ;;  %v227_v14 = vld [vmem:[%s974_s0 + $0x10] sm:$0xff]  ;;  %s552_s28 = sshll.u32 %s887_s5, 6 }
  0x3a   : > { %351 = vmatprep.subr.bf16.mxu0 %v656_v3  ;;  %579 = vmatprep.subr.bf16.mxu1 %v656_v3  ;;  %v225_v11 = vld [vmem:[%s974_s0] sm:$0xff]  ;;  %v226_v12 = vld [vmem:[%s974_s0 + $0x8] sm:$0xff]  ;;  %v228_v15 = vld [vmem:[%s974_s0 + $0x18] sm:$0xff]  ;;  %s932_s29 = scalar_lea.vmem [#allocation4], %s552_s28  ;;  %p983_p8 = scmp.ne.s32.totalorder %s980_s25, 0 }
  0x3b   : > { %v553_v13 = vld [vmem:[%s975_s1] ss:$0 sm:$0xff]  ;;  %v668_v16 = vld [vmem:[%s891_s11 + $0x54] ss:$8 sps:$4 sm:$0xff]   ;;  %v670_v21 = vld [vmem:[%s891_s11 + $0x50] ss:$8 sps:$4 sm:$0xff]  }
  0x3c   : > { %v234_v17 = vmul.f32 %v553_v13, %v225_v11  ;;  %v235_v18 = vmul.f32 %v553_v13, %v226_v12  ;;  %v236_v19 = vmul.f32 %v553_v13, %v227_v14  ;;  %v237_v20 = vmul.f32 %v553_v13, %v228_v15  ;;  %v554_v22 = vld [vmem:[%s975_s1 + $0x1] ss:$0 sm:$0xff]  ;;  %v671_v23 = vld [vmem:[%s891_s11 + $0x64] ss:$8 sps:$4 sm:$0xff]   ;;  %v674_v29 = vld [vmem:[%s891_s11 + $0x74] ss:$8 sps:$4 sm:$0xff]  }
  0x3d   : > { %352 = vmatpush1.bf16.msra.mxu0 %v658_v4  ;;  %587 = vmatpush1.bf16.msra.mxu1 %v658_v4  ;;  %v673_v28 = vld [vmem:[%s891_s11 + $0x60] ss:$8 sps:$4 sm:$0xff]   ;;  %v676_v34 = vld [vmem:[%s891_s11 + $0x70] ss:$8 sps:$4 sm:$0xff]   ;;  %s577_s30 = sshll.u32 (%p983_p8), %s749_s15, 4 }
  0x3e   : > { %353 = vmatprep.subr.bf16.mxu0 %v659_v5  ;;  %580 = vmatprep.subr.bf16.mxu1 %v659_v5  ;;  %v243_v24 = vadd.f32 %v554_v22, %v234_v17  ;;  %v244_v25 = vadd.f32 %v554_v22, %v235_v18  ;;  %v245_v26 = vadd.f32 %v554_v22, %v236_v19  ;;  %s422_s10 = scalar_lea.vmem (%p983_p8), %s977_s3, %s577_s30 }
  0x3f   : > { %v246_v27 = vadd.f32 %v554_v22, %v237_v20 }
  0x40   : > { %v247_v30 = vmax.f32 %v243_v24, 0.0  ;;  %v248_v31 = vmax.f32 %v244_v25, 0.0  ;;  %v249_v32 = vmax.f32 %v245_v26, 0.0 }
  0x41   : > { %354 = vmatpush1.bf16.msra.mxu0 %v661_v6  ;;  %588 = vmatpush1.bf16.msra.mxu1 %v661_v6  ;;  %v250_v33 = vmax.f32 %v246_v27, 0.0 }
  0x42   : > { %355 = vmatprep.subr.bf16.mxu0 %v662_v7  ;;  %581 = vmatprep.subr.bf16.mxu1 %v662_v7  ;;  %v251_v35 = vpack.c.bf16 %v248_v31, %v247_v30 }
  0x43   : > { %v252_v36 = vpack.c.bf16 %v250_v33, %v249_v32 }
  0x45   : > { %356 = vmatpush1.bf16.msra.mxu0 %v664_v8  ;;  %589 = vmatpush1.bf16.msra.mxu1 %v664_v8 }
  0x46   : > { %357 = vmatprep.subr.bf16.mxu0 %v665_v9  ;;  %582 = vmatprep.subr.bf16.mxu1 %v665_v9 }
  0x49   : > { %358 = vmatpush1.bf16.msra.mxu0 %v667_v10  ;;  %590 = vmatpush1.bf16.msra.mxu1 %v667_v10 }
  0x4a   : > { %359 = vmatprep.subr.bf16.mxu0 %v668_v16  ;;  %583 = vmatprep.subr.bf16.mxu1 %v668_v16 }
  0x4d   : > { %360 = vmatpush1.bf16.msra.mxu0 %v670_v21  ;;  %591 = vmatpush1.bf16.msra.mxu1 %v670_v21 }
  0x4e   : > { %361 = vmatprep.subr.bf16.mxu0 %v671_v23  ;;  %584 = vmatprep.subr.bf16.mxu1 %v671_v23 }
  0x51   : > { %362 = vmatpush1.bf16.msra.mxu0 %v673_v28  ;;  %592 = vmatpush1.bf16.msra.mxu1 %v673_v28 }
  0x52   : > { %363 = vmatprep.subr.bf16.mxu0 %v674_v29  ;;  %585 = vmatprep.subr.bf16.mxu1 %v674_v29 }
  0x55   : > { %364 = vmatpush1.bf16.msra.mxu0 %v676_v34  ;;  %593 = vmatpush1.bf16.msra.mxu1 %v676_v34 }
  0x58   : > { %382 = vmatmul.mubr.bf16.vlgmr.msra.gmra.mrb[0].mxu0 %v251_v35  ;;  %392 = vmatmul.mubr.bf16.vlgmr.msra.gmra.mrb[0].mxu1 %v252_v36 }
 0x129   : > { %416 = sbr.rel (!%p983_p8) target bundleno = 313 (0x139), region = 40 }
 0x12b   : > { %v383_v37 = vpop.f32.mrb[0].mxu0  ;;  %v393_v38 = vpop.f32.mrb[0].mxu1 }
 0x12c   : > { %402 = vst [vmem:[%s932_s29] sm:$0xff] %v383_v37  ;;  %406 = vst [vmem:[%s932_s29 + $0x20] sm:$0xff] %v393_v38  ;;  %v385_v39 = vpop.f32.mrb[1].mxu0  ;;  %v395_v40 = vpop.f32.mrb[1].mxu1 }
 0x12d   : > { %403 = vst [vmem:[%s932_s29 + $0x8] sm:$0xff] %v385_v39  ;;  %407 = vst [vmem:[%s932_s29 + $0x28] sm:$0xff] %v395_v40  ;;  %v387_v41 = vpop.f32.mrb[2].mxu0  ;;  %v397_v42 = vpop.f32.mrb[2].mxu1 }
 0x12e   : > { %404 = vst [vmem:[%s932_s29 + $0x10] sm:$0xff] %v387_v41  ;;  %408 = vst [vmem:[%s932_s29 + $0x30] sm:$0xff] %v397_v42  ;;  %v389_v43 = vpop.f32.mrb[3].mxu0  ;;  %v399_v44 = vpop.f32.mrb[3].mxu1 }
 0x12f   : > { %405 = vst [vmem:[%s932_s29 + $0x18] sm:$0xff] %v389_v43  ;;  %409 = vst [vmem:[%s932_s29 + $0x38] sm:$0xff] %v399_v44 }
 0x133   : > { %v435_v45 = vld [vmem:[%s932_s29] sm:$0xff] }
 0x134   : > { %v437_v46 = vld [vmem:[%s932_s29 + $0x8] sm:$0xff]  ;;  %v443_v49 = vld [vmem:[%s932_s29 + $0x20] sm:$0xff]  ;;  %436 = vst [vmem:[%s422_s10] sm:$0xff] %v435_v45 }
 0x135   : > { %v439_v47 = vld [vmem:[%s932_s29 + $0x10] sm:$0xff]  ;;  %v445_v50 = vld [vmem:[%s932_s29 + $0x28] sm:$0xff]  ;;  %438 = vst [vmem:[%s422_s10 + $0x8] sm:$0xff] %v437_v46  ;;  %444 = vst [vmem:[%s422_s10 + $0x80] sm:$0xff] %v443_v49 }
 0x136   : > { %v441_v48 = vld [vmem:[%s932_s29 + $0x18] sm:$0xff]  ;;  %440 = vst [vmem:[%s422_s10 + $0x40] sm:$0xff] %v439_v47  ;;  %446 = vst [vmem:[%s422_s10 + $0x88] sm:$0xff] %v445_v50  ;;  %v447_v51 = vld [vmem:[%s932_s29 + $0x30] sm:$0xff] }
 0x137   : > { %442 = vst [vmem:[%s422_s10 + $0x48] sm:$0xff] %v441_v48  ;;  %v449_v52 = vld [vmem:[%s932_s29 + $0x38] sm:$0xff]  ;;  %448 = vst [vmem:[%s422_s10 + $0xc0] sm:$0xff] %v447_v51 }
 0x138   : > { %450 = vst [vmem:[%s422_s10 + $0xc8] sm:$0xff] %v449_v52 }
 0x139 PF: > { %s16_s17 = sadd.s32 1, %s757_s17   ;;  %s984_s12 = smov %s741_s13 }
 0x13a   : > { %p13_p9 = scmp.ge.s32.totalorder %s16_s17, 6   ;;  %s985_s13 = smov %s745_s14 }
 0x13b   : > { %s986_s14 = smov %s832_s24  ;;  %s987_s15 = smov %s753_s16 }
 0x13c   : > { %s988_s16 = smov %s990_s19  ;;  %15 = sbr.rel (!%p13_p9) target bundleno = 4 (0x4), region = 98 }
 0x143   :  { %466 = vsyncpa [#allocation3], 1 }
 0x144   :  { %468 = vsyncpa [#allocation3 + $0x1], 1 }

// kernel: generator_forward.12
= control target key start
LH: loop header
LB: loop body
LE: loop exit
PB: predicated region body
PF: predicated region fallthrough
CT: control target
= control target key end

     0   :  { %s901_s12 = smov 0   ;;  %s903_s13 = smov 0   ;;  %s1193_s0 = inlined_call_operand.vmem [shape: f32[128,64], index: 0, kind: input, shape index: {}]   ;;  %s1194_s1 = inlined_call_operand.vmem [shape: f32[2,64], index: 1, kind: input, shape index: {}]   ;;  %s1195_s2 = inlined_call_operand.vmem [shape: bf16[64,512], index: 2, kind: input, shape index: {}]   ;;  %s1196_s3 = inlined_call_operand.vmem [shape: f32[128,512], index: 3, kind: output, shape index: {}]  }
   0x1   :  { %s905_s14 = smov 0   ;;  %s907_s15 = smov 0  }
   0x2   :  { %s909_s16 = smov 0  }
   0x3 LB: > { %s22_s17 = sadd.s32 1, %s874_s15  ;;  %s743_s18 = sadd.s32 4294967295, %s878_s16   ;;  %s878_s16 = sphi %s909_s16, %s13_s16   ;;  %s874_s15 = sphi %s907_s15, %s1201_s15   ;;  %s870_s14 = sphi %s905_s14, %s1200_s14   ;;  %s866_s13 = sphi %s903_s13, %s1199_s13   ;;  %s862_s12 = sphi %s901_s12, %s1198_s12  }
   0x4   : > { %p23_p0 = scmp.ge.s32.totalorder %s22_s17, 2  ;;  %p86_p1 = scmp.ne.s32.totalorder %s866_s13, %s862_s12 }
   0x5   : > { %p87_p2 = scmp.eq.s32.totalorder %s878_s16, 0  ;;  %p118_p4 = scmp.eq.s32.totalorder %s743_s18, 1 }
   0x6   : > { %s1203_s17 = smov (%p23_p0, %s22_s17), 0  ;;  %s79_s20 = sadd.s32 1, %s866_s13 }
   0x7   : > { %p88_p3 = por %p87_p2, %p86_p1  ;;  %s76_s19 = ssub.s32 %s874_s15, %s1203_s17 }
   0x8   : > { %p77_p5 = scmp.eq.s32.totalorder %s76_s19, 0  ;;  %p936_p6 = por %p118_p4, %p86_p1 }
   0x9   : > { %p747_p7 = scmp.ge.s32.totalorder %s878_s16, 2 }
   0xa   : > { %s941_s22 = scalar_select %p77_p5, %s866_s13, %s79_s20  }
   0xb   : > { %152 = sbr.rel (%p747_p7) target bundleno = 26 (0x1a), region = 24 }
  0x12   : > { %155 = sbr.rel (!%p88_p3) target bundleno = 26 (0x1a), region = 28  ;;  %s157_s23 = sand.u32 (%p88_p3), 1, %s866_s13  }
  0x13   : > { %s777_s24 = sshll.u32 (%p88_p3), %s874_s15, 3  ;;  %s748_s25 = sshll.u32 (%p88_p3), %s157_s23, 6 }
  0x14   : > { %s162_s28 = scalar_lea.vmem (%p88_p3), %s1195_s2, %s777_s24  ;;  %s159_s29 = scalar_lea.vmem (%p88_p3), [#allocation2], %s748_s25 }
  0x15   : > { %v204_v0 = vld [vmem:[%s162_s28] sm:$0xff] (%p88_p3)  ;;  %v206_v1 = vld [vmem:[%s162_s28 + $0x10] sm:$0xff] (%p88_p3) }
  0x16   : > { %v208_v2 = vld [vmem:[%s162_s28 + $0x20] sm:$0xff] (%p88_p3)  ;;  %205 = vst [vmem:[%s159_s29] sm:$0xff] (%p88_p3), %v204_v0  ;;  %207 = vst [vmem:[%s159_s29 + $0x8] sm:$0xff] (%p88_p3), %v206_v1  ;;  %v210_v3 = vld [vmem:[%s162_s28 + $0x30] sm:$0xff] (%p88_p3) }
  0x17   : > { %209 = vst [vmem:[%s159_s29 + $0x10] sm:$0xff] (%p88_p3), %v208_v2  ;;  %v212_v4 = vld [vmem:[%s162_s28 + $0x40] sm:$0xff] (%p88_p3)  ;;  %v214_v5 = vld [vmem:[%s162_s28 + $0x50] sm:$0xff] (%p88_p3)  ;;  %211 = vst [vmem:[%s159_s29 + $0x18] sm:$0xff] (%p88_p3), %v210_v3 }
  0x18   : > { %213 = vst [vmem:[%s159_s29 + $0x20] sm:$0xff] (%p88_p3), %v212_v4  ;;  %215 = vst [vmem:[%s159_s29 + $0x28] sm:$0xff] (%p88_p3), %v214_v5  ;;  %v216_v6 = vld [vmem:[%s162_s28 + $0x60] sm:$0xff] (%p88_p3)  ;;  %v218_v7 = vld [vmem:[%s162_s28 + $0x70] sm:$0xff] (%p88_p3) }
  0x19   : > { %217 = vst [vmem:[%s159_s29 + $0x30] sm:$0xff] %v216_v6  ;;  %219 = vst [vmem:[%s159_s29 + $0x38] sm:$0xff] %v218_v7 }
  0x1a PF: > { %p751_p8 = scmp.ge.s32.totalorder %s878_s16, 1  ;;  %p224_p9 = scmp.lt.s32.totalorder %s878_s16, 3 }
  0x1c   : > { %p225_p10 = pnand %p751_p8, %p224_p9 }
  0x1d   : > { %s231_s30 = sand.u32 (!%p225_p10), 1, %s862_s12   ;;  %v880_v8 = vmov (!%p225_p10), 0   ;;  %v268_v9 = vld [vmem:[%s1193_s0] sm:$0xff] (!%p225_p10)  ;;  %v269_v10 = vld [vmem:[%s1193_s0 + $0x8] sm:$0xff] (!%p225_p10)  ;;  %v270_v28 = vld [vmem:[%s1193_s0 + $0x10] sm:$0xff] (!%p225_p10)  ;;  %vm398_vm0 = vcmask (!%p225_p10), 523264  }
  0x1e   : > { %228 = sbr.rel (%p225_p10) target bundleno = 298 (0x12a), region = 66  ;;  %s752_s4 = sshll.u32 (!%p225_p10), %s231_s30, 6  ;;  %455 = vmatprep.mubr.bf16.mxu0 (!%p225_p10), %v880_v8  ;;  %495 = vmatprep.mubr.bf16.mxu1 (!%p225_p10), %v880_v8  ;;  %v965_v11 = vld [vmem:[%s1194_s1] ss:$0 sm:$0xff] (!%p225_p10)  ;;  %v277_v13 = vld [vmem:[%s1193_s0 + $0x48] sm:$0xff] (!%p225_p10)  ;;  %v271_v29 = vld [vmem:[%s1193_s0 + $0x18] sm:$0xff] (!%p225_p10) }
  0x1f   : > { %v276_v12 = vld [vmem:[%s1193_s0 + $0x40] sm:$0xff] (!%p225_p10)  ;;  %s973_s23 = scalar_lea.vmem (!%p225_p10), [#allocation2], %s752_s4  ;;  %v289_v16 = vmul.f32 (!%p225_p10), %v965_v11, %v268_v9  ;;  %v290_v17 = vmul.f32 (!%p225_p10), %v965_v11, %v269_v10  ;;  %v298_v21 = vmul.f32 (!%p225_p10), %v965_v11, %v277_v13  ;;  %v278_v31 = vld [vmem:[%s1193_s0 + $0x50] sm:$0xff] (!%p225_p10)  ;;  %v279_v32 = vld [vmem:[%s1193_s0 + $0x58] sm:$0xff] (!%p225_p10)  ;;  %v291_v36 = vmul.f32 (!%p225_p10), %v965_v11, %v270_v28  ;;  %s753_s6 = sshll.u32 (!%p225_p10), %s231_s30, 8 }
  0x20   : > { %v828_v14 = vld [vmem:[%s973_s23 + $0x4] ss:$8 sps:$4 sm:$0xff] (!%p225_p10)   ;;  %v830_v15 = vld [vmem:[%s973_s23] ss:$8 sps:$4 sm:$0xff] (!%p225_p10)   ;;  %v831_v18 = vld [vmem:[%s973_s23 + $0x14] ss:$8 sps:$4 sm:$0xff] (!%p225_p10)   ;;  %v297_v20 = vmul.f32 (!%p225_p10), %v965_v11, %v276_v12  ;;  %v292_v37 = vmul.f32 (!%p225_p10), %v965_v11, %v271_v29  ;;  %v299_v40 = vmul.f32 (!%p225_p10), %v965_v11, %v278_v31  ;;  %v300_v41 = vmul.f32 (!%p225_p10), %v965_v11, %v279_v32 }
  0x21   : > { %423 = vmatprep.subr.bf16.mxu0 (!%p225_p10), %v828_v14  ;;  %779 = vmatprep.subr.bf16.mxu1 (!%p225_p10), %v828_v14  ;;  %v983_v19 = vld [vmem:[%s1194_s1 + $0x1] ss:$0 sm:$0xff] (!%p225_p10)  ;;  %v833_v22 = vld [vmem:[%s973_s23 + $0x10] ss:$8 sps:$4 sm:$0xff] (!%p225_p10)   ;;  %v834_v23 = vld [vmem:[%s973_s23 + $0x24] ss:$8 sps:$4 sm:$0xff] (!%p225_p10)  }
  0x22   : > { %424 = vmatpush1.bf16.msra.mxu0 (!%p225_p10), %v830_v15  ;;  %783 = vmatpush1.bf16.msra.mxu1 (!%p225_p10), %v830_v15  ;;  %v310_v24 = vadd.f32 (!%p225_p10), %v983_v19, %v289_v16  ;;  %v311_v25 = vadd.f32 (!%p225_p10), %v983_v19, %v290_v17  ;;  %v318_v26 = vadd.f32 (!%p225_p10), %v983_v19, %v297_v20  ;;  %v836_v30 = vld [vmem:[%s973_s23 + $0x20] ss:$8 sps:$4 sm:$0xff] (!%p225_p10)   ;;  %v837_v33 = vld [vmem:[%s973_s23 + $0x34] ss:$8 sps:$4 sm:$0xff] (!%p225_p10)   ;;  %v839_v42 = vld [vmem:[%s973_s23 + $0x30] ss:$8 sps:$4 sm:$0xff] (!%p225_p10)  }
  0x23   : > { %425 = vmatprep.subr.bf16.mxu0 (!%p225_p10), %v831_v18  ;;  %780 = vmatprep.subr.bf16.mxu1 (!%p225_p10), %v831_v18  ;;  %v319_v27 = vadd.f32 (!%p225_p10), %v983_v19, %v298_v21  ;;  %v312_v43 = vadd.f32 (!%p225_p10), %v983_v19, %v291_v36  ;;  %v313_v44 = vadd.f32 (!%p225_p10), %v983_v19, %v292_v37  ;;  %v272_v49 = vld [vmem:[%s1193_s0 + $0x20] sm:$0xff] (!%p225_p10)  ;;  %v273_v50 = vld [vmem:[%s1193_s0 + $0x28] sm:$0xff] (!%p225_p10)  ;;  %v274_v3 = vld [vmem:[%s1193_s0 + $0x30] sm:$0xff] (!%p225_p10)  ;;  %s1072_s7 = scalar_lea.vmem (!%p225_p10), [#allocation3], %s753_s6 }
  0x24   : > { %v326_v34 = vmax.f32 (!%p225_p10), %v310_v24, 0.0  ;;  %v327_v35 = vmax.f32 (!%p225_p10), %v311_v25, 0.0  ;;  %v334_v38 = vmax.f32 (!%p225_p10), %v318_v26, 0.0  ;;  %v320_v47 = vadd.f32 (!%p225_p10), %v983_v19, %v299_v40  ;;  %v280_v51 = vld [vmem:[%s1193_s0 + $0x60] sm:$0xff] (!%p225_p10)  ;;  %v281_v52 = vld [vmem:[%s1193_s0 + $0x68] sm:$0xff] (!%p225_p10)  ;;  %v275_v4 = vld [vmem:[%s1193_s0 + $0x38] sm:$0xff] (!%p225_p10) }
  0x25   : > { %v335_v39 = vmax.f32 %v319_v27, 0.0  ;;  %v321_v48 = vadd.f32 %v983_v19, %v300_v41  ;;  %v328_v53 = vmax.f32 %v312_v43, 0.0  ;;  %v329_v54 = vmax.f32 %v313_v44, 0.0  ;;  %v282_v5 = vld [vmem:[%s1193_s0 + $0x70] sm:$0xff]  ;;  %v283_v6 = vld [vmem:[%s1193_s0 + $0x78] sm:$0xff]  ;;  %s778_s12 = sshll.u32 (%p936_p6), %s870_s14, 4 }
  0x26   : > { %426 = vmatpush1.bf16.msra.mxu0 %v833_v22  ;;  %784 = vmatpush1.bf16.msra.mxu1 %v833_v22  ;;  %v342_v45 = vpack.c.bf16 %v327_v35, %v326_v34  ;;  %v293_v55 = vmul.f32 %v965_v11, %v272_v49  ;;  %v294_v56 = vmul.f32 %v965_v11, %v273_v50  ;;  %v336_v57 = vmax.f32 %v320_v47, 0.0  ;;  %s1115_s9 = scalar_lea.vmem (%p936_p6), %s1196_s3, %s778_s12 }
  0x27   : > { %427 = vmatprep.subr.bf16.mxu0 %v834_v23  ;;  %781 = vmatprep.subr.bf16.mxu1 %v834_v23  ;;  %v346_v46 = vpack.c.bf16 %v335_v39, %v334_v38  ;;  %v337_v58 = vmax.f32 %v321_v48, 0.0  ;;  %v301_v59 = vmul.f32 %v965_v11, %v280_v51  ;;  %v302_v60 = vmul.f32 %v965_v11, %v281_v52 }
  0x28   : > { %v314_v61 = vadd.f32 %v983_v19, %v293_v55  ;;  %v315_v62 = vadd.f32 %v983_v19, %v294_v56  ;;  %v343_v63 = vpack.c.bf16 %v329_v54, %v328_v53  ;;  %v295_v10 = vmul.f32 %v965_v11, %v274_v3 }
  0x29   : > { %v347_v0 = vpack.c.bf16 %v337_v58, %v336_v57  ;;  %v322_v1 = vadd.f32 %v983_v19, %v301_v59  ;;  %v323_v2 = vadd.f32 %v983_v19, %v302_v60  ;;  %v296_v12 = vmul.f32 %v965_v11, %v275_v4 }
  0x2a   : > { %428 = vmatpush1.bf16.msra.mxu0 %v836_v30  ;;  %785 = vmatpush1.bf16.msra.mxu1 %v836_v30  ;;  %v330_v7 = vmax.f32 %v314_v61, 0.0  ;;  %v331_v9 = vmax.f32 %v315_v62, 0.0  ;;  %v303_v15 = vmul.f32 %v965_v11, %v282_v5  ;;  %v304_v16 = vmul.f32 %v965_v11, %v283_v6 }
  0x2b   : > { %429 = vmatprep.subr.bf16.mxu0 %v837_v33  ;;  %782 = vmatprep.subr.bf16.mxu1 %v837_v33  ;;  %v338_v13 = vmax.f32 %v322_v1, 0.0  ;;  %v339_v14 = vmax.f32 %v323_v2, 0.0  ;;  %v316_v17 = vadd.f32 %v983_v19, %v295_v10  ;;  %v317_v18 = vadd.f32 %v983_v19, %v296_v12 }
  0x2c   : > { %v344_v20 = vpack.c.bf16 %v331_v9, %v330_v7  ;;  %v324_v22 = vadd.f32 %v983_v19, %v303_v15  ;;  %v325_v23 = vadd.f32 %v983_v19, %v304_v16 }
  0x2d   : > { %v348_v21 = vpack.c.bf16 %v339_v14, %v338_v13  ;;  %v332_v11 = vmax.f32 %v316_v17, 0.0  ;;  %v333_v24 = vmax.f32 %v317_v18, 0.0 }
  0x2e   : > { %430 = vmatpush1.bf16.msra.mxu0 %v839_v42  ;;  %786 = vmatpush1.bf16.msra.mxu1 %v839_v42  ;;  %v340_v25 = vmax.f32 %v324_v22, 0.0  ;;  %v341_v26 = vmax.f32 %v325_v23, 0.0 }
  0x2f   : > { %v345_v27 = vpack.c.bf16 %v333_v24, %v332_v11 }
  0x30   : > { %v349_v28 = vpack.c.bf16 %v341_v26, %v340_v25 }
  0x31   : > { %764 = vmatmul.mubr.msk.bf16.vlgmr.msra.gmra.mrb[0].mxu0 %vm398_vm0, %v342_v45  ;;  %768 = vmatmul.mubr.msk.bf16.vlgmr.msra.gmra.mrb[0].mxu1 %vm398_vm0, %v346_v46 }
  0x32   : > { %465 = vmatprep.mubr.bf16.mxu0 %v880_v8  ;;  %505 = vmatprep.mubr.bf16.mxu1 %v880_v8 }
  0x39   : > { %765 = vmatmul.mubr.msk.bf16.gmra.mrb[4].mxu0 %vm398_vm0, %v343_v63  ;;  %769 = vmatmul.mubr.msk.bf16.gmra.mrb[4].mxu1 %vm398_vm0, %v347_v0 }
  0x3a   : > { %475 = vmatprep.mubr.bf16.mxu0 %v880_v8  ;;  %515 = vmatprep.mubr.bf16.mxu1 %v880_v8 }
  0x41   : > { %766 = vmatmul.mubr.msk.bf16.gmra.mrb[8].mxu0 %vm398_vm0, %v344_v20  ;;  %770 = vmatmul.mubr.msk.bf16.gmra.mrb[8].mxu1 %vm398_vm0, %v348_v21 }
  0x42   : > { %485 = vmatprep.mubr.bf16.mxu0 %v880_v8  ;;  %525 = vmatprep.mubr.bf16.mxu1 %v880_v8 }
  0x49   : > { %767 = vmatmul.mubr.msk.bf16.gmra.mrb[12].mxu0 %vm398_vm0, %v345_v27  ;;  %771 = vmatmul.mubr.msk.bf16.gmra.mrb[12].mxu1 %vm398_vm0, %v349_v28 }
 0x104   : > { %v457_v19 = vpop.f32.mrb[0].mxu0  ;;  %v497_v29 = vpop.f32.mrb[0].mxu1 }
 0x105   : > { %536 = vst [vmem:[%s1072_s7] sm:$0xff] %v457_v19  ;;  %552 = vst [vmem:[%s1072_s7 + $0x80] sm:$0xff] %v497_v29  ;;  %v459_v8 = vpop.f32.mrb[1].mxu0  ;;  %v499_v30 = vpop.f32.mrb[1].mxu1 }
 0x106   : > { %537 = vst [vmem:[%s1072_s7 + $0x8] sm:$0xff] %v459_v8  ;;  %553 = vst [vmem:[%s1072_s7 + $0x88] sm:$0xff] %v499_v30  ;;  %v461_v31 = vpop.f32.mrb[2].mxu0  ;;  %v501_v32 = vpop.f32.mrb[2].mxu1 }
 0x107   : > { %538 = vst [vmem:[%s1072_s7 + $0x10] sm:$0xff] %v461_v31  ;;  %554 = vst [vmem:[%s1072_s7 + $0x90] sm:$0xff] %v501_v32  ;;  %v463_v33 = vpop.f32.mrb[3].mxu0  ;;  %v503_v34 = vpop.f32.mrb[3].mxu1 }
 0x108   : > { %539 = vst [vmem:[%s1072_s7 + $0x18] sm:$0xff] %v463_v33  ;;  %555 = vst [vmem:[%s1072_s7 + $0x98] sm:$0xff] %v503_v34 }
 0x10c   : > { %v467_v35 = vpop.f32.mrb[4].mxu0  ;;  %v507_v36 = vpop.f32.mrb[4].mxu1  ;;  %v593_v59 = vld [vmem:[%s1072_s7] sm:$0xff] (%p936_p6) }
 0x10d   : > { %540 = vst [vmem:[%s1072_s7 + $0x20] sm:$0xff] %v467_v35  ;;  %556 = vst [vmem:[%s1072_s7 + $0xa0] sm:$0xff] %v507_v36  ;;  %v469_v37 = vpop.f32.mrb[5].mxu0  ;;  %v509_v38 = vpop.f32.mrb[5].mxu1  ;;  %v595_v60 = vld [vmem:[%s1072_s7 + $0x8] sm:$0xff] (%p936_p6)  ;;  %v625_v13 = vld [vmem:[%s1072_s7 + $0x80] sm:$0xff] (%p936_p6) }
 0x10e   : > { %541 = vst [vmem:[%s1072_s7 + $0x28] sm:$0xff] %v469_v37  ;;  %557 = vst [vmem:[%s1072_s7 + $0xa8] sm:$0xff] %v509_v38  ;;  %v471_v39 = vpop.f32.mrb[6].mxu0  ;;  %v511_v40 = vpop.f32.mrb[6].mxu1  ;;  %v597_v61 = vld [vmem:[%s1072_s7 + $0x10] sm:$0xff] (%p936_p6)  ;;  %v627_v14 = vld [vmem:[%s1072_s7 + $0x88] sm:$0xff] (%p936_p6) }
 0x10f   : > { %542 = vst [vmem:[%s1072_s7 + $0x30] sm:$0xff] %v471_v39  ;;  %558 = vst [vmem:[%s1072_s7 + $0xb0] sm:$0xff] %v511_v40  ;;  %v473_v41 = vpop.f32.mrb[7].mxu0  ;;  %v513_v42 = vpop.f32.mrb[7].mxu1  ;;  %v599_v62 = vld [vmem:[%s1072_s7 + $0x18] sm:$0xff] (%p936_p6)  ;;  %v629_v15 = vld [vmem:[%s1072_s7 + $0x90] sm:$0xff] (%p936_p6) }
 0x110   : > { %543 = vst [vmem:[%s1072_s7 + $0x38] sm:$0xff] %v473_v41  ;;  %559 = vst [vmem:[%s1072_s7 + $0xb8] sm:$0xff] %v513_v42  ;;  %v631_v16 = vld [vmem:[%s1072_s7 + $0x98] sm:$0xff] (%p936_p6) }
 0x111   : > { %594 = vst [vmem:[%s1115_s9] sm:$0xff] (%p936_p6), %v593_v59  ;;  %596 = vst [vmem:[%s1115_s9 + $0x8] sm:$0xff] (%p936_p6), %v595_v60 }
 0x112   : > { %598 = vst [vmem:[%s1115_s9 + $0x20] sm:$0xff] (%p936_p6), %v597_v61  ;;  %600 = vst [vmem:[%s1115_s9 + $0x28] sm:$0xff] (%p936_p6), %v599_v62 }
 0x113   : > { %626 = vst [vmem:[%s1115_s9 + $0x100] sm:$0xff] (%p936_p6), %v625_v13  ;;  %628 = vst [vmem:[%s1115_s9 + $0x108] sm:$0xff] (%p936_p6), %v627_v14 }
 0x114   : > { %v477_v43 = vpop.f32.mrb[8].mxu0  ;;  %v517_v44 = vpop.f32.mrb[8].mxu1  ;;  %v601_v63 = vld [vmem:[%s1072_s7 + $0x20] sm:$0xff] (%p936_p6)  ;;  %630 = vst [vmem:[%s1115_s9 + $0x120] sm:$0xff] (%p936_p6), %v629_v15  ;;  %632 = vst [vmem:[%s1115_s9 + $0x128] sm:$0xff] (%p936_p6), %v631_v16 }
 0x115   : > { %544 = vst [vmem:[%s1072_s7 + $0x40] sm:$0xff] %v477_v43  ;;  %560 = vst [vmem:[%s1072_s7 + $0xc0] sm:$0xff] %v517_v44  ;;  %v479_v45 = vpop.f32.mrb[9].mxu0  ;;  %v519_v46 = vpop.f32.mrb[9].mxu1  ;;  %v603_v0 = vld [vmem:[%s1072_s7 + $0x28] sm:$0xff] (%p936_p6)  ;;  %v633_v17 = vld [vmem:[%s1072_s7 + $0xa0] sm:$0xff] (%p936_p6) }
 0x116   : > { %545 = vst [vmem:[%s1072_s7 + $0x48] sm:$0xff] %v479_v45  ;;  %561 = vst [vmem:[%s1072_s7 + $0xc8] sm:$0xff] %v519_v46  ;;  %v481_v47 = vpop.f32.mrb[10].mxu0  ;;  %v521_v48 = vpop.f32.mrb[10].mxu1  ;;  %v605_v1 = vld [vmem:[%s1072_s7 + $0x30] sm:$0xff] (%p936_p6)  ;;  %v635_v18 = vld [vmem:[%s1072_s7 + $0xa8] sm:$0xff] (%p936_p6) }
 0x117   : > { %546 = vst [vmem:[%s1072_s7 + $0x50] sm:$0xff] %v481_v47  ;;  %562 = vst [vmem:[%s1072_s7 + $0xd0] sm:$0xff] %v521_v48  ;;  %v483_v49 = vpop.f32.mrb[11].mxu0  ;;  %v523_v50 = vpop.f32.mrb[11].mxu1  ;;  %v607_v2 = vld [vmem:[%s1072_s7 + $0x38] sm:$0xff] (%p936_p6)  ;;  %v637_v20 = vld [vmem:[%s1072_s7 + $0xb0] sm:$0xff] (%p936_p6) }
 0x118   : > { %547 = vst [vmem:[%s1072_s7 + $0x58] sm:$0xff] %v483_v49  ;;  %563 = vst [vmem:[%s1072_s7 + $0xd8] sm:$0xff] %v523_v50  ;;  %v639_v21 = vld [vmem:[%s1072_s7 + $0xb8] sm:$0xff] (%p936_p6) }
 0x119   : > { %602 = vst [vmem:[%s1115_s9 + $0x40] sm:$0xff] (%p936_p6), %v601_v63  ;;  %604 = vst [vmem:[%s1115_s9 + $0x48] sm:$0xff] (%p936_p6), %v603_v0 }
 0x11a   : > { %574 = sbr.rel (!%p936_p6) target bundleno = 298 (0x12a), region = 74  ;;  %606 = vst [vmem:[%s1115_s9 + $0x60] sm:$0xff] (%p936_p6), %v605_v1  ;;  %608 = vst [vmem:[%s1115_s9 + $0x68] sm:$0xff] (%p936_p6), %v607_v2 }
 0x11b   : > { %634 = vst [vmem:[%s1115_s9 + $0x140] sm:$0xff] (%p936_p6), %v633_v17  ;;  %636 = vst [vmem:[%s1115_s9 + $0x148] sm:$0xff] (%p936_p6), %v635_v18 }
 0x11c   : > { %v487_v51 = vpop.f32.mrb[12].mxu0  ;;  %v527_v52 = vpop.f32.mrb[12].mxu1  ;;  %v609_v3 = vld [vmem:[%s1072_s7 + $0x40] sm:$0xff] (%p936_p6)  ;;  %638 = vst [vmem:[%s1115_s9 + $0x160] sm:$0xff] (%p936_p6), %v637_v20  ;;  %640 = vst [vmem:[%s1115_s9 + $0x168] sm:$0xff] (%p936_p6), %v639_v21 }
 0x11d   : > { %548 = vst [vmem:[%s1072_s7 + $0x60] sm:$0xff] %v487_v51  ;;  %564 = vst [vmem:[%s1072_s7 + $0xe0] sm:$0xff] %v527_v52  ;;  %v489_v53 = vpop.f32.mrb[13].mxu0  ;;  %v529_v54 = vpop.f32.mrb[13].mxu1  ;;  %v611_v4 = vld [vmem:[%s1072_s7 + $0x48] sm:$0xff] (%p936_p6)  ;;  %v641_v22 = vld [vmem:[%s1072_s7 + $0xc0] sm:$0xff] (%p936_p6) }
 0x11e   : > { %549 = vst [vmem:[%s1072_s7 + $0x68] sm:$0xff] %v489_v53  ;;  %565 = vst [vmem:[%s1072_s7 + $0xe8] sm:$0xff] %v529_v54  ;;  %v491_v55 = vpop.f32.mrb[14].mxu0  ;;  %v531_v56 = vpop.f32.mrb[14].mxu1  ;;  %v613_v5 = vld [vmem:[%s1072_s7 + $0x50] sm:$0xff] (%p936_p6)  ;;  %v643_v23 = vld [vmem:[%s1072_s7 + $0xc8] sm:$0xff] (%p936_p6) }
 0x11f   : > { %550 = vst [vmem:[%s1072_s7 + $0x70] sm:$0xff] %v491_v55  ;;  %566 = vst [vmem:[%s1072_s7 + $0xf0] sm:$0xff] %v531_v56  ;;  %v493_v57 = vpop.f32.mrb[15].mxu0  ;;  %v533_v58 = vpop.f32.mrb[15].mxu1  ;;  %v615_v6 = vld [vmem:[%s1072_s7 + $0x58] sm:$0xff] (%p936_p6)  ;;  %v645_v11 = vld [vmem:[%s1072_s7 + $0xd0] sm:$0xff] (%p936_p6) }
 0x120   : > { %551 = vst [vmem:[%s1072_s7 + $0x78] sm:$0xff] %v493_v57  ;;  %567 = vst [vmem:[%s1072_s7 + $0xf8] sm:$0xff] %v533_v58  ;;  %v647_v24 = vld [vmem:[%s1072_s7 + $0xd8] sm:$0xff] (%p936_p6) }
 0x121   : > { %610 = vst [vmem:[%s1115_s9 + $0x80] sm:$0xff] %v609_v3  ;;  %612 = vst [vmem:[%s1115_s9 + $0x88] sm:$0xff] %v611_v4 }
 0x122   : > { %614 = vst [vmem:[%s1115_s9 + $0xa0] sm:$0xff] %v613_v5  ;;  %616 = vst [vmem:[%s1115_s9 + $0xa8] sm:$0xff] %v615_v6 }
 0x123   : > { %642 = vst [vmem:[%s1115_s9 + $0x180] sm:$0xff] %v641_v22  ;;  %644 = vst [vmem:[%s1115_s9 + $0x188] sm:$0xff] %v643_v23 }
 0x124   : > { %v617_v7 = vld [vmem:[%s1072_s7 + $0x60] sm:$0xff]  ;;  %646 = vst [vmem:[%s1115_s9 + $0x1a0] sm:$0xff] %v645_v11  ;;  %648 = vst [vmem:[%s1115_s9 + $0x1a8] sm:$0xff] %v647_v24 }
 0x125   : > { %v619_v9 = vld [vmem:[%s1072_s7 + $0x68] sm:$0xff]  ;;  %618 = vst [vmem:[%s1115_s9 + $0xc0] sm:$0xff] %v617_v7  ;;  %v649_v25 = vld [vmem:[%s1072_s7 + $0xe0] sm:$0xff] }
 0x126   : > { %v621_v10 = vld [vmem:[%s1072_s7 + $0x70] sm:$0xff]  ;;  %620 = vst [vmem:[%s1115_s9 + $0xc8] sm:$0xff] %v619_v9  ;;  %v651_v26 = vld [vmem:[%s1072_s7 + $0xe8] sm:$0xff]  ;;  %650 = vst [vmem:[%s1115_s9 + $0x1c0] sm:$0xff] %v649_v25 }
 0x127   : > { %622 = vst [vmem:[%s1115_s9 + $0xe0] sm:$0xff] %v621_v10  ;;  %v623_v12 = vld [vmem:[%s1072_s7 + $0x78] sm:$0xff]  ;;  %652 = vst [vmem:[%s1115_s9 + $0x1c8] sm:$0xff] %v651_v26  ;;  %v653_v27 = vld [vmem:[%s1072_s7 + $0xf0] sm:$0xff] }
 0x128   : > { %624 = vst [vmem:[%s1115_s9 + $0xe8] sm:$0xff] %v623_v12  ;;  %v655_v28 = vld [vmem:[%s1072_s7 + $0xf8] sm:$0xff]  ;;  %654 = vst [vmem:[%s1115_s9 + $0x1e0] sm:$0xff] %v653_v27 }
 0x129   : > { %656 = vst [vmem:[%s1115_s9 + $0x1e8] sm:$0xff] %v655_v28 }
 0x12a PF: > { %s13_s16 = sadd.s32 1, %s878_s16   ;;  %s1198_s12 = smov %s866_s13 }
 0x12b   : > { %p10_p11 = scmp.ge.s32.totalorder %s13_s16, 4   ;;  %s1199_s13 = smov %s941_s22 }
 0x12c   : > { %s1200_s14 = smov %s874_s15  ;;  %s1201_s15 = smov %s1203_s17 }
 0x12d   :  { %12 = sbr.rel (!%p10_p11) target bundleno = 3 (0x3), region = 131 }

// kernel: generator_forward.11
= control target key start
LH: loop header
LB: loop body
LE: loop exit
PB: predicated region body
PF: predicated region fallthrough
CT: control target
= control target key end

     0   :  { %vm18_vm0 = vcmask 516096   ;;  %vm38_vm1 = vcmask 523264   ;;  %v161_v0 = vmov 0.0   ;;  %s280_s0 = inlined_call_operand.vmem [shape: f32[128,64], index: 0, kind: input, shape index: {}]   ;;  %s281_s1 = inlined_call_operand.vmem [shape: f32[1,64], index: 1, kind: input, shape index: {}]   ;;  %s282_s2 = inlined_call_operand.vmem [shape: f32[1,64], index: 2, kind: input, shape index: {}]   ;;  %s283_s3 = inlined_call_operand.vmem [shape: f32[2,64], index: 3, kind: output, shape index: {}]  }
   0x1   :  { %19 = vst.msk [vmem:[#allocation2] sm:$0x1] %vm18_vm0, %v161_v0  ;;  %20 = vst.msk [vmem:[#allocation3] sm:$0x1] %vm18_vm0, %v161_v0  ;;  %v21_v1 = vld [vmem:[%s280_s0] sm:$0xff]  ;;  %v22_v2 = vld [vmem:[%s280_s0 + $0x8] sm:$0xff] }
   0x2   :  { %v23_v3 = vld [vmem:[%s280_s0 + $0x10] sm:$0xff]  ;;  %v24_v4 = vld [vmem:[%s280_s0 + $0x18] sm:$0xff]  ;;  %v39_v5 = vsel %vm38_vm1, %v21_v1, 0.0  ;;  %v40_v6 = vsel %vm38_vm1, %v22_v2, 0.0  ;;  %v25_v8 = vld [vmem:[%s280_s0 + $0x20] sm:$0xff]  ;;  %v80_v16 = vmul.f32 %v21_v1, %v21_v1  ;;  %v81_v17 = vmul.f32 %v22_v2, %v22_v2 }
   0x3   :  { %v42_v7 = vsel %vm38_vm1, %v23_v3, 0.0  ;;  %v41_v9 = vadd.f32 %v40_v6, %v39_v5  ;;  %v44_v10 = vsel %vm38_vm1, %v24_v4, 0.0  ;;  %v26_v11 = vld [vmem:[%s280_s0 + $0x28] sm:$0xff]  ;;  %v46_v13 = vsel %vm38_vm1, %v25_v8, 0.0  ;;  %v27_v14 = vld [vmem:[%s280_s0 + $0x30] sm:$0xff]  ;;  %v28_v20 = vld [vmem:[%s280_s0 + $0x38] sm:$0xff] }
   0x4   :  { %v82_v18 = vmul.f32 %v23_v3, %v23_v3  ;;  %v48_v19 = vsel %vm38_vm1, %v26_v11, 0.0  ;;  %v83_v22 = vmul.f32 %v24_v4, %v24_v4  ;;  %v50_v23 = vsel %vm38_vm1, %v27_v14, 0.0  ;;  %v29_v25 = vld [vmem:[%s280_s0 + $0x40] sm:$0xff]  ;;  %v30_v32 = vld [vmem:[%s280_s0 + $0x48] sm:$0xff]  ;;  %v31_v38 = vld [vmem:[%s280_s0 + $0x50] sm:$0xff] }
   0x5   :  { %v43_v12 = vadd.f32 %v42_v7, %v41_v9  ;;  %v84_v24 = vmul.f32 %v25_v8, %v25_v8  ;;  %v96_v27 = vsel %vm38_vm1, %v80_v16, 0.0  ;;  %v97_v28 = vsel %vm38_vm1, %v81_v17, 0.0  ;;  %v32_v44 = vld [vmem:[%s280_s0 + $0x58] sm:$0xff]  ;;  %v33_v50 = vld [vmem:[%s280_s0 + $0x60] sm:$0xff]  ;;  %v34_v56 = vld [vmem:[%s280_s0 + $0x68] sm:$0xff] }
   0x6   :  { %v99_v29 = vsel %vm38_vm1, %v82_v18, 0.0  ;;  %v52_v30 = vsel %vm38_vm1, %v28_v20, 0.0  ;;  %v98_v31 = vadd.f32 %v97_v28, %v96_v27  ;;  %v85_v34 = vmul.f32 %v26_v11, %v26_v11  ;;  %v35_v62 = vld [vmem:[%s280_s0 + $0x70] sm:$0xff]  ;;  %v36_v4 = vld [vmem:[%s280_s0 + $0x78] sm:$0xff] }
   0x7   :  { %v45_v15 = vadd.f32 %v44_v10, %v43_v12  ;;  %v101_v35 = vsel %vm38_vm1, %v83_v22, 0.0  ;;  %v54_v36 = vsel %vm38_vm1, %v29_v25, 0.0  ;;  %v86_v40 = vmul.f32 %v27_v14, %v27_v14 }
   0x8   :  { %v100_v37 = vadd.f32 %v99_v29, %v98_v31  ;;  %v103_v41 = vsel %vm38_vm1, %v84_v24, 0.0  ;;  %v56_v42 = vsel %vm38_vm1, %v30_v32, 0.0  ;;  %v87_v46 = vmul.f32 %v28_v20, %v28_v20 }
   0x9   :  { %v47_v21 = vadd.f32 %v46_v13, %v45_v15  ;;  %v105_v47 = vsel %vm38_vm1, %v85_v34, 0.0  ;;  %v58_v48 = vsel %vm38_vm1, %v31_v38, 0.0  ;;  %v88_v52 = vmul.f32 %v29_v25, %v29_v25 }
   0xa   :  { %v102_v43 = vadd.f32 %v101_v35, %v100_v37  ;;  %v107_v53 = vsel %vm38_vm1, %v86_v40, 0.0  ;;  %v60_v54 = vsel %vm38_vm1, %v32_v44, 0.0  ;;  %v89_v58 = vmul.f32 %v30_v32, %v30_v32 }
   0xb   :  { %v49_v26 = vadd.f32 %v48_v19, %v47_v21  ;;  %v109_v59 = vsel %vm38_vm1, %v87_v46, 0.0  ;;  %v62_v60 = vsel %vm38_vm1, %v33_v50, 0.0  ;;  %v90_v0 = vmul.f32 %v31_v38, %v31_v38 }
   0xc   :  { %v104_v49 = vadd.f32 %v103_v41, %v102_v43  ;;  %v111_v1 = vsel %vm38_vm1, %v88_v52, 0.0  ;;  %v64_v2 = vsel %vm38_vm1, %v34_v56, 0.0  ;;  %v91_v6 = vmul.f32 %v32_v44, %v32_v44  ;;  %v79_v44 = vld [vmem:[#allocation3] sm:$0x1] }
   0xd   :  { %v51_v33 = vadd.f32 %v50_v23, %v49_v26  ;;  %v113_v7 = vsel %vm38_vm1, %v89_v58, 0.0  ;;  %v66_v8 = vsel %vm38_vm1, %v35_v62, 0.0  ;;  %v92_v11 = vmul.f32 %v33_v50, %v33_v50  ;;  %v150_v58 = vld [vmem:[%s282_s2] sm:$0x1] }
   0xe   :  { %v106_v55 = vadd.f32 %v105_v47, %v104_v49  ;;  %v115_v12 = vsel %vm38_vm1, %v90_v0, 0.0  ;;  %v68_v13 = vsel %vm38_vm1, %v36_v4, 0.0  ;;  %v93_v16 = vmul.f32 %v34_v56, %v34_v56 }
   0xf   :  { %v53_v39 = vadd.f32 %v52_v30, %v51_v33  ;;  %v117_v17 = vsel %vm38_vm1, %v91_v6, 0.0  ;;  %v94_v20 = vmul.f32 %v35_v62, %v35_v62  ;;  %v119_v21 = vsel %vm38_vm1, %v92_v11, 0.0 }
  0x10   :  { %v108_v61 = vadd.f32 %v107_v53, %v106_v55  ;;  %v95_v24 = vmul.f32 %v36_v4, %v36_v4  ;;  %v121_v25 = vsel %vm38_vm1, %v93_v16, 0.0  ;;  %v145_v55 = vld [vmem:[%s281_s1] sm:$0x1] }
  0x11   :  { %v55_v45 = vadd.f32 %v54_v36, %v53_v39  ;;  %v123_v28 = vsel %vm38_vm1, %v94_v20, 0.0  ;;  %v37_v36 = vld [vmem:[#allocation2] sm:$0x1] }
  0x12   :  { %v110_v3 = vadd.f32 %v109_v59, %v108_v61  ;;  %v125_v31 = vsel %vm38_vm1, %v95_v24, 0.0 }
  0x13   :  { %v57_v51 = vadd.f32 %v56_v42, %v55_v45 }
  0x14   :  { %v112_v9 = vadd.f32 %v111_v1, %v110_v3 }
  0x15   :  { %v59_v57 = vadd.f32 %v58_v48, %v57_v51 }
  0x16   :  { %v114_v14 = vadd.f32 %v113_v7, %v112_v9 }
  0x17   :  { %v61_v63 = vadd.f32 %v60_v54, %v59_v57 }
  0x18   :  { %v116_v18 = vadd.f32 %v115_v12, %v114_v14 }
  0x19   :  { %v63_v5 = vadd.f32 %v62_v60, %v61_v63 }
  0x1a   :  { %v118_v22 = vadd.f32 %v117_v17, %v116_v18 }
  0x1b   :  { %v65_v10 = vadd.f32 %v64_v2, %v63_v5 }
  0x1c   :  { %v120_v26 = vadd.f32 %v119_v21, %v118_v22 }
  0x1d   :  { %v67_v15 = vadd.f32 %v66_v8, %v65_v10 }
  0x1e   :  { %v122_v29 = vadd.f32 %v121_v25, %v120_v26 }
  0x1f   :  { %v69_v19 = vadd.f32 %v68_v13, %v67_v15 }
  0x20   :  { %v124_v32 = vadd.f32 %v123_v28, %v122_v29 }
  0x21   :  { %v70_v23 = vrot.slane %v69_v19, 4 }
  0x22   :  { %v126_v34 = vadd.f32 %v125_v31, %v124_v32 }
  0x23   :  { %v71_v27 = vadd.f32 %v70_v23, %v69_v19 }
  0x24   :  { %v127_v37 = vrot.slane %v126_v34, 4 }
  0x25   :  { %v72_v30 = vrot.slane %v71_v27, 2 }
  0x26   :  { %v128_v39 = vadd.f32 %v127_v37, %v126_v34 }
  0x27   :  { %v73_v33 = vadd.f32 %v72_v30, %v71_v27 }
  0x28   :  { %v129_v41 = vrot.slane %v128_v39, 2 }
  0x29   :  { %v74_v35 = vrot.slane %v73_v33, 1 }
  0x2a   :  { %v130_v42 = vadd.f32 %v129_v41, %v128_v39 }
  0x2b   :  { %v75_v38 = vadd.f32 %v74_v35, %v73_v33 }
  0x2c   :  { %v131_v43 = vrot.slane %v130_v42, 1 }
  0x2d   :  { %v76_v40 = vadd.f32 %v75_v38, %v37_v36 }
  0x2e   :  { %v132_v45 = vadd.f32 %v131_v43, %v130_v42 }
  0x2f   :  { %78 = vst.msk [vmem:[#allocation2] sm:$0x1] %vm18_vm0, %v76_v40 }
  0x30   :  { %v133_v46 = vadd.f32 %v132_v45, %v79_v44 }
  0x32   :  { %134 = vst.msk [vmem:[#allocation3] sm:$0x1] %vm18_vm0, %v133_v46 }
  0x36   :  { %v138_v47 = vld [vmem:[#allocation2] sm:$0x1] }
  0x37   :  { %v139_v48 = vmul.f32 0.0078125, %v138_v47 }
  0x39   :  { %v142_v49 = vmul.f32 %v139_v48, %v139_v48  ;;  %v140_v50 = vld [vmem:[#allocation3] sm:$0x1] }
  0x3a   :  { %v141_v51 = vmul.f32 0.0078125, %v140_v50 }
  0x3c   :  { %v143_v52 = vsub.f32 %v141_v51, %v142_v49 }
  0x3e   :  { %v144_v53 = vmax.f32 %v143_v52, 0.0 }
  0x40   :  { %v146_v54 = vadd.f32 1e-05, %v144_v53 }
  0x42   :  { %159 = vrsqrt.f32 %v146_v54 }
  0x4c   :  { %v160_v56 = vpop.eup %159 }
  0x4d   :  { %v148_v57 = vmul.f32 %v160_v56, %v145_v55 }
  0x4f   :  { %149 = vst.msk [vmem:[%s283_s3] sm:$0x1] %vm18_vm0, %v148_v57  ;;  %v151_v59 = vmul.f32 %v148_v57, %v139_v48 }
  0x51   :  { %v152_v60 = vsub.f32 %v150_v58, %v151_v59 }
  0x53   :  { %153 = vst.msk [vmem:[%s283_s3 + $0x1] sm:$0x1] %vm18_vm0, %v152_v60 }

// kernel: generator_forward.13
= control target key start
LH: loop header
LB: loop body
LE: loop exit
PB: predicated region body
PF: predicated region fallthrough
CT: control target
= control target key end

     0   :  { %vm18_vm0 = vcmask 253952   ;;  %vm86_vm1 = vcmask 261120   ;;  %v449_v0 = vmov 0.0   ;;  %s1342_s0 = inlined_call_operand.vmem [shape: f32[512,32], index: 0, kind: input, shape index: {}]   ;;  %s1343_s1 = inlined_call_operand.vmem [shape: f32[1,32], index: 1, kind: input, shape index: {}]   ;;  %s1344_s2 = inlined_call_operand.vmem [shape: f32[1,32], index: 2, kind: input, shape index: {}]   ;;  %s1345_s3 = inlined_call_operand.vmem [shape: f32[2,32], index: 3, kind: output, shape index: {}]  }
   0x1   :  { %19 = vst.msk [vmem:[#allocation2] sm:$0x1] %vm18_vm0, %v449_v0  ;;  %20 = vst.msk [vmem:[#allocation3] sm:$0x1] %vm18_vm0, %v449_v0  ;;  %v475_v1 = vld [vmem:[%s1342_s0] sm:$0xff]  ;;  %v480_v2 = vld [vmem:[%s1342_s0 + $0x8] sm:$0xff] }
   0x2   :  { %v485_v3 = vld [vmem:[%s1342_s0 + $0x10] sm:$0xff]  ;;  %v490_v4 = vld [vmem:[%s1342_s0 + $0x18] sm:$0xff]  ;;  %v87_v5 = vsel %vm86_vm1, %v475_v1, 0.0  ;;  %v88_v6 = vsel %vm86_vm1, %v480_v2, 0.0  ;;  %v501_v8 = vld [vmem:[%s1342_s0 + $0x20] sm:$0xff] }
   0x3   :  { %v90_v7 = vsel %vm86_vm1, %v485_v3, 0.0  ;;  %v89_v9 = vadd.f32 %v88_v6, %v87_v5  ;;  %v92_v10 = vsel %vm86_vm1, %v490_v4, 0.0  ;;  %v508_v11 = vld [vmem:[%s1342_s0 + $0x28] sm:$0xff]  ;;  %v94_v13 = vsel %vm86_vm1, %v501_v8, 0.0  ;;  %v515_v14 = vld [vmem:[%s1342_s0 + $0x30] sm:$0xff]  ;;  %v520_v16 = vld [vmem:[%s1342_s0 + $0x38] sm:$0xff] }
   0x4   :  { %v525_v17 = vld [vmem:[%s1342_s0 + $0x40] sm:$0xff]  ;;  %v96_v18 = vsel %vm86_vm1, %v508_v11, 0.0  ;;  %v532_v19 = vld [vmem:[%s1342_s0 + $0x48] sm:$0xff]  ;;  %v537_v20 = vld [vmem:[%s1342_s0 + $0x50] sm:$0xff]  ;;  %v98_v23 = vsel %vm86_vm1, %v515_v14, 0.0  ;;  %v100_v25 = vsel %vm86_vm1, %v520_v16, 0.0 }
   0x5   :  { %v91_v12 = vadd.f32 %v90_v7, %v89_v9  ;;  %v542_v21 = vld [vmem:[%s1342_s0 + $0x58] sm:$0xff]  ;;  %v102_v26 = vsel %vm86_vm1, %v525_v17, 0.0  ;;  %v553_v27 = vld [vmem:[%s1342_s0 + $0x108] sm:$0xff]  ;;  %v558_v28 = vld [vmem:[%s1342_s0 + $0x110] sm:$0xff]  ;;  %v104_v30 = vsel %vm86_vm1, %v532_v19, 0.0  ;;  %v106_v31 = vsel %vm86_vm1, %v537_v20, 0.0 }
   0x6   :  { %v563_v29 = vld [vmem:[%s1342_s0 + $0x118] sm:$0xff]  ;;  %v571_v32 = vsel %vm86_vm1, %v542_v21, 0.0  ;;  %v576_v33 = vld [vmem:[%s1342_s0 + $0x120] sm:$0xff]  ;;  %v581_v34 = vld [vmem:[%s1342_s0 + $0x128] sm:$0xff]  ;;  %v590_v37 = vsel %vm86_vm1, %v553_v27, 0.0  ;;  %v594_v38 = vsel %vm86_vm1, %v558_v28, 0.0 }
   0x7   :  { %v93_v15 = vadd.f32 %v92_v10, %v91_v12  ;;  %v586_v35 = vld [vmem:[%s1342_s0 + $0x130] sm:$0xff]  ;;  %1368 = vst [vmem:[#allocation4_spill] sm:$0xff] %v590_v37  ;;  %1369 = vst [vmem:[#allocation5_spill] sm:$0xff] %v594_v38  ;;  %v598_v39 = vsel %vm86_vm1, %v563_v29, 0.0  ;;  %v603_v40 = vld [vmem:[%s1342_s0 + $0x138] sm:$0xff]  ;;  %v617_v43 = vsel %vm86_vm1, %v576_v33, 0.0 }
   0x8   :  { %1370 = vst [vmem:[#allocation6_spill] sm:$0xff] %v598_v39  ;;  %v608_v41 = vld [vmem:[%s1342_s0 + $0x140] sm:$0xff]  ;;  %v613_v42 = vld [vmem:[%s1342_s0 + $0x148] sm:$0xff]  ;;  %1371 = vst [vmem:[#allocation7_spill] sm:$0xff] %v617_v43  ;;  %v621_v44 = vsel %vm86_vm1, %v581_v34, 0.0  ;;  %v625_v45 = vsel %vm86_vm1, %v586_v35, 0.0 }
   0x9   :  { %v95_v22 = vadd.f32 %v94_v13, %v93_v15  ;;  %1372 = vst [vmem:[#allocation8_spill] sm:$0xff] %v621_v44  ;;  %1373 = vst [vmem:[#allocation9_spill] sm:$0xff] %v625_v45  ;;  %v630_v46 = vld [vmem:[%s1342_s0 + $0x150] sm:$0xff]  ;;  %v635_v47 = vld [vmem:[%s1342_s0 + $0x158] sm:$0xff]  ;;  %v644_v50 = vsel %vm86_vm1, %v603_v40, 0.0  ;;  %v648_v51 = vsel %vm86_vm1, %v608_v41, 0.0 }
   0xa   :  { %v640_v48 = vld [vmem:[%s1342_s0 + $0x160] sm:$0xff]  ;;  %1374 = vst [vmem:[#allocation10_spill] sm:$0xff] %v644_v50  ;;  %1375 = vst [vmem:[#allocation11_spill] sm:$0xff] %v648_v51  ;;  %v652_v52 = vsel %vm86_vm1, %v613_v42, 0.0  ;;  %v657_v53 = vld [vmem:[%s1342_s0 + $0x168] sm:$0xff]  ;;  %v671_v56 = vsel %vm86_vm1, %v630_v46, 0.0 }
   0xb   :  { %v97_v24 = vadd.f32 %v96_v18, %v95_v22  ;;  %1376 = vst [vmem:[#allocation12_spill] sm:$0xff] %v652_v52  ;;  %v662_v54 = vld [vmem:[%s1342_s0 + $0x170] sm:$0xff]  ;;  %v667_v55 = vld [vmem:[%s1342_s0 + $0x178] sm:$0xff]  ;;  %1377 = vst [vmem:[#allocation13_spill] sm:$0xff] %v671_v56  ;;  %v675_v57 = vsel %vm86_vm1, %v635_v47, 0.0  ;;  %v679_v58 = vsel %vm86_vm1, %v640_v48, 0.0 }
   0xc   :  { %1378 = vst [vmem:[#allocation14_spill] sm:$0xff] %v675_v57  ;;  %1379 = vst [vmem:[#allocation15_spill] sm:$0xff] %v679_v58  ;;  %v684_v59 = vld [vmem:[%s1342_s0 + $0x60] sm:$0xff]  ;;  %v694_v61 = vld [vmem:[%s1342_s0 + $0x188] sm:$0xff]  ;;  %v703_v0 = vsel %vm86_vm1, %v657_v53, 0.0  ;;  %v707_v5 = vsel %vm86_vm1, %v662_v54, 0.0 }
   0xd   :  { %v99_v36 = vadd.f32 %v98_v23, %v97_v24  ;;  %v689_v60 = vld [vmem:[%s1342_s0 + $0x180] sm:$0xff]  ;;  %v699_v62 = vld [vmem:[%s1342_s0 + $0x190] sm:$0xff]  ;;  %1380 = vst [vmem:[#allocation16_spill] sm:$0xff] %v703_v0  ;;  %1381 = vst [vmem:[#allocation17_spill] sm:$0xff] %v707_v5  ;;  %v711_v6 = vsel %vm86_vm1, %v667_v55, 0.0  ;;  %v734_v13 = vsel %vm86_vm1, %v694_v61, 0.0 }
   0xe   :  { %1382 = vst [vmem:[#allocation18_spill] sm:$0xff] %v711_v6  ;;  %v716_v7 = vld [vmem:[%s1342_s0 + $0x198] sm:$0xff]  ;;  %v721_v9 = vld [vmem:[%s1342_s0 + $0x1a0] sm:$0xff]  ;;  %v726_v10 = vld [vmem:[%s1342_s0 + $0x1a8] sm:$0xff]  ;;  %v730_v12 = vsel %vm86_vm1, %v689_v60, 0.0  ;;  %v738_v15 = vsel %vm86_vm1, %v699_v62, 0.0 }
   0xf   :  { %v101_v49 = vadd.f32 %v100_v25, %v99_v36  ;;  %1383 = vst [vmem:[#allocation19_spill] sm:$0xff] %v730_v12  ;;  %1384 = vst [vmem:[#allocation20_spill] sm:$0xff] %v734_v13  ;;  %v743_v18 = vld [vmem:[%s1342_s0 + $0x68] sm:$0xff]  ;;  %v748_v22 = vld [vmem:[%s1342_s0 + $0x1b0] sm:$0xff]  ;;  %v766_v36 = vsel %vm86_vm1, %v721_v9, 0.0 }
  0x10   :  { %1385 = vst [vmem:[#allocation21_spill] sm:$0xff] %v738_v15  ;;  %v753_v23 = vld [vmem:[%s1342_s0 + $0x1b8] sm:$0xff]  ;;  %v758_v24 = vld [vmem:[%s1342_s0 + $0x1c0] sm:$0xff]  ;;  %1387 = vst [vmem:[#allocation23_spill] sm:$0xff] %v766_v36  ;;  %v789_v36 = vsel %vm86_vm1, %v748_v22, 0.0 }
  0x11   :  { %v103_v63 = vadd.f32 %v102_v26, %v101_v49  ;;  %v762_v26 = vsel %vm86_vm1, %v716_v7, 0.0  ;;  %v770_v49 = vsel %vm86_vm1, %v726_v10, 0.0  ;;  %v775_v15 = vld [vmem:[%s1342_s0 + $0x1c8] sm:$0xff]  ;;  %1391 = vst [vmem:[#allocation27_spill] sm:$0xff] %v789_v36  ;;  %v802_v13 = vld [vmem:[%s1342_s0 + $0x1e0] sm:$0xff]  ;;  %v812_v36 = vld [vmem:[%s1342_s0 + $0x1f0] sm:$0xff] }
  0x12   :  { %1386 = vst [vmem:[#allocation22_spill] sm:$0xff] %v762_v26  ;;  %1388 = vst [vmem:[#allocation24_spill] sm:$0xff] %v770_v49  ;;  %v793_v49 = vsel %vm86_vm1, %v753_v23, 0.0  ;;  %v797_v26 = vsel %vm86_vm1, %v758_v24, 0.0  ;;  %v807_v12 = vld [vmem:[%s1342_s0 + $0x1e8] sm:$0xff]  ;;  %v816_v6 = vsel %vm86_vm1, %v775_v15, 0.0 }
  0x13   :  { %v105_v25 = vadd.f32 %v104_v30, %v103_v63  ;;  %v780_v30 = vld [vmem:[%s1342_s0 + $0x1d0] sm:$0xff]  ;;  %v785_v63 = vld [vmem:[%s1342_s0 + $0x1d8] sm:$0xff]  ;;  %1392 = vst [vmem:[#allocation28_spill] sm:$0xff] %v793_v49  ;;  %1393 = vst [vmem:[#allocation29_spill] sm:$0xff] %v797_v26 }
  0x14   :  { %1389 = vst [vmem:[#allocation25_spill] sm:$0xff] %v780_v30  ;;  %1390 = vst [vmem:[#allocation26_spill] sm:$0xff] %v785_v63  ;;  %v820_v26 = vsel %vm86_vm1, %v780_v30, 0.0  ;;  %v824_v5 = vsel %vm86_vm1, %v785_v63, 0.0  ;;  %v829_v0 = vld [vmem:[%s1342_s0 + $0x1f8] sm:$0xff]  ;;  %v883_v56 = vld [vmem:[%s1342_s0 + $0xa0] sm:$0xff] }
  0x15   :  { %1394 = vst [vmem:[#allocation30_spill] sm:$0xff] %v802_v13  ;;  %1395 = vst [vmem:[#allocation31_spill] sm:$0xff] %v807_v12  ;;  %v107_v49 = vadd.f32 %v106_v31, %v105_v25  ;;  %v110_v31 = vsel %vm86_vm1, %v684_v59, 0.0  ;;  %v835_v25 = vsel %vm86_vm1, %v802_v13, 0.0  ;;  %v851_v57 = vsel %vm86_vm1, %v829_v0, 0.0  ;;  %v888_v51 = vld [vmem:[%s1342_s0 + $0xa8] sm:$0xff] }
  0x16   :  { %1396 = vst [vmem:[#allocation32_spill] sm:$0xff] %v812_v36  ;;  %1397 = vst [vmem:[#allocation33_spill] sm:$0xff] %v816_v6  ;;  %v839_v6 = vsel %vm86_vm1, %v807_v12, 0.0  ;;  %v893_v50 = vld [vmem:[%s1342_s0 + $0xb0] sm:$0xff]  ;;  %v898_v45 = vld [vmem:[%s1342_s0 + $0xb8] sm:$0xff] }
  0x17   :  { %1398 = vst [vmem:[#allocation34_spill] sm:$0xff] %v820_v26  ;;  %1399 = vst [vmem:[#allocation35_spill] sm:$0xff] %v824_v5  ;;  %v843_v26 = vsel %vm86_vm1, %v812_v36, 0.0  ;;  %v35_v5 = vld [vmem:[%s1342_s0 + $0x70] sm:$0xff]  ;;  %v109_v58 = vadd.f32 %v571_v32, %v107_v49  ;;  %v112_v32 = vsel %vm86_vm1, %v743_v18, 0.0  ;;  %v908_v43 = vld [vmem:[%s1342_s0 + $0xc0] sm:$0xff] }
  0x18   :  { %1400 = vst [vmem:[#allocation36_spill] sm:$0xff] %v829_v0  ;;  %1401 = vst [vmem:[#allocation37_spill] sm:$0xff] %v835_v25  ;;  %v856_v25 = vld [vmem:[%s1342_s0 + $0x78] sm:$0xff]  ;;  %v873_v49 = vld [vmem:[%s1342_s0 + $0x90] sm:$0xff]  ;;  %v114_v44 = vsel %vm86_vm1, %v35_v5, 0.0  ;;  %v226_v0 = vmul.f32 %v485_v3, %v485_v3  ;;  %v126_v3 = vsel %vm86_vm1, %v883_v56, 0.0 }
  0x19   :  { %1402 = vst [vmem:[#allocation38_spill] sm:$0xff] %v839_v6  ;;  %1403 = vst [vmem:[#allocation39_spill] sm:$0xff] %v843_v26  ;;  %v861_v6 = vld [vmem:[%s1342_s0 + $0x80] sm:$0xff]  ;;  %v866_v26 = vld [vmem:[%s1342_s0 + $0x88] sm:$0xff]  ;;  %v111_v52 = vadd.f32 %v110_v31, %v109_v58  ;;  %v224_v58 = vmul.f32 %v475_v1, %v475_v1  ;;  %v225_v31 = vmul.f32 %v480_v2, %v480_v2  ;;  %v116_v1 = vsel %vm86_vm1, %v856_v25, 0.0 }
  0x1a   :  { %1404 = vst [vmem:[#allocation40_spill] sm:$0xff] %v851_v57  ;;  %1405 = vst [vmem:[#allocation41_spill] sm:$0xff] %v856_v25  ;;  %v878_v57 = vld [vmem:[%s1342_s0 + $0x98] sm:$0xff]  ;;  %v913_v39 = vld [vmem:[%s1342_s0 + $0xc8] sm:$0xff]  ;;  %v118_v2 = vsel %vm86_vm1, %v861_v6, 0.0  ;;  %v962_v63 = vsel %vm86_vm1, %v898_v45, 0.0 }
  0x1b   :  { %1406 = vst [vmem:[#allocation42_spill] sm:$0xff] %v861_v6  ;;  %1407 = vst [vmem:[#allocation43_spill] sm:$0xff] %v866_v26  ;;  %v918_v38 = vld [vmem:[%s1342_s0 + $0xd0] sm:$0xff]  ;;  %v113_v37 = vadd.f32 %v112_v32, %v111_v52  ;;  %v929_v36 = vld [vmem:[%s1342_s0 + $0xd8] sm:$0xff]  ;;  %v120_v52 = vsel %vm86_vm1, %v866_v26, 0.0  ;;  %v122_v32 = vsel %vm86_vm1, %v873_v49, 0.0 }
  0x1c   :  { %1408 = vst [vmem:[#allocation44_spill] sm:$0xff] %v873_v49  ;;  %1409 = vst [vmem:[#allocation45_spill] sm:$0xff] %v878_v57  ;;  %v934_v12 = vld [vmem:[%s1342_s0 + $0xe0] sm:$0xff]  ;;  %v124_v6 = vsel %vm86_vm1, %v878_v57, 0.0  ;;  %v947_v25 = vld [vmem:[%s1342_s0 + $0xe8] sm:$0xff]  ;;  %v128_v49 = vsel %vm86_vm1, %v888_v51, 0.0 }
  0x1d   :  { %1410 = vst [vmem:[#allocation46_spill] sm:$0xff] %v883_v56  ;;  %1411 = vst [vmem:[#allocation47_spill] sm:$0xff] %v888_v51  ;;  %v952_v13 = vld [vmem:[%s1342_s0 + $0xf0] sm:$0xff]  ;;  %v115_v26 = vadd.f32 %v114_v44, %v113_v37  ;;  %v130_v57 = vsel %vm86_vm1, %v893_v50, 0.0  ;;  %v227_v56 = vmul.f32 %v490_v4, %v490_v4  ;;  %v966_v30 = vsel %vm86_vm1, %v908_v43, 0.0 }
  0x1e   :  { %1412 = vst [vmem:[#allocation48_spill] sm:$0xff] %v893_v50  ;;  %1413 = vst [vmem:[#allocation49_spill] sm:$0xff] %v898_v45  ;;  %v970_v37 = vsel %vm86_vm1, %v913_v39, 0.0  ;;  %v974_v44 = vsel %vm86_vm1, %v918_v38, 0.0  ;;  %v978_v4 = vsel %vm86_vm1, %v929_v36, 0.0  ;;  %v982_v45 = vsel %vm86_vm1, %v934_v12, 0.0 }
  0x1f   :  { %1414 = vst [vmem:[#allocation50_spill] sm:$0xff] %v908_v43  ;;  %1415 = vst [vmem:[#allocation51_spill] sm:$0xff] %v913_v39  ;;  %v117_v50 = vadd.f32 %v116_v1, %v115_v26  ;;  %v228_v43 = vmul.f32 %v501_v8, %v501_v8  ;;  %v988_v39 = vsel %vm86_vm1, %v947_v25, 0.0  ;;  %v229_v26 = vmul.f32 %v508_v11, %v508_v11 }
  0x20   :  { %1416 = vst [vmem:[#allocation52_spill] sm:$0xff] %v918_v38  ;;  %1417 = vst [vmem:[#allocation53_spill] sm:$0xff] %v929_v36  ;;  %v992_v38 = vsel %vm86_vm1, %v952_v13, 0.0  ;;  %v230_v1 = vmul.f32 %v515_v14, %v515_v14  ;;  %v232_v8 = vmul.f32 %v525_v17, %v525_v17  ;;  %v235_v51 = vmul.f32 %v542_v21, %v542_v21 }
  0x21   :  { %1418 = vst [vmem:[#allocation54_spill] sm:$0xff] %v934_v12  ;;  %1419 = vst [vmem:[#allocation55_spill] sm:$0xff] %v947_v25  ;;  %v119_v36 = vadd.f32 %v118_v2, %v117_v50  ;;  %v231_v12 = vmul.f32 %v520_v16, %v520_v16  ;;  %v233_v25 = vmul.f32 %v532_v19, %v532_v19 }
  0x22   :  { %1420 = vst [vmem:[#allocation56_spill] sm:$0xff] %v952_v13  ;;  %v234_v13 = vmul.f32 %v537_v20, %v537_v20  ;;  %v236_v11 = vmul.f32 %v684_v59, %v684_v59  ;;  %v1012_v14 = vmul.f32 %v743_v18, %v743_v18  ;;  %v1014_v50 = vmul.f32 %v35_v5, %v35_v5 }
  0x23   :  { %v121_v16 = vadd.f32 %v120_v52, %v119_v36  ;;  %v257_v17 = vmul.f32 %v553_v27, %v553_v27  ;;  %v258_v19 = vmul.f32 %v558_v28, %v558_v28  ;;  %v259_v20 = vmul.f32 %v563_v29, %v563_v29 }
  0x24   :  { %v260_v21 = vmul.f32 %v576_v33, %v576_v33  ;;  %v261_v59 = vmul.f32 %v581_v34, %v581_v34  ;;  %v262_v18 = vmul.f32 %v586_v35, %v586_v35  ;;  %v263_v36 = vmul.f32 %v603_v40, %v603_v40 }
  0x25   :  { %v123_v5 = vadd.f32 %v122_v32, %v121_v16  ;;  %v264_v27 = vmul.f32 %v608_v41, %v608_v41  ;;  %v265_v28 = vmul.f32 %v613_v42, %v613_v42  ;;  %v266_v29 = vmul.f32 %v630_v46, %v630_v46 }
  0x26   :  { %v267_v33 = vmul.f32 %v635_v47, %v635_v47  ;;  %v288_v34 = vsel %vm86_vm1, %v224_v58, 0.0  ;;  %v289_v35 = vsel %vm86_vm1, %v225_v31, 0.0  ;;  %v268_v40 = vmul.f32 %v640_v48, %v640_v48 }
  0x27   :  { %v125_v2 = vadd.f32 %v124_v6, %v123_v5  ;;  %v290_v52 = vadd.f32 %v289_v35, %v288_v34  ;;  %v291_v41 = vsel %vm86_vm1, %v226_v0, 0.0  ;;  %v269_v42 = vmul.f32 %v657_v53, %v657_v53  ;;  %v1423_v35 = vld [vmem:[#allocation30_spill] sm:$0xff] }
  0x28   :  { %v270_v46 = vmul.f32 %v662_v54, %v662_v54  ;;  %v271_v47 = vmul.f32 %v667_v55, %v667_v55  ;;  %v293_v58 = vsel %vm86_vm1, %v227_v56, 0.0  ;;  %v272_v6 = vmul.f32 %v689_v60, %v689_v60 }
  0x29   :  { %v127_v32 = vadd.f32 %v126_v3, %v125_v2  ;;  %v273_v48 = vmul.f32 %v694_v61, %v694_v61  ;;  %v292_v31 = vadd.f32 %v291_v41, %v290_v52  ;;  %v274_v0 = vmul.f32 %v699_v62, %v699_v62 }
  0x2a   :  { %v275_v53 = vmul.f32 %v716_v7, %v716_v7  ;;  %v276_v54 = vmul.f32 %v721_v9, %v721_v9  ;;  %v295_v55 = vsel %vm86_vm1, %v228_v43, 0.0  ;;  %v277_v3 = vmul.f32 %v726_v10, %v726_v10  ;;  %v1422_v10 = vld [vmem:[#allocation26_spill] sm:$0xff] }
  0x2b   :  { %v129_v56 = vadd.f32 %v128_v49, %v127_v32  ;;  %v278_v60 = vmul.f32 %v748_v22, %v748_v22  ;;  %v294_v61 = vadd.f32 %v293_v58, %v292_v31  ;;  %v279_v16 = vmul.f32 %v753_v23, %v753_v23  ;;  %v1421_v49 = vld [vmem:[#allocation25_spill] sm:$0xff]  ;;  %v1424_v23 = vld [vmem:[#allocation31_spill] sm:$0xff] }
  0x2c   :  { %v280_v62 = vmul.f32 %v758_v24, %v758_v24  ;;  %v281_v7 = vmul.f32 %v775_v15, %v775_v15  ;;  %v297_v9 = vsel %vm86_vm1, %v229_v26, 0.0  ;;  %v282_v5 = vmul.f32 %v1421_v49, %v1421_v49  ;;  %v1425_v24 = vld [vmem:[#allocation32_spill] sm:$0xff] }
  0x2d   :  { %v131_v43 = vadd.f32 %v130_v57, %v129_v56  ;;  %v283_v34 = vmul.f32 %v1422_v10, %v1422_v10  ;;  %v296_v22 = vadd.f32 %v295_v55, %v294_v61  ;;  %v284_v2 = vmul.f32 %v1423_v35, %v1423_v35  ;;  %v1426_v26 = vld [vmem:[#allocation36_spill] sm:$0xff] }
  0x2e   :  { %v285_v52 = vmul.f32 %v1424_v23, %v1424_v23  ;;  %v286_v41 = vmul.f32 %v1425_v24, %v1425_v24  ;;  %v299_v15 = vsel %vm86_vm1, %v230_v1, 0.0  ;;  %v287_v58 = vmul.f32 %v1426_v26, %v1426_v26  ;;  %v1427_v24 = vld [vmem:[#allocation41_spill] sm:$0xff] }
  0x2f   :  { %v133_v57 = vadd.f32 %v962_v63, %v131_v43  ;;  %v298_v32 = vadd.f32 %v297_v9, %v296_v22  ;;  %v301_v31 = vsel %vm86_vm1, %v231_v12, 0.0  ;;  %v303_v55 = vsel %vm86_vm1, %v232_v8, 0.0 }
  0x30   :  { %v305_v56 = vsel %vm86_vm1, %v233_v25, 0.0  ;;  %v307_v61 = vsel %vm86_vm1, %v234_v13, 0.0  ;;  %v309_v49 = vsel %vm86_vm1, %v235_v51, 0.0  ;;  %v311_v1 = vsel %vm86_vm1, %v236_v11, 0.0 }
  0x31   :  { %v135_v10 = vadd.f32 %v966_v30, %v133_v57  ;;  %v300_v35 = vadd.f32 %v299_v15, %v298_v32  ;;  %v1094_v63 = vsel %vm86_vm1, %v257_v17, 0.0  ;;  %v1097_v9 = vsel %vm86_vm1, %v258_v19, 0.0 }
  0x32   :  { %v1100_v12 = vsel %vm86_vm1, %v259_v20, 0.0  ;;  %v1103_v25 = vsel %vm86_vm1, %v260_v21, 0.0  ;;  %v1106_v13 = vsel %vm86_vm1, %v261_v59, 0.0  ;;  %v1110_v8 = vsel %vm86_vm1, %v262_v18, 0.0 }
  0x33   :  { %v137_v51 = vadd.f32 %v970_v37, %v135_v10  ;;  %v302_v30 = vadd.f32 %v301_v31, %v300_v35  ;;  %v1113_v11 = vsel %vm86_vm1, %v263_v36, 0.0  ;;  %v1116_v17 = vsel %vm86_vm1, %v264_v27, 0.0 }
  0x34   :  { %v1119_v19 = vsel %vm86_vm1, %v265_v28, 0.0  ;;  %v1122_v20 = vsel %vm86_vm1, %v266_v29, 0.0  ;;  %v1125_v21 = vsel %vm86_vm1, %v267_v33, 0.0  ;;  %v1129_v18 = vsel %vm86_vm1, %v268_v40, 0.0 }
  0x35   :  { %v139_v37 = vadd.f32 %v974_v44, %v137_v51  ;;  %v304_v59 = vadd.f32 %v303_v55, %v302_v30  ;;  %v1132_v36 = vsel %vm86_vm1, %v269_v42, 0.0  ;;  %v1135_v27 = vsel %vm86_vm1, %v270_v46, 0.0  ;;  %v1431_v51 = vld [vmem:[#allocation4_spill] sm:$0xff] }
  0x36   :  { %v1138_v28 = vsel %vm86_vm1, %v271_v47, 0.0  ;;  %v1141_v29 = vsel %vm86_vm1, %v272_v6, 0.0  ;;  %v1144_v33 = vsel %vm86_vm1, %v273_v48, 0.0  ;;  %v1148_v40 = vsel %vm86_vm1, %v274_v0, 0.0 }
  0x37   :  { %v141_v44 = vadd.f32 %v978_v4, %v139_v37  ;;  %v306_v43 = vadd.f32 %v305_v56, %v304_v59  ;;  %v1151_v42 = vsel %vm86_vm1, %v275_v53, 0.0  ;;  %v1154_v46 = vsel %vm86_vm1, %v276_v54, 0.0  ;;  %v1168_v4 = vld [vmem:[%s1342_s0 + $0xf8] sm:$0xff]  ;;  %v1432_v59 = vld [vmem:[#allocation45_spill] sm:$0xff] }
  0x38   :  { %v1157_v47 = vsel %vm86_vm1, %v277_v3, 0.0  ;;  %v1160_v6 = vsel %vm86_vm1, %v278_v60, 0.0  ;;  %v1163_v48 = vsel %vm86_vm1, %v279_v16, 0.0  ;;  %v1172_v54 = vsel %vm86_vm1, %v280_v62, 0.0  ;;  %v1429_v56 = vld [vmem:[#allocation43_spill] sm:$0xff] }
  0x39   :  { %v143_v0 = vadd.f32 %v982_v45, %v141_v44  ;;  %v308_v53 = vadd.f32 %v307_v61, %v306_v43  ;;  %v1175_v3 = vsel %vm86_vm1, %v281_v7, 0.0  ;;  %v1178_v60 = vsel %vm86_vm1, %v282_v5, 0.0  ;;  %v1192_v45 = vld [vmem:[%s1342_s0 + $0x100] sm:$0xff]  ;;  %v1433_v43 = vld [vmem:[#allocation5_spill] sm:$0xff] }
  0x3a   :  { %v1181_v16 = vsel %vm86_vm1, %v283_v34, 0.0  ;;  %v1184_v22 = vsel %vm86_vm1, %v284_v2, 0.0  ;;  %v1187_v23 = vsel %vm86_vm1, %v285_v52, 0.0  ;;  %v1196_v5 = vsel %vm86_vm1, %v286_v41, 0.0  ;;  %v1428_v41 = vld [vmem:[#allocation42_spill] sm:$0xff] }
  0x3b   :  { %v145_v62 = vadd.f32 %v988_v39, %v143_v0  ;;  %v310_v7 = vadd.f32 %v309_v49, %v308_v53  ;;  %v1199_v34 = vsel %vm86_vm1, %v287_v58, 0.0  ;;  %v148_v2 = vsel %vm86_vm1, %v1168_v4, 0.0 }
  0x3c   :  { %v239_v52 = vmul.f32 %v1427_v24, %v1427_v24  ;;  %v313_v15 = vsel %vm86_vm1, %v1012_v14, 0.0  ;;  %v150_v39 = vsel %vm86_vm1, %v1192_v45, 0.0  ;;  %v240_v32 = vmul.f32 %v1428_v41, %v1428_v41  ;;  %v1435_v24 = vld [vmem:[#allocation6_spill] sm:$0xff]  ;;  %v1437_v41 = vld [vmem:[#allocation7_spill] sm:$0xff] }
  0x3d   :  { %v147_v57 = vadd.f32 %v992_v38, %v145_v62  ;;  %v312_v26 = vadd.f32 %v311_v1, %v310_v7  ;;  %v315_v58 = vsel %vm86_vm1, %v1014_v50, 0.0  ;;  %v241_v61 = vmul.f32 %v1429_v56, %v1429_v56  ;;  %v1430_v38 = vld [vmem:[#allocation44_spill] sm:$0xff]  ;;  %v1434_v62 = vld [vmem:[#allocation46_spill] sm:$0xff] }
  0x3e   :  { %v317_v49 = vsel %vm86_vm1, %v239_v52, 0.0  ;;  %v242_v35 = vmul.f32 %v1430_v38, %v1430_v38  ;;  %v319_v1 = vsel %vm86_vm1, %v240_v32, 0.0  ;;  %v243_v50 = vmul.f32 %v1432_v59, %v1432_v59 }
  0x3f   :  { %v149_v31 = vadd.f32 %v148_v2, %v147_v57  ;;  %v314_v55 = vadd.f32 %v313_v15, %v312_v26  ;;  %v321_v44 = vsel %vm86_vm1, %v241_v61, 0.0  ;;  %v244_v7 = vmul.f32 %v1434_v62, %v1434_v62  ;;  %v1436_v57 = vld [vmem:[#allocation47_spill] sm:$0xff]  ;;  %v1439_v61 = vld [vmem:[#allocation8_spill] sm:$0xff] }
  0x40   :  { %v323_v2 = vsel %vm86_vm1, %v242_v35, 0.0  ;;  %v245_v26 = vmul.f32 %v1436_v57, %v1436_v57 }
  0x41   :  { %v151_v14 = vadd.f32 %v150_v39, %v149_v31  ;;  %v316_v10 = vadd.f32 %v315_v58, %v314_v55  ;;  %v325_v39 = vsel %vm86_vm1, %v243_v50, 0.0  ;;  %v1438_v31 = vld [vmem:[#allocation48_spill] sm:$0xff]  ;;  %v327_v56 = vsel %vm86_vm1, %v244_v7, 0.0 }
  0x42   :  { %v246_v55 = vmul.f32 %v1438_v31, %v1438_v31  ;;  %v329_v35 = vsel %vm86_vm1, %v245_v26, 0.0 }
  0x43   :  { %v153_v30 = vadd.f32 %v1431_v51, %v151_v14  ;;  %v318_v37 = vadd.f32 %v317_v49, %v316_v10  ;;  %v1440_v10 = vld [vmem:[#allocation49_spill] sm:$0xff] }
  0x44   :  { %v247_v38 = vmul.f32 %v1440_v10, %v1440_v10  ;;  %v331_v50 = vsel %vm86_vm1, %v246_v55, 0.0 }
  0x45   :  { %v155_v0 = vadd.f32 %v1433_v43, %v153_v30  ;;  %v320_v53 = vadd.f32 %v319_v1, %v318_v37  ;;  %v1441_v1 = vld [vmem:[#allocation9_spill] sm:$0xff]  ;;  %v1442_v37 = vld [vmem:[#allocation50_spill] sm:$0xff] }
  0x46   :  { %v248_v59 = vmul.f32 %v1442_v37, %v1442_v37  ;;  %v333_v7 = vsel %vm86_vm1, %v247_v38, 0.0 }
  0x47   :  { %v157_v52 = vadd.f32 %v1435_v24, %v155_v0  ;;  %v322_v15 = vadd.f32 %v321_v44, %v320_v53  ;;  %v1443_v44 = vld [vmem:[#allocation10_spill] sm:$0xff]  ;;  %v1444_v53 = vld [vmem:[#allocation51_spill] sm:$0xff] }
  0x48   :  { %v249_v62 = vmul.f32 %v1444_v53, %v1444_v53  ;;  %v335_v26 = vsel %vm86_vm1, %v248_v59, 0.0 }
  0x49   :  { %v159_v32 = vadd.f32 %v1437_v41, %v157_v52  ;;  %v324_v58 = vadd.f32 %v323_v2, %v322_v15  ;;  %v1445_v2 = vld [vmem:[#allocation11_spill] sm:$0xff]  ;;  %v1446_v15 = vld [vmem:[#allocation52_spill] sm:$0xff] }
  0x4a   :  { %v250_v57 = vmul.f32 %v1446_v15, %v1446_v15  ;;  %v337_v55 = vsel %vm86_vm1, %v249_v62, 0.0 }
  0x4b   :  { %v161_v49 = vadd.f32 %v1439_v61, %v159_v32  ;;  %v326_v14 = vadd.f32 %v325_v39, %v324_v58  ;;  %v1447_v39 = vld [vmem:[#allocation12_spill] sm:$0xff]  ;;  %v1448_v58 = vld [vmem:[#allocation53_spill] sm:$0xff] }
  0x4c   :  { %v251_v31 = vmul.f32 %v1448_v58, %v1448_v58  ;;  %v339_v38 = vsel %vm86_vm1, %v250_v57, 0.0  ;;  %v1456_v57 = vld [vmem:[#allocation17_spill] sm:$0xff]  ;;  %v1457_v58 = vld [vmem:[#allocation18_spill] sm:$0xff] }
  0x4d   :  { %v163_v51 = vadd.f32 %v1441_v1, %v161_v49  ;;  %v328_v30 = vadd.f32 %v327_v56, %v326_v14  ;;  %v1449_v56 = vld [vmem:[#allocation13_spill] sm:$0xff]  ;;  %v1450_v14 = vld [vmem:[#allocation54_spill] sm:$0xff] }
  0x4e   :  { %v252_v10 = vmul.f32 %v1450_v14, %v1450_v14  ;;  %v341_v59 = vsel %vm86_vm1, %v251_v31, 0.0 }
  0x4f   :  { %v165_v43 = vadd.f32 %v1443_v44, %v163_v51  ;;  %v330_v0 = vadd.f32 %v329_v35, %v328_v30  ;;  %v1451_v35 = vld [vmem:[#allocation14_spill] sm:$0xff]  ;;  %v1452_v30 = vld [vmem:[#allocation55_spill] sm:$0xff] }
  0x50   :  { %v253_v37 = vmul.f32 %v1452_v30, %v1452_v30  ;;  %v343_v62 = vsel %vm86_vm1, %v252_v10, 0.0  ;;  %v1459_v10 = vld [vmem:[#allocation20_spill] sm:$0xff] }
  0x51   :  { %v167_v24 = vadd.f32 %v1445_v2, %v165_v43  ;;  %v332_v52 = vadd.f32 %v331_v50, %v330_v0  ;;  %v1453_v50 = vld [vmem:[#allocation15_spill] sm:$0xff]  ;;  %v1454_v0 = vld [vmem:[#allocation56_spill] sm:$0xff] }
  0x52   :  { %v254_v53 = vmul.f32 %v1454_v0, %v1454_v0  ;;  %v345_v15 = vsel %vm86_vm1, %v253_v37, 0.0  ;;  %v1461_v37 = vld [vmem:[#allocation22_spill] sm:$0xff]  ;;  %v1463_v0 = vld [vmem:[#allocation24_spill] sm:$0xff] }
  0x53   :  { %v169_v41 = vadd.f32 %v1447_v39, %v167_v24  ;;  %v334_v32 = vadd.f32 %v333_v7, %v332_v52  ;;  %v1455_v7 = vld [vmem:[#allocation16_spill] sm:$0xff]  ;;  %v255_v52 = vmul.f32 %v1168_v4, %v1168_v4 }
  0x55   :  { %v171_v61 = vadd.f32 %v1449_v56, %v169_v41  ;;  %v336_v49 = vadd.f32 %v335_v26, %v334_v32  ;;  %v256_v41 = vmul.f32 %v1192_v45, %v1192_v45  ;;  %v347_v32 = vsel %vm86_vm1, %v254_v53, 0.0 }
  0x56   :  { %v349_v56 = vsel %vm86_vm1, %v255_v52, 0.0  ;;  %v1465_v52 = vld [vmem:[#allocation28_spill] sm:$0xff] }
  0x57   :  { %v173_v1 = vadd.f32 %v1451_v35, %v171_v61  ;;  %v338_v51 = vadd.f32 %v337_v55, %v336_v49  ;;  %v1458_v61 = vld [vmem:[#allocation19_spill] sm:$0xff]  ;;  %v351_v4 = vsel %vm86_vm1, %v256_v41, 0.0  ;;  %v1467_v41 = vld [vmem:[#allocation33_spill] sm:$0xff] }
  0x59   :  { %v175_v44 = vadd.f32 %v1453_v50, %v173_v1  ;;  %v340_v43 = vadd.f32 %v339_v38, %v338_v51  ;;  %v1460_v1 = vld [vmem:[#allocation21_spill] sm:$0xff]  ;;  %v1462_v50 = vld [vmem:[#allocation23_spill] sm:$0xff] }
  0x5b   :  { %v177_v2 = vadd.f32 %v1455_v7, %v175_v44  ;;  %v342_v24 = vadd.f32 %v341_v59, %v340_v43  ;;  %v1464_v7 = vld [vmem:[#allocation27_spill] sm:$0xff] }
  0x5d   :  { %v179_v26 = vadd.f32 %v1456_v57, %v177_v2  ;;  %v344_v39 = vadd.f32 %v343_v62, %v342_v24 }
  0x5f   :  { %v181_v31 = vadd.f32 %v1457_v58, %v179_v26  ;;  %v346_v55 = vadd.f32 %v345_v15, %v344_v39  ;;  %v1466_v26 = vld [vmem:[#allocation29_spill] sm:$0xff]  ;;  %v1468_v58 = vld [vmem:[#allocation34_spill] sm:$0xff] }
  0x61   :  { %v183_v49 = vadd.f32 %v1458_v61, %v181_v31  ;;  %v348_v14 = vadd.f32 %v347_v32, %v346_v55  ;;  %v1469_v55 = vld [vmem:[#allocation35_spill] sm:$0xff]  ;;  %v1470_v61 = vld [vmem:[#allocation37_spill] sm:$0xff] }
  0x63   :  { %v185_v38 = vadd.f32 %v1459_v10, %v183_v49  ;;  %v350_v35 = vadd.f32 %v349_v56, %v348_v14  ;;  %v1471_v14 = vld [vmem:[#allocation38_spill] sm:$0xff]  ;;  %v1472_v10 = vld [vmem:[#allocation39_spill] sm:$0xff] }
  0x65   :  { %v187_v51 = vadd.f32 %v1460_v1, %v185_v38  ;;  %v352_v30 = vadd.f32 %v351_v4, %v350_v35  ;;  %v1473_v35 = vld [vmem:[#allocation40_spill] sm:$0xff] }
  0x67   :  { %v189_v45 = vadd.f32 %v1461_v37, %v187_v51  ;;  %v354_v59 = vadd.f32 %v1094_v63, %v352_v30 }
  0x69   :  { %v191_v44 = vadd.f32 %v1462_v50, %v189_v45  ;;  %v356_v43 = vadd.f32 %v1097_v9, %v354_v59 }
  0x6b   :  { %v193_v53 = vadd.f32 %v1463_v0, %v191_v44  ;;  %v358_v62 = vadd.f32 %v1100_v12, %v356_v43 }
  0x6d   :  { %v195_v2 = vadd.f32 %v1464_v7, %v193_v53  ;;  %v360_v24 = vadd.f32 %v1103_v25, %v358_v62 }
  0x6f   :  { %v197_v15 = vadd.f32 %v1465_v52, %v195_v2  ;;  %v362_v57 = vadd.f32 %v1106_v13, %v360_v24 }
  0x71   :  { %v199_v39 = vadd.f32 %v1466_v26, %v197_v15  ;;  %v364_v63 = vadd.f32 %v1110_v8, %v362_v57 }
  0x73   :  { %v201_v32 = vadd.f32 %v1467_v41, %v199_v39  ;;  %v366_v9 = vadd.f32 %v1113_v11, %v364_v63 }
  0x75   :  { %v203_v31 = vadd.f32 %v1468_v58, %v201_v32  ;;  %v368_v12 = vadd.f32 %v1116_v17, %v366_v9  ;;  %v438_v9 = vld [vmem:[%s1344_s2] sm:$0x1] }
  0x77   :  { %v205_v56 = vadd.f32 %v1469_v55, %v203_v31  ;;  %v370_v25 = vadd.f32 %v1119_v19, %v368_v12 }
  0x79   :  { %v207_v49 = vadd.f32 %v1470_v61, %v205_v56  ;;  %v372_v13 = vadd.f32 %v1122_v20, %v370_v25 }
  0x7b   :  { %v209_v4 = vadd.f32 %v1471_v14, %v207_v49  ;;  %v374_v8 = vadd.f32 %v1125_v21, %v372_v13 }
  0x7d   :  { %v211_v38 = vadd.f32 %v1472_v10, %v209_v4  ;;  %v376_v11 = vadd.f32 %v1129_v18, %v374_v8  ;;  %v85_v18 = vld [vmem:[#allocation2] sm:$0x1] }
  0x7f   :  { %v213_v1 = vadd.f32 %v1473_v35, %v211_v38  ;;  %v378_v17 = vadd.f32 %v1132_v36, %v376_v11 }
  0x81   :  { %v214_v51 = vrot.slane %v213_v1, 4  ;;  %v380_v30 = vadd.f32 %v1135_v27, %v378_v17 }
  0x83   :  { %v215_v19 = vadd.f32 %v214_v51, %v213_v1  ;;  %v382_v37 = vadd.f32 %v1138_v28, %v380_v30 }
  0x85   :  { %v216_v45 = vrot.slane %v215_v19, 2  ;;  %v384_v20 = vadd.f32 %v1141_v29, %v382_v37 }
  0x87   :  { %v217_v59 = vadd.f32 %v216_v45, %v215_v19  ;;  %v386_v21 = vadd.f32 %v1144_v33, %v384_v20 }
  0x89   :  { %v218_v50 = vrot.slane %v217_v59, 1  ;;  %v388_v44 = vadd.f32 %v1148_v40, %v386_v21 }
  0x8b   :  { %v219_v43 = vadd.f32 %v218_v50, %v217_v59  ;;  %v390_v0 = vadd.f32 %v1151_v42, %v388_v44 }
  0x8d   :  { %v220_v36 = vadd.f32 %v219_v43, %v85_v18  ;;  %v392_v53 = vadd.f32 %v1154_v46, %v390_v0 }
  0x8f   :  { %222 = vst.msk [vmem:[#allocation2] sm:$0x1] %vm18_vm0, %v220_v36  ;;  %v394_v27 = vadd.f32 %v1157_v47, %v392_v53 }
  0x91   :  { %v396_v28 = vadd.f32 %v1160_v6, %v394_v27 }
  0x93   :  { %v398_v29 = vadd.f32 %v1163_v48, %v396_v28 }
  0x95   :  { %v400_v33 = vadd.f32 %v1172_v54, %v398_v29  ;;  %v223_v54 = vld [vmem:[#allocation3] sm:$0x1] }
  0x96   :  { %v426_v26 = vld [vmem:[#allocation2] sm:$0x1] }
  0x97   :  { %v402_v62 = vadd.f32 %v1175_v3, %v400_v33 }
  0x99   :  { %v404_v40 = vadd.f32 %v1178_v60, %v402_v62  ;;  %v427_v60 = vmul.f32 0.001953125, %v426_v26 }
  0x9b   :  { %v406_v7 = vadd.f32 %v1181_v16, %v404_v40  ;;  %v430_v16 = vmul.f32 %v427_v60, %v427_v60 }
  0x9d   :  { %v408_v42 = vadd.f32 %v1184_v22, %v406_v7 }
  0x9f   :  { %v410_v46 = vadd.f32 %v1187_v23, %v408_v42 }
  0xa1   :  { %v412_v2 = vadd.f32 %v1196_v5, %v410_v46 }
  0xa3   :  { %v414_v47 = vadd.f32 %v1199_v34, %v412_v2  ;;  %v433_v34 = vld [vmem:[%s1343_s1] sm:$0x1] }
  0xa5   :  { %v415_v24 = vrot.slane %v414_v47, 4 }
  0xa7   :  { %v416_v6 = vadd.f32 %v415_v24, %v414_v47 }
  0xa9   :  { %v417_v52 = vrot.slane %v416_v6, 2 }
  0xab   :  { %v418_v48 = vadd.f32 %v417_v52, %v416_v6 }
  0xad   :  { %v419_v15 = vrot.slane %v418_v48, 1 }
  0xaf   :  { %v420_v57 = vadd.f32 %v419_v15, %v418_v48 }
  0xb1   :  { %v421_v3 = vadd.f32 %v420_v57, %v223_v54 }
  0xb3   :  { %422 = vst.msk [vmem:[#allocation3] sm:$0x1] %vm18_vm0, %v421_v3 }
  0xba   :  { %v428_v22 = vld [vmem:[#allocation3] sm:$0x1] }
  0xbb   :  { %v429_v39 = vmul.f32 0.001953125, %v428_v22 }
  0xbd   :  { %v431_v23 = vsub.f32 %v429_v39, %v430_v16 }
  0xbf   :  { %v432_v63 = vmax.f32 %v431_v23, 0.0 }
  0xc1   :  { %v434_v5 = vadd.f32 1e-05, %v432_v63 }
  0xc3   :  { %447 = vrsqrt.f32 %v434_v5 }
  0xcd   :  { %v448_v41 = vpop.eup %447 }
  0xce   :  { %v436_v32 = vmul.f32 %v448_v41, %v433_v34 }
  0xd0   :  { %437 = vst.msk [vmem:[%s1345_s3] sm:$0x1] %vm18_vm0, %v436_v32  ;;  %v439_v58 = vmul.f32 %v436_v32, %v427_v60 }
  0xd2   :  { %v440_v31 = vsub.f32 %v438_v9, %v439_v58 }
  0xd4   :  { %441 = vst.msk [vmem:[%s1345_s3 + $0x1] sm:$0x1] %vm18_vm0, %v440_v31 }

// kernel: generator_forward.14
= control target key start
LH: loop header
LB: loop body
LE: loop exit
PB: predicated region body
PF: predicated region fallthrough
CT: control target
= control target key end

     0   :  { %s875_s12 = smov 0   ;;  %s877_s13 = smov 0   ;;  %s1111_s0 = inlined_call_operand.vmem [shape: f32[512,32], index: 0, kind: input, shape index: {}]   ;;  %s1112_s1 = inlined_call_operand.vmem [shape: f32[2,32], index: 1, kind: input, shape index: {}]   ;;  %s1113_s2 = inlined_call_operand.vmem [shape: bf16[32,48], index: 2, kind: input, shape index: {}]   ;;  %s1114_s3 = inlined_call_operand.vmem [shape: f32[512,48], index: 3, kind: output, shape index: {}]  }
   0x1   :  { %s879_s14 = smov 0  }
   0x2 LB: > { %s25_s15 = sadd.s32 1, %s849_s13  ;;  %p720_p0 = scmp.ge.s32.totalorder %s853_s14, 1  ;;  %s853_s14 = sphi %s879_s14, %s13_s14   ;;  %s849_s13 = sphi %s877_s13, %s1116_s13   ;;  %s845_s12 = sphi %s875_s12, %s1115_s12  }
   0x3   : > { %p27_p1 = scmp.ge.s32.totalorder %s25_s15, 2  ;;  %p161_p2 = scmp.lt.s32.totalorder %s853_s14, 3 }
   0x5   : > { %s1118_s15 = smov (%p27_p1, %s25_s15), 0  ;;  %p162_p3 = pnand %p720_p0, %p161_p2 }
   0x6   : > { %v829_v0 = vld [vmem:[%s1113_s2] sm:$0xff] (!%p162_p3)   ;;  %s721_s18 = sshll.u32 (!%p162_p3), %s845_s12, 5  ;;  %v830_v1 = vld [vmem:[%s1113_s2 + $0x8] sm:$0xff] (!%p162_p3)   ;;  %vm382_vm0 = vcmask (!%p162_p3), 261120   ;;  %vm592_vm1 = vcmask (!%p162_p3), 392192  }
   0x7   : > { %165 = sbr.rel (%p162_p3) target bundleno = 269 (0x10d), region = 32  ;;  %p193_p4 = scmp.lt.s32.totalorder (!%p162_p3), %s721_s18, 63  ;;  %765 = vmatprep.subr.bf16.mxu0 (!%p162_p3), %v829_v0  ;;  %801 = vmatprep.subr.bf16.mxu1 (!%p162_p3), %v829_v0  ;;  %v905_v2 = vld [vmem:[%s1112_s1] ss:$0 sm:$0xff] (!%p162_p3)  ;;  %v917_v3 = vld [vmem:[%s1112_s1 + $0x1] ss:$0 sm:$0xff] (!%p162_p3) }
   0x8   : > { %766 = vmatpush3.bf16.msra.mxu0 (!%p162_p3), %v829_v0  ;;  %803 = vmatpush3.bf16.msra.mxu1 (!%p162_p3), %v829_v0 }
   0x9   : > { %767 = vmatprep.subr.bf16.mxu0 (!%p162_p3), %v830_v1  ;;  %802 = vmatprep.subr.bf16.mxu1 (!%p162_p3), %v830_v1 }
   0xc   : > { %768 = vmatpush3.bf16.msra.mxu0 (!%p162_p3), %v830_v1  ;;  %804 = vmatpush3.bf16.msra.mxu1 (!%p162_p3), %v830_v1 }
   0xe   : > { %s1120_s18 = smov (!%p193_p4, %s721_s18), 63 }
   0xf   : > { %s722_s21 = sshll.u32 %s1120_s18, 3 }
  0x10   : > { %s912_s26 = scalar_lea.vmem %s1111_s0, %s722_s21  ;;  %s1036_s4 = scalar_lea.vmem %s1114_s3, %s722_s21 }
  0x11   : > { %v212_v4 = vld [vmem:[%s912_s26] sm:$0xff]  ;;  %v213_v5 = vld [vmem:[%s912_s26 + $0x8] sm:$0xff]  ;;  %v214_v11 = vld [vmem:[%s912_s26 + $0x10] sm:$0xff] }
  0x12   : > { %v228_v6 = vld [vmem:[%s912_s26 + $0x80] sm:$0xff]  ;;  %v249_v7 = vmul.f32 %v905_v2, %v212_v4  ;;  %v250_v8 = vmul.f32 %v905_v2, %v213_v5  ;;  %v229_v9 = vld [vmem:[%s912_s26 + $0x88] sm:$0xff]  ;;  %v215_v12 = vld [vmem:[%s912_s26 + $0x18] sm:$0xff]  ;;  %v251_v14 = vmul.f32 %v905_v2, %v214_v11 }
  0x13   : > { %v265_v10 = vmul.f32 %v905_v2, %v228_v6  ;;  %v266_v13 = vmul.f32 %v905_v2, %v229_v9  ;;  %v252_v15 = vmul.f32 %v905_v2, %v215_v12  ;;  %v230_v16 = vld [vmem:[%s912_s26 + $0x90] sm:$0xff]  ;;  %v231_v17 = vld [vmem:[%s912_s26 + $0x98] sm:$0xff]  ;;  %v216_v26 = vld [vmem:[%s912_s26 + $0x20] sm:$0xff] }
  0x14   : > { %v286_v18 = vadd.f32 %v917_v3, %v249_v7  ;;  %v287_v19 = vadd.f32 %v917_v3, %v250_v8  ;;  %v267_v21 = vmul.f32 %v905_v2, %v230_v16  ;;  %v288_v23 = vadd.f32 %v917_v3, %v251_v14  ;;  %v217_v27 = vld [vmem:[%s912_s26 + $0x28] sm:$0xff]  ;;  %v232_v32 = vld [vmem:[%s912_s26 + $0xa0] sm:$0xff]  ;;  %v218_v38 = vld [vmem:[%s912_s26 + $0x30] sm:$0xff] }
  0x15   : > { %v302_v20 = vadd.f32 %v917_v3, %v265_v10  ;;  %v303_v22 = vadd.f32 %v917_v3, %v266_v13  ;;  %v289_v24 = vadd.f32 %v917_v3, %v252_v15  ;;  %v268_v25 = vmul.f32 %v905_v2, %v231_v17  ;;  %v233_v37 = vld [vmem:[%s912_s26 + $0xa8] sm:$0xff]  ;;  %v219_v43 = vld [vmem:[%s912_s26 + $0x38] sm:$0xff]  ;;  %v234_v52 = vld [vmem:[%s912_s26 + $0xb0] sm:$0xff] }
  0x16   : > { %v318_v28 = vmax.f32 %v286_v18, 0.0  ;;  %v319_v29 = vmax.f32 %v287_v19, 0.0  ;;  %v304_v31 = vadd.f32 %v917_v3, %v267_v21  ;;  %v320_v34 = vmax.f32 %v288_v23, 0.0  ;;  %v235_v53 = vld [vmem:[%s912_s26 + $0xb8] sm:$0xff]  ;;  %v220_v57 = vld [vmem:[%s912_s26 + $0x40] sm:$0xff]  ;;  %v221_v62 = vld [vmem:[%s912_s26 + $0x48] sm:$0xff] }
  0x17   : > { %v334_v30 = vmax.f32 %v302_v20, 0.0  ;;  %v335_v33 = vmax.f32 %v303_v22, 0.0  ;;  %v321_v35 = vmax.f32 %v289_v24, 0.0  ;;  %v305_v36 = vadd.f32 %v917_v3, %v268_v25  ;;  %v236_v5 = vld [vmem:[%s912_s26 + $0xc0] sm:$0xff]  ;;  %v237_v6 = vld [vmem:[%s912_s26 + $0xc8] sm:$0xff]  ;;  %v222_v15 = vld [vmem:[%s912_s26 + $0x50] sm:$0xff] }
  0x18   : > { %v350_v39 = vpack.c.bf16 %v319_v29, %v318_v28  ;;  %v336_v40 = vmax.f32 %v304_v31, 0.0  ;;  %v253_v41 = vmul.f32 %v905_v2, %v216_v26  ;;  %v254_v42 = vmul.f32 %v905_v2, %v217_v27  ;;  %v223_v20 = vld [vmem:[%s912_s26 + $0x58] sm:$0xff]  ;;  %v238_v21 = vld [vmem:[%s912_s26 + $0xd0] sm:$0xff]  ;;  %v224_v31 = vld [vmem:[%s912_s26 + $0x60] sm:$0xff] }
  0x19   : > { %v358_v44 = vpack.c.bf16 %v335_v33, %v334_v30  ;;  %v351_v45 = vpack.c.bf16 %v321_v35, %v320_v34  ;;  %v337_v46 = vmax.f32 %v305_v36, 0.0  ;;  %v269_v47 = vmul.f32 %v905_v2, %v232_v32  ;;  %v239_v26 = vld [vmem:[%s912_s26 + $0xd8] sm:$0xff]  ;;  %v225_v36 = vld [vmem:[%s912_s26 + $0x68] sm:$0xff] }
  0x1a   : > { %769 = vmatprep.mubr.msk.bf16.mxu0 %vm382_vm0, %v350_v39  ;;  %v290_v48 = vadd.f32 %v917_v3, %v253_v41  ;;  %v291_v49 = vadd.f32 %v917_v3, %v254_v42  ;;  %v270_v50 = vmul.f32 %v905_v2, %v233_v37  ;;  %v255_v51 = vmul.f32 %v905_v2, %v218_v38  ;;  %v240_v41 = vld [vmem:[%s912_s26 + $0xe0] sm:$0xff] }
  0x1b   : > { %785 = vmatprep.mubr.msk.bf16.mxu1 %vm382_vm0, %v358_v44  ;;  %770 = vmatmul.mubr.msk.bf16.vlgmr.msra.gmra.mrb[0].mxu0 %vm382_vm0, %v351_v45  ;;  %v359_v54 = vpack.c.bf16 %v337_v46, %v336_v40  ;;  %v306_v55 = vadd.f32 %v917_v3, %v269_v47  ;;  %v256_v56 = vmul.f32 %v905_v2, %v219_v43  ;;  %v241_v46 = vld [vmem:[%s912_s26 + $0xe8] sm:$0xff]  ;;  %v226_v47 = vld [vmem:[%s912_s26 + $0x70] sm:$0xff] }
  0x1c   : > { %v322_v58 = vmax.f32 %v290_v48, 0.0  ;;  %v323_v59 = vmax.f32 %v291_v49, 0.0  ;;  %v307_v60 = vadd.f32 %v917_v3, %v270_v50  ;;  %v292_v61 = vadd.f32 %v917_v3, %v255_v51 }
  0x1d   : > { %786 = vmatmul.mubr.msk.bf16.vlgmr.msra.gmra.mrb[0].mxu1 %vm382_vm0, %v359_v54  ;;  %v338_v63 = vmax.f32 %v306_v55, 0.0  ;;  %v293_v0 = vadd.f32 %v917_v3, %v256_v56  ;;  %v271_v1 = vmul.f32 %v905_v2, %v234_v52  ;;  %v272_v4 = vmul.f32 %v905_v2, %v235_v53  ;;  %v227_v52 = vld [vmem:[%s912_s26 + $0x78] sm:$0xff] }
  0x1e   : > { %v352_v7 = vpack.c.bf16 %v323_v59, %v322_v58  ;;  %v339_v8 = vmax.f32 %v307_v60, 0.0  ;;  %v324_v9 = vmax.f32 %v292_v61, 0.0  ;;  %v257_v10 = vmul.f32 %v905_v2, %v220_v57  ;;  %v242_v61 = vld [vmem:[%s912_s26 + $0xf0] sm:$0xff] }
  0x1f   : > { %v325_v11 = vmax.f32 %v293_v0, 0.0  ;;  %v308_v12 = vadd.f32 %v917_v3, %v271_v1  ;;  %v309_v13 = vadd.f32 %v917_v3, %v272_v4  ;;  %v258_v14 = vmul.f32 %v905_v2, %v221_v62  ;;  %v243_v62 = vld [vmem:[%s912_s26 + $0xf8] sm:$0xff] }
  0x20   : > { %773 = vmatprep.mubr.msk.bf16.mxu0 %vm382_vm0, %v352_v7  ;;  %v360_v16 = vpack.c.bf16 %v339_v8, %v338_v63  ;;  %v294_v17 = vadd.f32 %v917_v3, %v257_v10  ;;  %v273_v18 = vmul.f32 %v905_v2, %v236_v5  ;;  %v274_v19 = vmul.f32 %v905_v2, %v237_v6 }
  0x21   : > { %v353_v22 = vpack.c.bf16 %v325_v11, %v324_v9  ;;  %v340_v23 = vmax.f32 %v308_v12, 0.0  ;;  %v341_v24 = vmax.f32 %v309_v13, 0.0  ;;  %v295_v25 = vadd.f32 %v917_v3, %v258_v14 }
  0x22   : > { %789 = vmatprep.mubr.msk.bf16.mxu1 %vm382_vm0, %v360_v16  ;;  %v326_v27 = vmax.f32 %v294_v17, 0.0  ;;  %v310_v28 = vadd.f32 %v917_v3, %v273_v18  ;;  %v311_v29 = vadd.f32 %v917_v3, %v274_v19  ;;  %v259_v30 = vmul.f32 %v905_v2, %v222_v15 }
  0x23   : > { %774 = vmatmul.mubr.msk.bf16.gmra.mrb[4].mxu0 %vm382_vm0, %v353_v22  ;;  %v361_v32 = vpack.c.bf16 %v341_v24, %v340_v23  ;;  %v327_v33 = vmax.f32 %v295_v25, 0.0  ;;  %v260_v34 = vmul.f32 %v905_v2, %v223_v20  ;;  %v275_v35 = vmul.f32 %v905_v2, %v238_v21 }
  0x24   : > { %v342_v37 = vmax.f32 %v310_v28, 0.0  ;;  %v343_v38 = vmax.f32 %v311_v29, 0.0  ;;  %v296_v39 = vadd.f32 %v917_v3, %v259_v30  ;;  %v276_v40 = vmul.f32 %v905_v2, %v239_v26 }
  0x25   : > { %790 = vmatmul.mubr.msk.bf16.gmra.mrb[4].mxu1 %vm382_vm0, %v361_v32  ;;  %v354_v42 = vpack.c.bf16 %v327_v33, %v326_v27  ;;  %v297_v43 = vadd.f32 %v917_v3, %v260_v34  ;;  %v312_v44 = vadd.f32 %v917_v3, %v275_v35  ;;  %v261_v45 = vmul.f32 %v905_v2, %v224_v31 }
  0x26   : > { %v362_v48 = vpack.c.bf16 %v343_v38, %v342_v37  ;;  %v328_v49 = vmax.f32 %v296_v39, 0.0  ;;  %v313_v50 = vadd.f32 %v917_v3, %v276_v40  ;;  %v262_v51 = vmul.f32 %v905_v2, %v225_v36 }
  0x27   : > { %777 = vmatprep.mubr.msk.bf16.mxu0 %vm382_vm0, %v354_v42  ;;  %v329_v53 = vmax.f32 %v297_v43, 0.0  ;;  %v344_v54 = vmax.f32 %v312_v44, 0.0  ;;  %v298_v55 = vadd.f32 %v917_v3, %v261_v45  ;;  %v277_v56 = vmul.f32 %v905_v2, %v240_v41 }
  0x28   : > { %793 = vmatprep.mubr.msk.bf16.mxu1 %vm382_vm0, %v362_v48  ;;  %v345_v57 = vmax.f32 %v313_v50, 0.0  ;;  %v299_v58 = vadd.f32 %v917_v3, %v262_v51  ;;  %v278_v59 = vmul.f32 %v905_v2, %v241_v46  ;;  %v263_v60 = vmul.f32 %v905_v2, %v226_v47 }
  0x29   : > { %v355_v63 = vpack.c.bf16 %v329_v53, %v328_v49  ;;  %v330_v0 = vmax.f32 %v298_v55, 0.0  ;;  %v314_v1 = vadd.f32 %v917_v3, %v277_v56  ;;  %v264_v4 = vmul.f32 %v905_v2, %v227_v52 }
  0x2a   : > { %v363_v5 = vpack.c.bf16 %v345_v57, %v344_v54  ;;  %v331_v6 = vmax.f32 %v299_v58, 0.0  ;;  %v315_v7 = vadd.f32 %v917_v3, %v278_v59  ;;  %v300_v8 = vadd.f32 %v917_v3, %v263_v60 }
  0x2b   : > { %778 = vmatmul.mubr.msk.bf16.gmra.mrb[8].mxu0 %vm382_vm0, %v355_v63  ;;  %v346_v9 = vmax.f32 %v314_v1, 0.0  ;;  %v301_v10 = vadd.f32 %v917_v3, %v264_v4  ;;  %v279_v11 = vmul.f32 %v905_v2, %v242_v61  ;;  %v280_v12 = vmul.f32 %v905_v2, %v243_v62 }
  0x2c   : > { %v356_v13 = vpack.c.bf16 %v331_v6, %v330_v0  ;;  %v347_v14 = vmax.f32 %v315_v7, 0.0  ;;  %v332_v15 = vmax.f32 %v300_v8, 0.0 }
  0x2d   : > { %794 = vmatmul.mubr.msk.bf16.gmra.mrb[8].mxu1 %vm382_vm0, %v363_v5  ;;  %v333_v16 = vmax.f32 %v301_v10, 0.0  ;;  %v316_v17 = vadd.f32 %v917_v3, %v279_v11  ;;  %v317_v18 = vadd.f32 %v917_v3, %v280_v12 }
  0x2e   : > { %781 = vmatprep.mubr.msk.bf16.mxu0 %vm382_vm0, %v356_v13  ;;  %v364_v19 = vpack.c.bf16 %v347_v14, %v346_v9 }
  0x2f   : > { %v357_v20 = vpack.c.bf16 %v333_v16, %v332_v15  ;;  %v348_v21 = vmax.f32 %v316_v17, 0.0  ;;  %v349_v22 = vmax.f32 %v317_v18, 0.0 }
  0x30   : > { %797 = vmatprep.mubr.msk.bf16.mxu1 %vm382_vm0, %v364_v19 }
  0x31   : > { %v365_v2 = vpack.c.bf16 %v349_v22, %v348_v21 }
  0x33   : > { %782 = vmatmul.mubr.msk.bf16.gmra.mrb[12].mxu0 %vm382_vm0, %v357_v20 }
  0x35   : > { %798 = vmatmul.mubr.msk.bf16.gmra.mrb[12].mxu1 %vm382_vm0, %v365_v2 }
  0xee   : > { %v771_v3 = vpop.f32.mrb[0].mxu0 }
  0xef   : > { %595 = vst.msk [vmem:[%s1036_s4 + $0x10] sm:$0xff] %vm592_vm1, %v771_v3  ;;  %v465_v23 = vpop.f32.mrb[1].mxu0 }
  0xf0   : > { %v787_v24 = vpop.f32.mrb[0].mxu1  ;;  %593 = vst.msk [vmem:[%s1036_s4] sm:$0xff] %vm592_vm1, %v465_v23  ;;  %v772_v25 = vpop.f32.mrb[2].mxu0 }
  0xf1   : > { %611 = vst.msk [vmem:[%s1036_s4 + $0x90] sm:$0xff] %vm592_vm1, %v787_v24  ;;  %v529_v26 = vpop.f32.mrb[1].mxu1  ;;  %596 = vst.msk [vmem:[%s1036_s4 + $0x18] sm:$0xff] %vm592_vm1, %v772_v25  ;;  %v468_v27 = vpop.f32.mrb[3].mxu0 }
  0xf2   : > { %609 = vst.msk [vmem:[%s1036_s4 + $0x80] sm:$0xff] %vm592_vm1, %v529_v26  ;;  %v788_v28 = vpop.f32.mrb[2].mxu1  ;;  %594 = vst.msk [vmem:[%s1036_s4 + $0x8] sm:$0xff] %vm592_vm1, %v468_v27 }
  0xf3   : > { %612 = vst.msk [vmem:[%s1036_s4 + $0x98] sm:$0xff] %vm592_vm1, %v788_v28  ;;  %v532_v29 = vpop.f32.mrb[3].mxu1 }
  0xf4   : > { %610 = vst.msk [vmem:[%s1036_s4 + $0x88] sm:$0xff] %vm592_vm1, %v532_v29 }
  0xf6   : > { %v775_v30 = vpop.f32.mrb[4].mxu0 }
  0xf7   : > { %599 = vst.msk [vmem:[%s1036_s4 + $0x30] sm:$0xff] %vm592_vm1, %v775_v30  ;;  %v481_v31 = vpop.f32.mrb[5].mxu0 }
  0xf8   : > { %v791_v32 = vpop.f32.mrb[4].mxu1  ;;  %597 = vst.msk [vmem:[%s1036_s4 + $0x20] sm:$0xff] %vm592_vm1, %v481_v31  ;;  %v776_v33 = vpop.f32.mrb[6].mxu0 }
  0xf9   : > { %615 = vst.msk [vmem:[%s1036_s4 + $0xb0] sm:$0xff] %vm592_vm1, %v791_v32  ;;  %v545_v34 = vpop.f32.mrb[5].mxu1  ;;  %600 = vst.msk [vmem:[%s1036_s4 + $0x38] sm:$0xff] %vm592_vm1, %v776_v33  ;;  %v484_v35 = vpop.f32.mrb[7].mxu0 }
  0xfa   : > { %613 = vst.msk [vmem:[%s1036_s4 + $0xa0] sm:$0xff] %vm592_vm1, %v545_v34  ;;  %v792_v36 = vpop.f32.mrb[6].mxu1  ;;  %598 = vst.msk [vmem:[%s1036_s4 + $0x28] sm:$0xff] %vm592_vm1, %v484_v35 }
  0xfb   : > { %616 = vst.msk [vmem:[%s1036_s4 + $0xb8] sm:$0xff] %vm592_vm1, %v792_v36  ;;  %v548_v37 = vpop.f32.mrb[7].mxu1 }
  0xfc   : > { %614 = vst.msk [vmem:[%s1036_s4 + $0xa8] sm:$0xff] %vm592_vm1, %v548_v37 }
  0xfe   : > { %v779_v38 = vpop.f32.mrb[8].mxu0 }
  0xff   : > { %603 = vst.msk [vmem:[%s1036_s4 + $0x50] sm:$0xff] %vm592_vm1, %v779_v38  ;;  %v497_v39 = vpop.f32.mrb[9].mxu0 }
 0x100   : > { %v795_v40 = vpop.f32.mrb[8].mxu1  ;;  %601 = vst.msk [vmem:[%s1036_s4 + $0x40] sm:$0xff] %vm592_vm1, %v497_v39  ;;  %v780_v41 = vpop.f32.mrb[10].mxu0 }
 0x101   : > { %619 = vst.msk [vmem:[%s1036_s4 + $0xd0] sm:$0xff] %vm592_vm1, %v795_v40  ;;  %v561_v42 = vpop.f32.mrb[9].mxu1  ;;  %604 = vst.msk [vmem:[%s1036_s4 + $0x58] sm:$0xff] %vm592_vm1, %v780_v41  ;;  %v500_v43 = vpop.f32.mrb[11].mxu0 }
 0x102   : > { %617 = vst.msk [vmem:[%s1036_s4 + $0xc0] sm:$0xff] %vm592_vm1, %v561_v42  ;;  %v796_v44 = vpop.f32.mrb[10].mxu1  ;;  %602 = vst.msk [vmem:[%s1036_s4 + $0x48] sm:$0xff] %vm592_vm1, %v500_v43 }
 0x103   : > { %620 = vst.msk [vmem:[%s1036_s4 + $0xd8] sm:$0xff] %vm592_vm1, %v796_v44  ;;  %v564_v45 = vpop.f32.mrb[11].mxu1 }
 0x104   : > { %618 = vst.msk [vmem:[%s1036_s4 + $0xc8] sm:$0xff] %vm592_vm1, %v564_v45 }
 0x106   : > { %v783_v46 = vpop.f32.mrb[12].mxu0 }
 0x107   : > { %607 = vst.msk [vmem:[%s1036_s4 + $0x70] sm:$0xff] %vm592_vm1, %v783_v46  ;;  %v513_v47 = vpop.f32.mrb[13].mxu0 }
 0x108   : > { %v799_v48 = vpop.f32.mrb[12].mxu1  ;;  %605 = vst.msk [vmem:[%s1036_s4 + $0x60] sm:$0xff] %vm592_vm1, %v513_v47  ;;  %v784_v49 = vpop.f32.mrb[14].mxu0 }
 0x109   : > { %623 = vst.msk [vmem:[%s1036_s4 + $0xf0] sm:$0xff] %vm592_vm1, %v799_v48  ;;  %v577_v50 = vpop.f32.mrb[13].mxu1  ;;  %608 = vst.msk [vmem:[%s1036_s4 + $0x78] sm:$0xff] %vm592_vm1, %v784_v49  ;;  %v516_v51 = vpop.f32.mrb[15].mxu0 }
 0x10a   : > { %621 = vst.msk [vmem:[%s1036_s4 + $0xe0] sm:$0xff] %vm592_vm1, %v577_v50  ;;  %v800_v52 = vpop.f32.mrb[14].mxu1  ;;  %606 = vst.msk [vmem:[%s1036_s4 + $0x68] sm:$0xff] %vm592_vm1, %v516_v51 }
 0x10b   : > { %624 = vst.msk [vmem:[%s1036_s4 + $0xf8] sm:$0xff] %vm592_vm1, %v800_v52  ;;  %v580_v53 = vpop.f32.mrb[15].mxu1 }
 0x10c   : > { %622 = vst.msk [vmem:[%s1036_s4 + $0xe8] sm:$0xff] %vm592_vm1, %v580_v53 }
 0x10d PF: > { %s13_s14 = sadd.s32 1, %s853_s14   ;;  %s1115_s12 = smov %s849_s13 }
 0x10e   : > { %p10_p5 = scmp.ge.s32.totalorder %s13_s14, 4   ;;  %s1116_s13 = smov %s1118_s15 }
 0x110   :  { %12 = sbr.rel (!%p10_p5) target bundleno = 2 (0x2), region = 65 }

// kernel: generator_forward.15
= control target key start
LH: loop header
LB: loop body
LE: loop exit
PB: predicated region body
PF: predicated region fallthrough
CT: control target
= control target key end

     0   :  { %s88_s0 = inlined_call_operand.vmem [shape: f32[2,3072], index: 0, kind: input, shape index: {}]   ;;  %s89_s1 = inlined_call_operand.vmem [shape: f32[2,3072], index: 1, kind: output, shape index: {}]  }
   0x1   :  { %v8_v0 = vld [vmem:[%s88_s0] sm:$0xff]  ;;  %v9_v1 = vld [vmem:[%s88_s0 + $0x8] sm:$0xff]  ;;  %v10_v2 = vld [vmem:[%s88_s0 + $0x10] sm:$0xff] }
   0x2   :  { %30 = vtanh.f32 %v8_v0  ;;  %v11_v3 = vld [vmem:[%s88_s0 + $0x18] sm:$0xff]  ;;  %v12_v4 = vld [vmem:[%s88_s0 + $0x20] sm:$0xff]  ;;  %v13_v5 = vld [vmem:[%s88_s0 + $0x28] sm:$0xff] }
   0x3   :  { %32 = vtanh.f32 %v9_v1 }
   0x4   :  { %34 = vtanh.f32 %v10_v2 }
   0x5   :  { %36 = vtanh.f32 %v11_v3 }
   0x6   :  { %38 = vtanh.f32 %v12_v4 }
   0x7   :  { %40 = vtanh.f32 %v13_v5 }
   0xc   :  { %v31_v6 = vpop.eup %30 }
   0xd   :  { %v33_v7 = vpop.eup %32  ;;  %20 = vst [vmem:[%s89_s1] sm:$0xff] %v31_v6 }
   0xe   :  { %v35_v8 = vpop.eup %34  ;;  %21 = vst [vmem:[%s89_s1 + $0x8] sm:$0xff] %v33_v7 }
   0xf   :  { %v37_v9 = vpop.eup %36  ;;  %22 = vst [vmem:[%s89_s1 + $0x10] sm:$0xff] %v35_v8 }
  0x10   :  { %v39_v10 = vpop.eup %38  ;;  %23 = vst [vmem:[%s89_s1 + $0x18] sm:$0xff] %v37_v9 }
  0x11   :  { %v41_v11 = vpop.eup %40  ;;  %24 = vst [vmem:[%s89_s1 + $0x20] sm:$0xff] %v39_v10 }
  0x12   :  { %25 = vst [vmem:[%s89_s1 + $0x28] sm:$0xff] %v41_v11 }

</bundles_post_ra>
